<compile_context>
chip_gen: v7x
topology: tpu7x:2x2x1
jax: 0.10.0
libtpu: 0.0.40
codegen_flags: <defaults>
</compile_context>

<pallas_src>
import functools

import numpy as np
import jax
import jax.numpy as jnp
from jax import lax
from jax.experimental import pallas as pl
from jax.experimental.pallas import tpu as pltpu


# ----------------------------- small host helpers ---------------------------

def _up_matrix_1d(n):
    """Exact 1-D bilinear 2x upsample operator, PyTorch align_corners=False."""
    u = np.zeros((2 * n, n), dtype=np.float32)
    for k in range(n):
        u[2 * k, k] += 0.75
        u[2 * k, max(k - 1, 0)] += 0.25
        u[2 * k + 1, k] += 0.75
        u[2 * k + 1, min(k + 1, n - 1)] += 0.25
    return u


def _upsample_opT(h, w):
    """Full 2x bilinear operator (transposed): (h*w, 4*h*w) so that
    out(c, 4hw) = x(c, hw) @ opT.  Small at this size (64 KiB)."""
    op = np.kron(_up_matrix_1d(h), _up_matrix_1d(w))    # (2h*2w, h*w)
    return jnp.asarray(np.ascontiguousarray(op.T))


def _pool_selector(h, w):
    """0/1 selector (h*w, h*w/4) picking the even-row/even-col positions of the
    4-way shifted max; finishes the 2x2 max pool as ONE matmul."""
    ho, wo = h // 2, w // 2
    sel = np.zeros((h * w, ho * wo), np.float32)
    for a in range(ho):
        for b in range(wo):
            sel[(2 * a) * w + 2 * b, a * wo + b] = 1.0
    return jnp.asarray(sel)


def _edge_masks(h, w):
    """(1, h*w) masks zeroing the column that would wrap across a row boundary
    for the dx=0 (left) and dx=2 (right) conv taps."""
    j = np.arange(h * w) % w
    ml = (j >= 1).astype(np.float32).reshape(1, h * w)
    mr = (j <= w - 2).astype(np.float32).reshape(1, h * w)
    return jnp.asarray(ml), jnp.asarray(mr)


def _prep_conv3(w, b):
    """(3,3,cin,cout) -> per-tap (9, cout, cin) weights (exact cin, no slot
    padding) and bias -> (cout, 1) for lane-broadcast."""
    _, _, cin, cout = w.shape
    w9 = jnp.transpose(w.reshape(9, cin, cout).astype(jnp.float32), (0, 2, 1))
    return w9, b.reshape(cout, 1).astype(jnp.float32)


def _const_map(rank):
    zeros = (0,) * rank
    return lambda b: zeros


# --------------------------------- the kernel -------------------------------

def _unet_kernel(*refs, in_channels, out_channels, filters, H, W):
    f32 = jnp.float32
    L = len(filters)

    it = iter(refs)

    def take(n):
        return [next(it) for _ in range(n)]

    (x_ref,) = take(1)
    blk = {"inc": take(4)}
    for i in range(1, L):
        blk[f"down{i}"] = take(4)
    for i in range(1, L):
        blk[f"up{i}"] = take(4)
    w_out_ref, b_out_ref = take(2)
    pool_sels = take(L - 1)
    up_ops = take(L - 1)
    masks = [take(2) for _ in range(L)]
    (o_ref,) = take(1)
    S_refs = take(L)

    def geom(level):
        Wl = W >> level
        hw = (H >> level) * Wl
        return Wl, hw, Wl + 1          # row width, flat size, flat border pad

    # Zero ONLY the left/right border columns of each staging buffer, every
    # program (megacore-safe -- each TensorCore has its own scratch).  Interiors
    # are fully rewritten before use; rows beyond the current cin are never read.
    for level, S in enumerate(S_refs):
        _, hw, pad = geom(level)
        zer = jnp.zeros((S.shape[0], pad), f32)
        S[:, :pad] = zer
        S[:, pad + hw:] = zer

    def store_rows(level, val, row0):
        """Stage a (c, hw) slab into the interior of the level's flat buffer."""
        _, hw, pad = geom(level)
        S_refs[level][row0:row0 + val.shape[0], pad:pad + hw] = val

    def conv3x3(level, cin, w_ref, b_ref):
        """relu(3x3 conv + bias).  Input already staged in S_refs[level][:cin].
        9 per-tap matmuls accumulating a lane-dense (cout, hw) slab; vertical
        taps get their zero padding from the buffer borders, horizontal taps
        from the edge masks (row-wrap is masked)."""
        Wl, hw, pad = geom(level)
        S = S_refs[level]
        ml = masks[level][0][...]
        mr = masks[level][1][...]
        acc = None
        for t in range(9):
            dy, dx = divmod(t, 3)
            off = (dy - 1) * Wl + (dx - 1)
            xs = S[:cin, pad + off:pad + off + hw]          # (cin, hw) window
            if dx == 0:
                xs = xs * ml
            elif dx == 2:
                xs = xs * mr
            part = jnp.dot(w_ref[t], xs, preferred_element_type=f32)
            acc = part if acc is None else acc + part
        return jnp.maximum(acc + b_ref[...], 0.0)

    def double_conv(level, x, cin, wrefs):
        w1, b1, w2, b2 = wrefs
        store_rows(level, x, 0)
        y = conv3x3(level, cin, w1, b1)
        store_rows(level, y, 0)
        return conv3x3(level, y.shape[0], w2, b2)

    def maxpool2(level, x, sel_ref):
        """2x2/stride-2 max pool: 3 shifted-window maxes (offsets +1, +W, +W+1
        read from the staged copy; borders are zero) + one selector matmul."""
        Wl, hw, pad = geom(level)
        S = S_refs[level]
        c = x.shape[0]
        store_rows(level, x, 0)
        m = x
        for off in (1, Wl, Wl + 1):
            m = jnp.maximum(m, S[:c, pad + off:pad + off + hw])
        return jnp.dot(m, sel_ref[...], preferred_element_type=f32)

    # ---------------- forward pass (one batch element, all in VMEM) ----------
    x = x_ref[0]                                        # (Cin, H*W), lane-dense
    x = double_conv(0, x, in_channels, blk["inc"])
    skips = [(x, filters[0])]
    lvl = 0
    for i in range(1, L):                               # Down: maxpool + DoubleConv
        x = maxpool2(lvl, x, pool_sels[i - 1])
        lvl += 1
        x = double_conv(lvl, x, filters[i - 1], blk[f"down{i}"])
        skips.insert(0, (x, filters[i]))
    for i in range(1, L):                               # Up: upsample, cat, DoubleConv
        x1 = jnp.dot(x, up_ops[i - 1][...], preferred_element_type=f32)
        lvl -= 1
        skip, c_skip = skips[i]
        store_rows(lvl, skip, 0)                        # torch.cat([x2, x1], dim=1)
        store_rows(lvl, x1, c_skip)
        cin_u = filters[i] + filters[i - 1]
        w1, b1, w2, b2 = blk[f"up{i}"]
        y = conv3x3(lvl, cin_u, w1, b1)
        store_rows(lvl, y, 0)
        x = conv3x3(lvl, cin_u // 2, w2, b2)
    # outc: 1x1 conv, no activation; (Cout, f0) @ (f0, H*W) -> lane-dense store.
    o_ref[0] = jnp.dot(w_out_ref[...], x, preferred_element_type=f32) + b_out_ref[...]


# --------------------------- parameters & forward ---------------------------

def init_unet_params(key, in_channels, out_channels, filters):
    """Conv weights ~ U(-1/sqrt(fan_in), 1/sqrt(fan_in)); all conv biases zero
    (the PyTorch module wraps convs in _bias0)."""
    params = {}
    keys = iter(jax.random.split(key, 64))

    def conv_param(k, kh, kw, cin, cout):
        bound = 1.0 / np.sqrt(cin * kh * kw)
        w = jax.random.uniform(k, (kh, kw, cin, cout), jnp.float32, -bound, bound)
        b = jnp.zeros((cout,), jnp.float32)
        return w, b

    def double_conv(name, cin, cout, cmid):
        params[f"{name}_w1"], params[f"{name}_b1"] = conv_param(next(keys), 3, 3, cin, cmid)
        params[f"{name}_w2"], params[f"{name}_b2"] = conv_param(next(keys), 3, 3, cmid, cout)

    levels = len(filters)
    double_conv("inc", in_channels, filters[0], filters[0])
    for i in range(1, levels):
        double_conv(f"down{i}", filters[i - 1], filters[i], filters[i])
        cin_up = filters[i] + filters[i - 1]
        double_conv(f"up{i}", cin_up, filters[i - 1], cin_up // 2)
    w, b = conv_param(next(keys), 1, 1, filters[0], out_channels)
    params["outc_w"] = w[0, 0]        # (Cin, Cout)
    params["outc_b"] = b
    return params


def unet_forward(params, x_nchw, filters):
    """UNet.forward (batch_norm=False, ReLU, periodic=False, DoubleConv blocks).
    Input/output are NCHW like the PyTorch module; the whole network runs in a
    single Pallas kernel and activations never leave VMEM."""
    filters = tuple(filters)
    L = len(filters)
    x_nchw = x_nchw.astype(jnp.float32)
    B, Cin, H, W = x_nchw.shape
    Cout = params["outc_w"].shape[-1]

    # conv input-channel bookkeeping -> per-level staging-buffer row counts
    conv_cins_at = [[] for _ in range(L)]
    conv_cins_at[0] += [Cin, filters[0]]                       # inc
    for i in range(1, L):
        conv_cins_at[i] += [filters[i - 1], filters[i]]        # down{i}
        cu = filters[i] + filters[i - 1]
        conv_cins_at[L - 1 - i] += [cu, cu // 2]               # up{i}
    stage_rows = [max(max(cs), filters[l]) for l, cs in enumerate(conv_cins_at)]

    # ---- kernel inputs in a fixed order (must match _unet_kernel unpacking) --
    inputs = [x_nchw.reshape(B, Cin, H * W)]                   # native NCHW, no transpose

    def add_block(name):
        w1, b1 = _prep_conv3(params[f"{name}_w1"], params[f"{name}_b1"])
        w2, b2 = _prep_conv3(params[f"{name}_w2"], params[f"{name}_b2"])
        inputs.extend([w1, b1, w2, b2])

    add_block("inc")
    for i in range(1, L):
        add_block(f"down{i}")
    for i in range(1, L):
        add_block(f"up{i}")
    inputs.append(jnp.transpose(params["outc_w"]).astype(jnp.float32))   # (Cout, f0)
    inputs.append(params["outc_b"].reshape(Cout, 1).astype(jnp.float32))
    for i in range(1, L):                                  # max-pool selectors
        inputs.append(_pool_selector(H >> (i - 1), W >> (i - 1)))
    for i in range(1, L):                                  # upsample operators
        lvl_src = L - i
        inputs.append(_upsample_opT(H >> lvl_src, W >> lvl_src))
    for l in range(L):                                     # horizontal-tap edge masks
        ml, mr = _edge_masks(H >> l, W >> l)
        inputs.extend([ml, mr])

    in_specs = [pl.BlockSpec((1, Cin, H * W), lambda b: (b, 0, 0))]
    in_specs += [pl.BlockSpec(a.shape, _const_map(a.ndim)) for a in inputs[1:]]

    # One flat, border-padded staging buffer per level: (rows, hw + 2*(W_l+1)).
    scratch = []
    for l in range(L):
        Wl, Hl = W >> l, H >> l
        scratch.append(pltpu.VMEM((stage_rows[l], Hl * Wl + 2 * (Wl + 1)), jnp.float32))

    kernel = functools.partial(
        _unet_kernel, in_channels=Cin, out_channels=Cout, filters=filters, H=H, W=W)

    out = pl.pallas_call(
        kernel,
        out_shape=jax.ShapeDtypeStruct((B, Cout, H * W), jnp.float32),
        grid=(B,),
        in_specs=in_specs,
        out_specs=pl.BlockSpec((1, Cout, H * W), lambda b: (b, 0, 0)),
        scratch_shapes=scratch,
        compiler_params=pltpu.CompilerParams(dimension_semantics=("parallel",)),
    )(*inputs)
    return out.reshape(B, Cout, H, W)


# ------------------------------ pure-JAX reference ---------------------------

def _reference_forward(params, x_nchw, filters):
    """Plain-XLA reference of the same forward pass (for self-checking)."""
    L = len(filters)
    x = jnp.transpose(x_nchw, (0, 2, 3, 1)).astype(jnp.float32)
    dn = ("NHWC", "HWIO", "NHWC")

    def conv3(h, w, b):
        y = lax.conv_general_dilated(h, w, (1, 1), "SAME", dimension_numbers=dn)
        return jax.nn.relu(y + b)

    def dconv(name, h):
        h = conv3(h, params[f"{name}_w1"], params[f"{name}_b1"])
        return conv3(h, params[f"{name}_w2"], params[f"{name}_b2"])

    def pool(h):
        b, hh, ww, c = h.shape
        return jnp.max(h.reshape(b, hh // 2, 2, ww // 2, 2, c), axis=(2, 4))

    def upsample(h):
        _, hh, ww, _ = h.shape
        uh = jnp.asarray(_up_matrix_1d(hh))
        uw = jnp.asarray(_up_matrix_1d(ww))
        return jnp.einsum("Yh,Xw,bhwc->bYXc", uh, uw, h)

    x = dconv("inc", x)
    xs = [x]
    for i in range(1, L):
        x = dconv(f"down{i}", pool(x))
        xs.insert(0, x)
    for i in range(1, L):
        x1 = upsample(x)
        x = dconv(f"up{i}", jnp.concatenate([xs[i], x1], axis=-1))
    y = jnp.einsum("bhwc,co->bhwo", x, params["outc_w"]) + params["outc_b"]
    return jnp.transpose(y, (0, 3, 1, 2))


# ----------------------------------- main -----------------------------------

if __name__ == "__main__":
    B, Cin, Cout, H, W = 2, 4, 3, 16, 16
    filters = (8, 16)

    key = jax.random.PRNGKey(0)
    kx, kp = jax.random.split(key)
    x = jax.random.normal(kx, (B, Cin, H, W), jnp.float32)
    params = init_unet_params(kp, Cin, Cout, filters)

    fwd = jax.jit(functools.partial(unet_forward, filters=filters))
    y = jax.block_until_ready(fwd(params, x))

    assert y.shape == (B, Cout, H, W), y.shape
    assert y.dtype == jnp.float32
    assert bool(jnp.all(jnp.isfinite(y)))

    y_ref = jax.block_until_ready(_reference_forward(params, x, filters))
    max_err = float(jnp.max(jnp.abs(y - y_ref)))
    assert max_err < 1e-2, f"mismatch vs reference: {max_err}"

    print("KERNEL_OK")
</pallas_src>

<mosaic_0001>
module attributes {stable_mosaic.version = 11 : i64} {
  func.func @_unet_kernel(%arg0: i32, %arg1: memref<1x4x256xf32, #tpu.memory_space<vmem>>, %arg2: memref<9x8x4xf32, #tpu.memory_space<vmem>>, %arg3: memref<8x1xf32, #tpu.memory_space<vmem>>, %arg4: memref<9x8x8xf32, #tpu.memory_space<vmem>>, %arg5: memref<8x1xf32, #tpu.memory_space<vmem>>, %arg6: memref<9x16x8xf32, #tpu.memory_space<vmem>>, %arg7: memref<16x1xf32, #tpu.memory_space<vmem>>, %arg8: memref<9x16x16xf32, #tpu.memory_space<vmem>>, %arg9: memref<16x1xf32, #tpu.memory_space<vmem>>, %arg10: memref<9x12x24xf32, #tpu.memory_space<vmem>>, %arg11: memref<12x1xf32, #tpu.memory_space<vmem>>, %arg12: memref<9x8x12xf32, #tpu.memory_space<vmem>>, %arg13: memref<8x1xf32, #tpu.memory_space<vmem>>, %arg14: memref<3x8xf32, #tpu.memory_space<vmem>>, %arg15: memref<3x1xf32, #tpu.memory_space<vmem>>, %arg16: memref<256x64xf32, #tpu.memory_space<vmem>>, %arg17: memref<64x256xf32, #tpu.memory_space<vmem>>, %arg18: memref<1x256xf32, #tpu.memory_space<vmem>>, %arg19: memref<1x256xf32, #tpu.memory_space<vmem>>, %arg20: memref<1x64xf32, #tpu.memory_space<vmem>>, %arg21: memref<1x64xf32, #tpu.memory_space<vmem>>, %arg22: memref<1x3x256xf32, #tpu.memory_space<vmem>>, %arg23: memref<24x290xf32, #tpu.memory_space<vmem>>, %arg24: memref<16x82xf32, #tpu.memory_space<vmem>>) attributes {dimension_semantics = [#tpu.dimension_semantics<parallel>], iteration_bounds = array<i64: 2>, scalar_prefetch = 0 : i64, scratch_operands = 2 : i64, tpu.core_type = #tpu.core_type<tc>, window_params = [{transform_indices = @transform_0, window_bounds = array<i64: 1, 4, 256>}, {pipeline_mode = #tpu.pipeline_mode<synchronous>, transform_indices = @transform_1, window_bounds = array<i64: 9, 8, 4>}, {pipeline_mode = #tpu.pipeline_mode<synchronous>, transform_indices = @transform_2, window_bounds = array<i64: 8, 1>}, {pipeline_mode = #tpu.pipeline_mode<synchronous>, transform_indices = @transform_3, window_bounds = array<i64: 9, 8, 8>}, {pipeline_mode = #tpu.pipeline_mode<synchronous>, transform_indices = @transform_4, window_bounds = array<i64: 8, 1>}, {pipeline_mode = #tpu.pipeline_mode<synchronous>, transform_indices = @transform_5, window_bounds = array<i64: 9, 16, 8>}, {pipeline_mode = #tpu.pipeline_mode<synchronous>, transform_indices = @transform_6, window_bounds = array<i64: 16, 1>}, {pipeline_mode = #tpu.pipeline_mode<synchronous>, transform_indices = @transform_7, window_bounds = array<i64: 9, 16, 16>}, {pipeline_mode = #tpu.pipeline_mode<synchronous>, transform_indices = @transform_8, window_bounds = array<i64: 16, 1>}, {pipeline_mode = #tpu.pipeline_mode<synchronous>, transform_indices = @transform_9, window_bounds = array<i64: 9, 12, 24>}, {pipeline_mode = #tpu.pipeline_mode<synchronous>, transform_indices = @transform_10, window_bounds = array<i64: 12, 1>}, {pipeline_mode = #tpu.pipeline_mode<synchronous>, transform_indices = @transform_11, window_bounds = array<i64: 9, 8, 12>}, {pipeline_mode = #tpu.pipeline_mode<synchronous>, transform_indices = @transform_12, window_bounds = array<i64: 8, 1>}, {pipeline_mode = #tpu.pipeline_mode<synchronous>, transform_indices = @transform_13, window_bounds = array<i64: 3, 8>}, {pipeline_mode = #tpu.pipeline_mode<synchronous>, transform_indices = @transform_14, window_bounds = array<i64: 3, 1>}, {pipeline_mode = #tpu.pipeline_mode<synchronous>, transform_indices = @transform_15, window_bounds = array<i64: 256, 64>}, {pipeline_mode = #tpu.pipeline_mode<synchronous>, transform_indices = @transform_16, window_bounds = array<i64: 64, 256>}, {pipeline_mode = #tpu.pipeline_mode<synchronous>, transform_indices = @transform_17, window_bounds = array<i64: 1, 256>}, {pipeline_mode = #tpu.pipeline_mode<synchronous>, transform_indices = @transform_18, window_bounds = array<i64: 1, 256>}, {pipeline_mode = #tpu.pipeline_mode<synchronous>, transform_indices = @transform_19, window_bounds = array<i64: 1, 64>}, {pipeline_mode = #tpu.pipeline_mode<synchronous>, transform_indices = @transform_20, window_bounds = array<i64: 1, 64>}, {transform_indices = @transform_21, window_bounds = array<i64: 1, 3, 256>}]} {
    %cst = arith.constant 0.000000e+00 : f32
    %0 = vector.broadcast %cst : f32 to vector<24x17xf32>
    %c0 = arith.constant 0 : index
    %c0_0 = arith.constant 0 : index
    %1 = vector.load %arg23[%c0, %c0_0] : memref<24x290xf32, #tpu.memory_space<vmem>>, vector<24x17xf32>
    tpu.vector_store %arg23[%c0, %c0_0], %0 {strides = array<i32>} : memref<24x290xf32, #tpu.memory_space<vmem>>, vector<24x17xf32>,
    %c0_1 = arith.constant 0 : index
    %c273 = arith.constant 273 : index
    %2 = vector.load %arg23[%c0_1, %c273] : memref<24x290xf32, #tpu.memory_space<vmem>>, vector<24x17xf32>
    tpu.vector_store %arg23[%c0_1, %c273], %0 {strides = array<i32>} : memref<24x290xf32, #tpu.memory_space<vmem>>, vector<24x17xf32>,
    %cst_2 = arith.constant 0.000000e+00 : f32
    %3 = vector.broadcast %cst_2 : f32 to vector<16x9xf32>
    %c0_3 = arith.constant 0 : index
    %c0_4 = arith.constant 0 : index
    %4 = vector.load %arg24[%c0_3, %c0_4] : memref<16x82xf32, #tpu.memory_space<vmem>>, vector<16x9xf32>
    tpu.vector_store %arg24[%c0_3, %c0_4], %3 {strides = array<i32>} : memref<16x82xf32, #tpu.memory_space<vmem>>, vector<16x9xf32>,
    %c0_5 = arith.constant 0 : index
    %c73 = arith.constant 73 : index
    %5 = vector.load %arg24[%c0_5, %c73] : memref<16x82xf32, #tpu.memory_space<vmem>>, vector<16x9xf32>
    tpu.vector_store %arg24[%c0_5, %c73], %3 {strides = array<i32>} : memref<16x82xf32, #tpu.memory_space<vmem>>, vector<16x9xf32>,
    %c0_6 = arith.constant 0 : index
    %c0_7 = arith.constant 0 : index
    %c0_8 = arith.constant 0 : index
    %6 = vector.load %arg1[%c0_6, %c0_7, %c0_8] : memref<1x4x256xf32, #tpu.memory_space<vmem>>, vector<1x4x256xf32>
    %7 = vector.shape_cast %6 : vector<1x4x256xf32> to vector<4x256xf32>
    %c0_9 = arith.constant 0 : index
    %c17 = arith.constant 17 : index
    %8 = vector.load %arg23[%c0_9, %c17] : memref<24x290xf32, #tpu.memory_space<vmem>>, vector<4x256xf32>
    tpu.vector_store %arg23[%c0_9, %c17], %7 {strides = array<i32>} : memref<24x290xf32, #tpu.memory_space<vmem>>, vector<4x256xf32>,
    %c0_10 = arith.constant 0 : index
    %c0_11 = arith.constant 0 : index
    %9 = vector.load %arg18[%c0_10, %c0_11] : memref<1x256xf32, #tpu.memory_space<vmem>>, vector<1x256xf32>
    %c0_12 = arith.constant 0 : index
    %c0_13 = arith.constant 0 : index
    %10 = vector.load %arg19[%c0_12, %c0_13] : memref<1x256xf32, #tpu.memory_space<vmem>>, vector<1x256xf32>
    %c0_14 = arith.constant 0 : index
    %c0_15 = arith.constant 0 : index
    %11 = vector.load %arg23[%c0_14, %c0_15] : memref<24x290xf32, #tpu.memory_space<vmem>>, vector<4x256xf32>
    %12 = vector.broadcast %9 : vector<1x256xf32> to vector<4x256xf32>
    %13 = arith.mulf %11, %12 : vector<4x256xf32>
    %c0_16 = arith.constant 0 : index
    %c0_17 = arith.constant 0 : index
    %c0_18 = arith.constant 0 : index
    %14 = vector.load %arg2[%c0_16, %c0_17, %c0_18] : memref<9x8x4xf32, #tpu.memory_space<vmem>>, vector<1x8x4xf32>
    %15 = vector.shape_cast %14 : vector<1x8x4xf32> to vector<8x4xf32>
    %cst_19 = arith.constant dense<0.000000e+00> : vector<8x256xf32>
    %16 = tpu.matmul %15, %13, %cst_19 {dimension_numbers = #tpu.dot_dimension_numbers<[1], [0], [0], [1], [0, 0, 1, 1], [], []>} : vector<8x4xf32>, vector<4x256xf32>, vector<8x256xf32> -> vector<8x256xf32>
    %c0_20 = arith.constant 0 : index
    %c1 = arith.constant 1 : index
    %17 = vector.load %arg23[%c0_20, %c1] : memref<24x290xf32, #tpu.memory_space<vmem>>, vector<4x256xf32>
    %c1_21 = arith.constant 1 : index
    %c0_22 = arith.constant 0 : index
    %c0_23 = arith.constant 0 : index
    %18 = vector.load %arg2[%c1_21, %c0_22, %c0_23] : memref<9x8x4xf32, #tpu.memory_space<vmem>>, vector<1x8x4xf32>
    %19 = vector.shape_cast %18 : vector<1x8x4xf32> to vector<8x4xf32>
    %cst_24 = arith.constant dense<0.000000e+00> : vector<8x256xf32>
    %20 = tpu.matmul %19, %17, %cst_24 {dimension_numbers = #tpu.dot_dimension_numbers<[1], [0], [0], [1], [0, 0, 1, 1], [], []>} : vector<8x4xf32>, vector<4x256xf32>, vector<8x256xf32> -> vector<8x256xf32>
    %21 = arith.addf %16, %20 : vector<8x256xf32>
    %c0_25 = arith.constant 0 : index
    %c2 = arith.constant 2 : index
    %22 = vector.load %arg23[%c0_25, %c2] : memref<24x290xf32, #tpu.memory_space<vmem>>, vector<4x256xf32>
    %23 = vector.broadcast %10 : vector<1x256xf32> to vector<4x256xf32>
    %24 = arith.mulf %22, %23 : vector<4x256xf32>
    %c2_26 = arith.constant 2 : index
    %c0_27 = arith.constant 0 : index
    %c0_28 = arith.constant 0 : index
    %25 = vector.load %arg2[%c2_26, %c0_27, %c0_28] : memref<9x8x4xf32, #tpu.memory_space<vmem>>, vector<1x8x4xf32>
    %26 = vector.shape_cast %25 : vector<1x8x4xf32> to vector<8x4xf32>
    %cst_29 = arith.constant dense<0.000000e+00> : vector<8x256xf32>
    %27 = tpu.matmul %26, %24, %cst_29 {dimension_numbers = #tpu.dot_dimension_numbers<[1], [0], [0], [1], [0, 0, 1, 1], [], []>} : vector<8x4xf32>, vector<4x256xf32>, vector<8x256xf32> -> vector<8x256xf32>
    %28 = arith.addf %21, %27 : vector<8x256xf32>
    %c0_30 = arith.constant 0 : index
    %c16 = arith.constant 16 : index
    %29 = vector.load %arg23[%c0_30, %c16] : memref<24x290xf32, #tpu.memory_space<vmem>>, vector<4x256xf32>
    %30 = vector.broadcast %9 : vector<1x256xf32> to vector<4x256xf32>
    %31 = arith.mulf %29, %30 : vector<4x256xf32>
    %c3 = arith.constant 3 : index
    %c0_31 = arith.constant 0 : index
    %c0_32 = arith.constant 0 : index
    %32 = vector.load %arg2[%c3, %c0_31, %c0_32] : memref<9x8x4xf32, #tpu.memory_space<vmem>>, vector<1x8x4xf32>
    %33 = vector.shape_cast %32 : vector<1x8x4xf32> to vector<8x4xf32>
    %cst_33 = arith.constant dense<0.000000e+00> : vector<8x256xf32>
    %34 = tpu.matmul %33, %31, %cst_33 {dimension_numbers = #tpu.dot_dimension_numbers<[1], [0], [0], [1], [0, 0, 1, 1], [], []>} : vector<8x4xf32>, vector<4x256xf32>, vector<8x256xf32> -> vector<8x256xf32>
    %35 = arith.addf %28, %34 : vector<8x256xf32>
    %c0_34 = arith.constant 0 : index
    %c17_35 = arith.constant 17 : index
    %36 = vector.load %arg23[%c0_34, %c17_35] : memref<24x290xf32, #tpu.memory_space<vmem>>, vector<4x256xf32>
    %c4 = arith.constant 4 : index
    %c0_36 = arith.constant 0 : index
    %c0_37 = arith.constant 0 : index
    %37 = vector.load %arg2[%c4, %c0_36, %c0_37] : memref<9x8x4xf32, #tpu.memory_space<vmem>>, vector<1x8x4xf32>
    %38 = vector.shape_cast %37 : vector<1x8x4xf32> to vector<8x4xf32>
    %cst_38 = arith.constant dense<0.000000e+00> : vector<8x256xf32>
    %39 = tpu.matmul %38, %36, %cst_38 {dimension_numbers = #tpu.dot_dimension_numbers<[1], [0], [0], [1], [0, 0, 1, 1], [], []>} : vector<8x4xf32>, vector<4x256xf32>, vector<8x256xf32> -> vector<8x256xf32>
    %40 = arith.addf %35, %39 : vector<8x256xf32>
    %c0_39 = arith.constant 0 : index
    %c18 = arith.constant 18 : index
    %41 = vector.load %arg23[%c0_39, %c18] : memref<24x290xf32, #tpu.memory_space<vmem>>, vector<4x256xf32>
    %42 = vector.broadcast %10 : vector<1x256xf32> to vector<4x256xf32>
    %43 = arith.mulf %41, %42 : vector<4x256xf32>
    %c5 = arith.constant 5 : index
    %c0_40 = arith.constant 0 : index
    %c0_41 = arith.constant 0 : index
    %44 = vector.load %arg2[%c5, %c0_40, %c0_41] : memref<9x8x4xf32, #tpu.memory_space<vmem>>, vector<1x8x4xf32>
    %45 = vector.shape_cast %44 : vector<1x8x4xf32> to vector<8x4xf32>
    %cst_42 = arith.constant dense<0.000000e+00> : vector<8x256xf32>
    %46 = tpu.matmul %45, %43, %cst_42 {dimension_numbers = #tpu.dot_dimension_numbers<[1], [0], [0], [1], [0, 0, 1, 1], [], []>} : vector<8x4xf32>, vector<4x256xf32>, vector<8x256xf32> -> vector<8x256xf32>
    %47 = arith.addf %40, %46 : vector<8x256xf32>
    %c0_43 = arith.constant 0 : index
    %c32 = arith.constant 32 : index
    %48 = vector.load %arg23[%c0_43, %c32] : memref<24x290xf32, #tpu.memory_space<vmem>>, vector<4x256xf32>
    %49 = vector.broadcast %9 : vector<1x256xf32> to vector<4x256xf32>
    %50 = arith.mulf %48, %49 : vector<4x256xf32>
    %c6 = arith.constant 6 : index
    %c0_44 = arith.constant 0 : index
    %c0_45 = arith.constant 0 : index
    %51 = vector.load %arg2[%c6, %c0_44, %c0_45] : memref<9x8x4xf32, #tpu.memory_space<vmem>>, vector<1x8x4xf32>
    %52 = vector.shape_cast %51 : vector<1x8x4xf32> to vector<8x4xf32>
    %cst_46 = arith.constant dense<0.000000e+00> : vector<8x256xf32>
    %53 = tpu.matmul %52, %50, %cst_46 {dimension_numbers = #tpu.dot_dimension_numbers<[1], [0], [0], [1], [0, 0, 1, 1], [], []>} : vector<8x4xf32>, vector<4x256xf32>, vector<8x256xf32> -> vector<8x256xf32>
    %54 = arith.addf %47, %53 : vector<8x256xf32>
    %c0_47 = arith.constant 0 : index
    %c33 = arith.constant 33 : index
    %55 = vector.load %arg23[%c0_47, %c33] : memref<24x290xf32, #tpu.memory_space<vmem>>, vector<4x256xf32>
    %c7 = arith.constant 7 : index
    %c0_48 = arith.constant 0 : index
    %c0_49 = arith.constant 0 : index
    %56 = vector.load %arg2[%c7, %c0_48, %c0_49] : memref<9x8x4xf32, #tpu.memory_space<vmem>>, vector<1x8x4xf32>
    %57 = vector.shape_cast %56 : vector<1x8x4xf32> to vector<8x4xf32>
    %cst_50 = arith.constant dense<0.000000e+00> : vector<8x256xf32>
    %58 = tpu.matmul %57, %55, %cst_50 {dimension_numbers = #tpu.dot_dimension_numbers<[1], [0], [0], [1], [0, 0, 1, 1], [], []>} : vector<8x4xf32>, vector<4x256xf32>, vector<8x256xf32> -> vector<8x256xf32>
    %59 = arith.addf %54, %58 : vector<8x256xf32>
    %c0_51 = arith.constant 0 : index
    %c34 = arith.constant 34 : index
    %60 = vector.load %arg23[%c0_51, %c34] : memref<24x290xf32, #tpu.memory_space<vmem>>, vector<4x256xf32>
    %61 = vector.broadcast %10 : vector<1x256xf32> to vector<4x256xf32>
    %62 = arith.mulf %60, %61 : vector<4x256xf32>
    %c8 = arith.constant 8 : index
    %c0_52 = arith.constant 0 : index
    %c0_53 = arith.constant 0 : index
    %63 = vector.load %arg2[%c8, %c0_52, %c0_53] : memref<9x8x4xf32, #tpu.memory_space<vmem>>, vector<1x8x4xf32>
    %64 = vector.shape_cast %63 : vector<1x8x4xf32> to vector<8x4xf32>
    %cst_54 = arith.constant dense<0.000000e+00> : vector<8x256xf32>
    %65 = tpu.matmul %64, %62, %cst_54 {dimension_numbers = #tpu.dot_dimension_numbers<[1], [0], [0], [1], [0, 0, 1, 1], [], []>} : vector<8x4xf32>, vector<4x256xf32>, vector<8x256xf32> -> vector<8x256xf32>
    %66 = arith.addf %59, %65 : vector<8x256xf32>
    %c0_55 = arith.constant 0 : index
    %c0_56 = arith.constant 0 : index
    %67 = vector.load %arg3[%c0_55, %c0_56] : memref<8x1xf32, #tpu.memory_space<vmem>>, vector<8x1xf32>
    %68 = vector.broadcast %67 : vector<8x1xf32> to vector<8x256xf32>
    %69 = arith.addf %66, %68 : vector<8x256xf32>
    %cst_57 = arith.constant 0.000000e+00 : f32
    %70 = vector.broadcast %cst_57 : f32 to vector<8x256xf32>
    %71 = arith.maximumf %69, %70 : vector<8x256xf32>
    %c0_58 = arith.constant 0 : index
    %c17_59 = arith.constant 17 : index
    %72 = vector.load %arg23[%c0_58, %c17_59] : memref<24x290xf32, #tpu.memory_space<vmem>>, vector<8x256xf32>
    tpu.vector_store %arg23[%c0_58, %c17_59], %71 {strides = array<i32>} : memref<24x290xf32, #tpu.memory_space<vmem>>, vector<8x256xf32>,
    %c0_60 = arith.constant 0 : index
    %c0_61 = arith.constant 0 : index
    %73 = vector.load %arg18[%c0_60, %c0_61] : memref<1x256xf32, #tpu.memory_space<vmem>>, vector<1x256xf32>
    %c0_62 = arith.constant 0 : index
    %c0_63 = arith.constant 0 : index
    %74 = vector.load %arg19[%c0_62, %c0_63] : memref<1x256xf32, #tpu.memory_space<vmem>>, vector<1x256xf32>
    %c0_64 = arith.constant 0 : index
    %c0_65 = arith.constant 0 : index
    %75 = vector.load %arg23[%c0_64, %c0_65] : memref<24x290xf32, #tpu.memory_space<vmem>>, vector<8x256xf32>
    %76 = vector.broadcast %73 : vector<1x256xf32> to vector<8x256xf32>
    %77 = arith.mulf %75, %76 : vector<8x256xf32>
    %c0_66 = arith.constant 0 : index
    %c0_67 = arith.constant 0 : index
    %c0_68 = arith.constant 0 : index
    %78 = vector.load %arg4[%c0_66, %c0_67, %c0_68] : memref<9x8x8xf32, #tpu.memory_space<vmem>>, vector<1x8x8xf32>
    %79 = vector.shape_cast %78 : vector<1x8x8xf32> to vector<8x8xf32>
    %cst_69 = arith.constant dense<0.000000e+00> : vector<8x256xf32>
    %80 = tpu.matmul %79, %77, %cst_69 {dimension_numbers = #tpu.dot_dimension_numbers<[1], [0], [0], [1], [0, 0, 1, 1], [], []>} : vector<8x8xf32>, vector<8x256xf32>, vector<8x256xf32> -> vector<8x256xf32>
    %c0_70 = arith.constant 0 : index
    %c1_71 = arith.constant 1 : index
    %81 = vector.load %arg23[%c0_70, %c1_71] : memref<24x290xf32, #tpu.memory_space<vmem>>, vector<8x256xf32>
    %c1_72 = arith.constant 1 : index
    %c0_73 = arith.constant 0 : index
    %c0_74 = arith.constant 0 : index
    %82 = vector.load %arg4[%c1_72, %c0_73, %c0_74] : memref<9x8x8xf32, #tpu.memory_space<vmem>>, vector<1x8x8xf32>
    %83 = vector.shape_cast %82 : vector<1x8x8xf32> to vector<8x8xf32>
    %cst_75 = arith.constant dense<0.000000e+00> : vector<8x256xf32>
    %84 = tpu.matmul %83, %81, %cst_75 {dimension_numbers = #tpu.dot_dimension_numbers<[1], [0], [0], [1], [0, 0, 1, 1], [], []>} : vector<8x8xf32>, vector<8x256xf32>, vector<8x256xf32> -> vector<8x256xf32>
    %85 = arith.addf %80, %84 : vector<8x256xf32>
    %c0_76 = arith.constant 0 : index
    %c2_77 = arith.constant 2 : index
    %86 = vector.load %arg23[%c0_76, %c2_77] : memref<24x290xf32, #tpu.memory_space<vmem>>, vector<8x256xf32>
    %87 = vector.broadcast %74 : vector<1x256xf32> to vector<8x256xf32>
    %88 = arith.mulf %86, %87 : vector<8x256xf32>
    %c2_78 = arith.constant 2 : index
    %c0_79 = arith.constant 0 : index
    %c0_80 = arith.constant 0 : index
    %89 = vector.load %arg4[%c2_78, %c0_79, %c0_80] : memref<9x8x8xf32, #tpu.memory_space<vmem>>, vector<1x8x8xf32>
    %90 = vector.shape_cast %89 : vector<1x8x8xf32> to vector<8x8xf32>
    %cst_81 = arith.constant dense<0.000000e+00> : vector<8x256xf32>
    %91 = tpu.matmul %90, %88, %cst_81 {dimension_numbers = #tpu.dot_dimension_numbers<[1], [0], [0], [1], [0, 0, 1, 1], [], []>} : vector<8x8xf32>, vector<8x256xf32>, vector<8x256xf32> -> vector<8x256xf32>
    %92 = arith.addf %85, %91 : vector<8x256xf32>
    %c0_82 = arith.constant 0 : index
    %c16_83 = arith.constant 16 : index
    %93 = vector.load %arg23[%c0_82, %c16_83] : memref<24x290xf32, #tpu.memory_space<vmem>>, vector<8x256xf32>
    %94 = vector.broadcast %73 : vector<1x256xf32> to vector<8x256xf32>
    %95 = arith.mulf %93, %94 : vector<8x256xf32>
    %c3_84 = arith.constant 3 : index
    %c0_85 = arith.constant 0 : index
    %c0_86 = arith.constant 0 : index
    %96 = vector.load %arg4[%c3_84, %c0_85, %c0_86] : memref<9x8x8xf32, #tpu.memory_space<vmem>>, vector<1x8x8xf32>
    %97 = vector.shape_cast %96 : vector<1x8x8xf32> to vector<8x8xf32>
    %cst_87 = arith.constant dense<0.000000e+00> : vector<8x256xf32>
    %98 = tpu.matmul %97, %95, %cst_87 {dimension_numbers = #tpu.dot_dimension_numbers<[1], [0], [0], [1], [0, 0, 1, 1], [], []>} : vector<8x8xf32>, vector<8x256xf32>, vector<8x256xf32> -> vector<8x256xf32>
    %99 = arith.addf %92, %98 : vector<8x256xf32>
    %c0_88 = arith.constant 0 : index
    %c17_89 = arith.constant 17 : index
    %100 = vector.load %arg23[%c0_88, %c17_89] : memref<24x290xf32, #tpu.memory_space<vmem>>, vector<8x256xf32>
    %c4_90 = arith.constant 4 : index
    %c0_91 = arith.constant 0 : index
    %c0_92 = arith.constant 0 : index
    %101 = vector.load %arg4[%c4_90, %c0_91, %c0_92] : memref<9x8x8xf32, #tpu.memory_space<vmem>>, vector<1x8x8xf32>
    %102 = vector.shape_cast %101 : vector<1x8x8xf32> to vector<8x8xf32>
    %cst_93 = arith.constant dense<0.000000e+00> : vector<8x256xf32>
    %103 = tpu.matmul %102, %100, %cst_93 {dimension_numbers = #tpu.dot_dimension_numbers<[1], [0], [0], [1], [0, 0, 1, 1], [], []>} : vector<8x8xf32>, vector<8x256xf32>, vector<8x256xf32> -> vector<8x256xf32>
    %104 = arith.addf %99, %103 : vector<8x256xf32>
    %c0_94 = arith.constant 0 : index
    %c18_95 = arith.constant 18 : index
    %105 = vector.load %arg23[%c0_94, %c18_95] : memref<24x290xf32, #tpu.memory_space<vmem>>, vector<8x256xf32>
    %106 = vector.broadcast %74 : vector<1x256xf32> to vector<8x256xf32>
    %107 = arith.mulf %105, %106 : vector<8x256xf32>
    %c5_96 = arith.constant 5 : index
    %c0_97 = arith.constant 0 : index
    %c0_98 = arith.constant 0 : index
    %108 = vector.load %arg4[%c5_96, %c0_97, %c0_98] : memref<9x8x8xf32, #tpu.memory_space<vmem>>, vector<1x8x8xf32>
    %109 = vector.shape_cast %108 : vector<1x8x8xf32> to vector<8x8xf32>
    %cst_99 = arith.constant dense<0.000000e+00> : vector<8x256xf32>
    %110 = tpu.matmul %109, %107, %cst_99 {dimension_numbers = #tpu.dot_dimension_numbers<[1], [0], [0], [1], [0, 0, 1, 1], [], []>} : vector<8x8xf32>, vector<8x256xf32>, vector<8x256xf32> -> vector<8x256xf32>
    %111 = arith.addf %104, %110 : vector<8x256xf32>
    %c0_100 = arith.constant 0 : index
    %c32_101 = arith.constant 32 : index
    %112 = vector.load %arg23[%c0_100, %c32_101] : memref<24x290xf32, #tpu.memory_space<vmem>>, vector<8x256xf32>
    %113 = vector.broadcast %73 : vector<1x256xf32> to vector<8x256xf32>
    %114 = arith.mulf %112, %113 : vector<8x256xf32>
    %c6_102 = arith.constant 6 : index
    %c0_103 = arith.constant 0 : index
    %c0_104 = arith.constant 0 : index
    %115 = vector.load %arg4[%c6_102, %c0_103, %c0_104] : memref<9x8x8xf32, #tpu.memory_space<vmem>>, vector<1x8x8xf32>
    %116 = vector.shape_cast %115 : vector<1x8x8xf32> to vector<8x8xf32>
    %cst_105 = arith.constant dense<0.000000e+00> : vector<8x256xf32>
    %117 = tpu.matmul %116, %114, %cst_105 {dimension_numbers = #tpu.dot_dimension_numbers<[1], [0], [0], [1], [0, 0, 1, 1], [], []>} : vector<8x8xf32>, vector<8x256xf32>, vector<8x256xf32> -> vector<8x256xf32>
    %118 = arith.addf %111, %117 : vector<8x256xf32>
    %c0_106 = arith.constant 0 : index
    %c33_107 = arith.constant 33 : index
    %119 = vector.load %arg23[%c0_106, %c33_107] : memref<24x290xf32, #tpu.memory_space<vmem>>, vector<8x256xf32>
    %c7_108 = arith.constant 7 : index
    %c0_109 = arith.constant 0 : index
    %c0_110 = arith.constant 0 : index
    %120 = vector.load %arg4[%c7_108, %c0_109, %c0_110] : memref<9x8x8xf32, #tpu.memory_space<vmem>>, vector<1x8x8xf32>
    %121 = vector.shape_cast %120 : vector<1x8x8xf32> to vector<8x8xf32>
    %cst_111 = arith.constant dense<0.000000e+00> : vector<8x256xf32>
    %122 = tpu.matmul %121, %119, %cst_111 {dimension_numbers = #tpu.dot_dimension_numbers<[1], [0], [0], [1], [0, 0, 1, 1], [], []>} : vector<8x8xf32>, vector<8x256xf32>, vector<8x256xf32> -> vector<8x256xf32>
    %123 = arith.addf %118, %122 : vector<8x256xf32>
    %c0_112 = arith.constant 0 : index
    %c34_113 = arith.constant 34 : index
    %124 = vector.load %arg23[%c0_112, %c34_113] : memref<24x290xf32, #tpu.memory_space<vmem>>, vector<8x256xf32>
    %125 = vector.broadcast %74 : vector<1x256xf32> to vector<8x256xf32>
    %126 = arith.mulf %124, %125 : vector<8x256xf32>
    %c8_114 = arith.constant 8 : index
    %c0_115 = arith.constant 0 : index
    %c0_116 = arith.constant 0 : index
    %127 = vector.load %arg4[%c8_114, %c0_115, %c0_116] : memref<9x8x8xf32, #tpu.memory_space<vmem>>, vector<1x8x8xf32>
    %128 = vector.shape_cast %127 : vector<1x8x8xf32> to vector<8x8xf32>
    %cst_117 = arith.constant dense<0.000000e+00> : vector<8x256xf32>
    %129 = tpu.matmul %128, %126, %cst_117 {dimension_numbers = #tpu.dot_dimension_numbers<[1], [0], [0], [1], [0, 0, 1, 1], [], []>} : vector<8x8xf32>, vector<8x256xf32>, vector<8x256xf32> -> vector<8x256xf32>
    %130 = arith.addf %123, %129 : vector<8x256xf32>
    %c0_118 = arith.constant 0 : index
    %c0_119 = arith.constant 0 : index
    %131 = vector.load %arg5[%c0_118, %c0_119] : memref<8x1xf32, #tpu.memory_space<vmem>>, vector<8x1xf32>
    %132 = vector.broadcast %131 : vector<8x1xf32> to vector<8x256xf32>
    %133 = arith.addf %130, %132 : vector<8x256xf32>
    %cst_120 = arith.constant 0.000000e+00 : f32
    %134 = vector.broadcast %cst_120 : f32 to vector<8x256xf32>
    %135 = arith.maximumf %133, %134 : vector<8x256xf32>
    %c0_121 = arith.constant 0 : index
    %c17_122 = arith.constant 17 : index
    %136 = vector.load %arg23[%c0_121, %c17_122] : memref<24x290xf32, #tpu.memory_space<vmem>>, vector<8x256xf32>
    tpu.vector_store %arg23[%c0_121, %c17_122], %135 {strides = array<i32>} : memref<24x290xf32, #tpu.memory_space<vmem>>, vector<8x256xf32>,
    %c0_123 = arith.constant 0 : index
    %c18_124 = arith.constant 18 : index
    %137 = vector.load %arg23[%c0_123, %c18_124] : memref<24x290xf32, #tpu.memory_space<vmem>>, vector<8x256xf32>
    %138 = arith.maximumf %135, %137 : vector<8x256xf32>
    %c0_125 = arith.constant 0 : index
    %c33_126 = arith.constant 33 : index
    %139 = vector.load %arg23[%c0_125, %c33_126] : memref<24x290xf32, #tpu.memory_space<vmem>>, vector<8x256xf32>
    %140 = arith.maximumf %138, %139 : vector<8x256xf32>
    %c0_127 = arith.constant 0 : index
    %c34_128 = arith.constant 34 : index
    %141 = vector.load %arg23[%c0_127, %c34_128] : memref<24x290xf32, #tpu.memory_space<vmem>>, vector<8x256xf32>
    %142 = arith.maximumf %140, %141 : vector<8x256xf32>
    %c0_129 = arith.constant 0 : index
    %c0_130 = arith.constant 0 : index
    %143 = vector.load %arg16[%c0_129, %c0_130] : memref<256x64xf32, #tpu.memory_space<vmem>>, vector<256x64xf32>
    %cst_131 = arith.constant dense<0.000000e+00> : vector<8x64xf32>
    %144 = tpu.matmul %142, %143, %cst_131 {dimension_numbers = #tpu.dot_dimension_numbers<[1], [0], [0], [1], [0, 0, 1, 1], [], []>} : vector<8x256xf32>, vector<256x64xf32>, vector<8x64xf32> -> vector<8x64xf32>
    %c0_132 = arith.constant 0 : index
    %c9 = arith.constant 9 : index
    %145 = vector.load %arg24[%c0_132, %c9] : memref<16x82xf32, #tpu.memory_space<vmem>>, vector<8x64xf32>
    tpu.vector_store %arg24[%c0_132, %c9], %144 {strides = array<i32>} : memref<16x82xf32, #tpu.memory_space<vmem>>, vector<8x64xf32>,
    %c0_133 = arith.constant 0 : index
    %c0_134 = arith.constant 0 : index
    %146 = vector.load %arg20[%c0_133, %c0_134] : memref<1x64xf32, #tpu.memory_space<vmem>>, vector<1x64xf32>
    %c0_135 = arith.constant 0 : index
    %c0_136 = arith.constant 0 : index
    %147 = vector.load %arg21[%c0_135, %c0_136] : memref<1x64xf32, #tpu.memory_space<vmem>>, vector<1x64xf32>
    %c0_137 = arith.constant 0 : index
    %c0_138 = arith.constant 0 : index
    %148 = vector.load %arg24[%c0_137, %c0_138] : memref<16x82xf32, #tpu.memory_space<vmem>>, vector<8x64xf32>
    %149 = vector.broadcast %146 : vector<1x64xf32> to vector<8x64xf32>
    %150 = arith.mulf %148, %149 : vector<8x64xf32>
    %c0_139 = arith.constant 0 : index
    %c0_140 = arith.constant 0 : index
    %c0_141 = arith.constant 0 : index
    %151 = vector.load %arg6[%c0_139, %c0_140, %c0_141] : memref<9x16x8xf32, #tpu.memory_space<vmem>>, vector<1x16x8xf32>
    %152 = vector.shape_cast %151 : vector<1x16x8xf32> to vector<16x8xf32>
    %cst_142 = arith.constant dense<0.000000e+00> : vector<16x64xf32>
    %153 = tpu.matmul %152, %150, %cst_142 {dimension_numbers = #tpu.dot_dimension_numbers<[1], [0], [0], [1], [0, 0, 1, 1], [], []>} : vector<16x8xf32>, vector<8x64xf32>, vector<16x64xf32> -> vector<16x64xf32>
    %c0_143 = arith.constant 0 : index
    %c1_144 = arith.constant 1 : index
    %154 = vector.load %arg24[%c0_143, %c1_144] : memref<16x82xf32, #tpu.memory_space<vmem>>, vector<8x64xf32>
    %c1_145 = arith.constant 1 : index
    %c0_146 = arith.constant 0 : index
    %c0_147 = arith.constant 0 : index
    %155 = vector.load %arg6[%c1_145, %c0_146, %c0_147] : memref<9x16x8xf32, #tpu.memory_space<vmem>>, vector<1x16x8xf32>
    %156 = vector.shape_cast %155 : vector<1x16x8xf32> to vector<16x8xf32>
    %cst_148 = arith.constant dense<0.000000e+00> : vector<16x64xf32>
    %157 = tpu.matmul %156, %154, %cst_148 {dimension_numbers = #tpu.dot_dimension_numbers<[1], [0], [0], [1], [0, 0, 1, 1], [], []>} : vector<16x8xf32>, vector<8x64xf32>, vector<16x64xf32> -> vector<16x64xf32>
    %158 = arith.addf %153, %157 : vector<16x64xf32>
    %c0_149 = arith.constant 0 : index
    %c2_150 = arith.constant 2 : index
    %159 = vector.load %arg24[%c0_149, %c2_150] : memref<16x82xf32, #tpu.memory_space<vmem>>, vector<8x64xf32>
    %160 = vector.broadcast %147 : vector<1x64xf32> to vector<8x64xf32>
    %161 = arith.mulf %159, %160 : vector<8x64xf32>
    %c2_151 = arith.constant 2 : index
    %c0_152 = arith.constant 0 : index
    %c0_153 = arith.constant 0 : index
    %162 = vector.load %arg6[%c2_151, %c0_152, %c0_153] : memref<9x16x8xf32, #tpu.memory_space<vmem>>, vector<1x16x8xf32>
    %163 = vector.shape_cast %162 : vector<1x16x8xf32> to vector<16x8xf32>
    %cst_154 = arith.constant dense<0.000000e+00> : vector<16x64xf32>
    %164 = tpu.matmul %163, %161, %cst_154 {dimension_numbers = #tpu.dot_dimension_numbers<[1], [0], [0], [1], [0, 0, 1, 1], [], []>} : vector<16x8xf32>, vector<8x64xf32>, vector<16x64xf32> -> vector<16x64xf32>
    %165 = arith.addf %158, %164 : vector<16x64xf32>
    %c0_155 = arith.constant 0 : index
    %c8_156 = arith.constant 8 : index
    %166 = vector.load %arg24[%c0_155, %c8_156] : memref<16x82xf32, #tpu.memory_space<vmem>>, vector<8x64xf32>
    %167 = vector.broadcast %146 : vector<1x64xf32> to vector<8x64xf32>
    %168 = arith.mulf %166, %167 : vector<8x64xf32>
    %c3_157 = arith.constant 3 : index
    %c0_158 = arith.constant 0 : index
    %c0_159 = arith.constant 0 : index
    %169 = vector.load %arg6[%c3_157, %c0_158, %c0_159] : memref<9x16x8xf32, #tpu.memory_space<vmem>>, vector<1x16x8xf32>
    %170 = vector.shape_cast %169 : vector<1x16x8xf32> to vector<16x8xf32>
    %cst_160 = arith.constant dense<0.000000e+00> : vector<16x64xf32>
    %171 = tpu.matmul %170, %168, %cst_160 {dimension_numbers = #tpu.dot_dimension_numbers<[1], [0], [0], [1], [0, 0, 1, 1], [], []>} : vector<16x8xf32>, vector<8x64xf32>, vector<16x64xf32> -> vector<16x64xf32>
    %172 = arith.addf %165, %171 : vector<16x64xf32>
    %c0_161 = arith.constant 0 : index
    %c9_162 = arith.constant 9 : index
    %173 = vector.load %arg24[%c0_161, %c9_162] : memref<16x82xf32, #tpu.memory_space<vmem>>, vector<8x64xf32>
    %c4_163 = arith.constant 4 : index
    %c0_164 = arith.constant 0 : index
    %c0_165 = arith.constant 0 : index
    %174 = vector.load %arg6[%c4_163, %c0_164, %c0_165] : memref<9x16x8xf32, #tpu.memory_space<vmem>>, vector<1x16x8xf32>
    %175 = vector.shape_cast %174 : vector<1x16x8xf32> to vector<16x8xf32>
    %cst_166 = arith.constant dense<0.000000e+00> : vector<16x64xf32>
    %176 = tpu.matmul %175, %173, %cst_166 {dimension_numbers = #tpu.dot_dimension_numbers<[1], [0], [0], [1], [0, 0, 1, 1], [], []>} : vector<16x8xf32>, vector<8x64xf32>, vector<16x64xf32> -> vector<16x64xf32>
    %177 = arith.addf %172, %176 : vector<16x64xf32>
    %c0_167 = arith.constant 0 : index
    %c10 = arith.constant 10 : index
    %178 = vector.load %arg24[%c0_167, %c10] : memref<16x82xf32, #tpu.memory_space<vmem>>, vector<8x64xf32>
    %179 = vector.broadcast %147 : vector<1x64xf32> to vector<8x64xf32>
    %180 = arith.mulf %178, %179 : vector<8x64xf32>
    %c5_168 = arith.constant 5 : index
    %c0_169 = arith.constant 0 : index
    %c0_170 = arith.constant 0 : index
    %181 = vector.load %arg6[%c5_168, %c0_169, %c0_170] : memref<9x16x8xf32, #tpu.memory_space<vmem>>, vector<1x16x8xf32>
    %182 = vector.shape_cast %181 : vector<1x16x8xf32> to vector<16x8xf32>
    %cst_171 = arith.constant dense<0.000000e+00> : vector<16x64xf32>
    %183 = tpu.matmul %182, %180, %cst_171 {dimension_numbers = #tpu.dot_dimension_numbers<[1], [0], [0], [1], [0, 0, 1, 1], [], []>} : vector<16x8xf32>, vector<8x64xf32>, vector<16x64xf32> -> vector<16x64xf32>
    %184 = arith.addf %177, %183 : vector<16x64xf32>
    %c0_172 = arith.constant 0 : index
    %c16_173 = arith.constant 16 : index
    %185 = vector.load %arg24[%c0_172, %c16_173] : memref<16x82xf32, #tpu.memory_space<vmem>>, vector<8x64xf32>
    %186 = vector.broadcast %146 : vector<1x64xf32> to vector<8x64xf32>
    %187 = arith.mulf %185, %186 : vector<8x64xf32>
    %c6_174 = arith.constant 6 : index
    %c0_175 = arith.constant 0 : index
    %c0_176 = arith.constant 0 : index
    %188 = vector.load %arg6[%c6_174, %c0_175, %c0_176] : memref<9x16x8xf32, #tpu.memory_space<vmem>>, vector<1x16x8xf32>
    %189 = vector.shape_cast %188 : vector<1x16x8xf32> to vector<16x8xf32>
    %cst_177 = arith.constant dense<0.000000e+00> : vector<16x64xf32>
    %190 = tpu.matmul %189, %187, %cst_177 {dimension_numbers = #tpu.dot_dimension_numbers<[1], [0], [0], [1], [0, 0, 1, 1], [], []>} : vector<16x8xf32>, vector<8x64xf32>, vector<16x64xf32> -> vector<16x64xf32>
    %191 = arith.addf %184, %190 : vector<16x64xf32>
    %c0_178 = arith.constant 0 : index
    %c17_179 = arith.constant 17 : index
    %192 = vector.load %arg24[%c0_178, %c17_179] : memref<16x82xf32, #tpu.memory_space<vmem>>, vector<8x64xf32>
    %c7_180 = arith.constant 7 : index
    %c0_181 = arith.constant 0 : index
    %c0_182 = arith.constant 0 : index
    %193 = vector.load %arg6[%c7_180, %c0_181, %c0_182] : memref<9x16x8xf32, #tpu.memory_space<vmem>>, vector<1x16x8xf32>
    %194 = vector.shape_cast %193 : vector<1x16x8xf32> to vector<16x8xf32>
    %cst_183 = arith.constant dense<0.000000e+00> : vector<16x64xf32>
    %195 = tpu.matmul %194, %192, %cst_183 {dimension_numbers = #tpu.dot_dimension_numbers<[1], [0], [0], [1], [0, 0, 1, 1], [], []>} : vector<16x8xf32>, vector<8x64xf32>, vector<16x64xf32> -> vector<16x64xf32>
    %196 = arith.addf %191, %195 : vector<16x64xf32>
    %c0_184 = arith.constant 0 : index
    %c18_185 = arith.constant 18 : index
    %197 = vector.load %arg24[%c0_184, %c18_185] : memref<16x82xf32, #tpu.memory_space<vmem>>, vector<8x64xf32>
    %198 = vector.broadcast %147 : vector<1x64xf32> to vector<8x64xf32>
    %199 = arith.mulf %197, %198 : vector<8x64xf32>
    %c8_186 = arith.constant 8 : index
    %c0_187 = arith.constant 0 : index
    %c0_188 = arith.constant 0 : index
    %200 = vector.load %arg6[%c8_186, %c0_187, %c0_188] : memref<9x16x8xf32, #tpu.memory_space<vmem>>, vector<1x16x8xf32>
    %201 = vector.shape_cast %200 : vector<1x16x8xf32> to vector<16x8xf32>
    %cst_189 = arith.constant dense<0.000000e+00> : vector<16x64xf32>
    %202 = tpu.matmul %201, %199, %cst_189 {dimension_numbers = #tpu.dot_dimension_numbers<[1], [0], [0], [1], [0, 0, 1, 1], [], []>} : vector<16x8xf32>, vector<8x64xf32>, vector<16x64xf32> -> vector<16x64xf32>
    %203 = arith.addf %196, %202 : vector<16x64xf32>
    %c0_190 = arith.constant 0 : index
    %c0_191 = arith.constant 0 : index
    %204 = vector.load %arg7[%c0_190, %c0_191] : memref<16x1xf32, #tpu.memory_space<vmem>>, vector<16x1xf32>
    %205 = vector.broadcast %204 : vector<16x1xf32> to vector<16x64xf32>
    %206 = arith.addf %203, %205 : vector<16x64xf32>
    %cst_192 = arith.constant 0.000000e+00 : f32
    %207 = vector.broadcast %cst_192 : f32 to vector<16x64xf32>
    %208 = arith.maximumf %206, %207 : vector<16x64xf32>
    %c0_193 = arith.constant 0 : index
    %c9_194 = arith.constant 9 : index
    %209 = vector.load %arg24[%c0_193, %c9_194] : memref<16x82xf32, #tpu.memory_space<vmem>>, vector<16x64xf32>
    tpu.vector_store %arg24[%c0_193, %c9_194], %208 {strides = array<i32>} : memref<16x82xf32, #tpu.memory_space<vmem>>, vector<16x64xf32>,
    %c0_195 = arith.constant 0 : index
    %c0_196 = arith.constant 0 : index
    %210 = vector.load %arg20[%c0_195, %c0_196] : memref<1x64xf32, #tpu.memory_space<vmem>>, vector<1x64xf32>
    %c0_197 = arith.constant 0 : index
    %c0_198 = arith.constant 0 : index
    %211 = vector.load %arg21[%c0_197, %c0_198] : memref<1x64xf32, #tpu.memory_space<vmem>>, vector<1x64xf32>
    %c0_199 = arith.constant 0 : index
    %c0_200 = arith.constant 0 : index
    %212 = vector.load %arg24[%c0_199, %c0_200] : memref<16x82xf32, #tpu.memory_space<vmem>>, vector<16x64xf32>
    %213 = vector.broadcast %210 : vector<1x64xf32> to vector<16x64xf32>
    %214 = arith.mulf %212, %213 : vector<16x64xf32>
    %c0_201 = arith.constant 0 : index
    %c0_202 = arith.constant 0 : index
    %c0_203 = arith.constant 0 : index
    %215 = vector.load %arg8[%c0_201, %c0_202, %c0_203] : memref<9x16x16xf32, #tpu.memory_space<vmem>>, vector<1x16x16xf32>
    %216 = vector.shape_cast %215 : vector<1x16x16xf32> to vector<16x16xf32>
    %cst_204 = arith.constant dense<0.000000e+00> : vector<16x64xf32>
    %217 = tpu.matmul %216, %214, %cst_204 {dimension_numbers = #tpu.dot_dimension_numbers<[1], [0], [0], [1], [0, 0, 1, 1], [], []>} : vector<16x16xf32>, vector<16x64xf32>, vector<16x64xf32> -> vector<16x64xf32>
    %c0_205 = arith.constant 0 : index
    %c1_206 = arith.constant 1 : index
    %218 = vector.load %arg24[%c0_205, %c1_206] : memref<16x82xf32, #tpu.memory_space<vmem>>, vector<16x64xf32>
    %c1_207 = arith.constant 1 : index
    %c0_208 = arith.constant 0 : index
    %c0_209 = arith.constant 0 : index
    %219 = vector.load %arg8[%c1_207, %c0_208, %c0_209] : memref<9x16x16xf32, #tpu.memory_space<vmem>>, vector<1x16x16xf32>
    %220 = vector.shape_cast %219 : vector<1x16x16xf32> to vector<16x16xf32>
    %cst_210 = arith.constant dense<0.000000e+00> : vector<16x64xf32>
    %221 = tpu.matmul %220, %218, %cst_210 {dimension_numbers = #tpu.dot_dimension_numbers<[1], [0], [0], [1], [0, 0, 1, 1], [], []>} : vector<16x16xf32>, vector<16x64xf32>, vector<16x64xf32> -> vector<16x64xf32>
    %222 = arith.addf %217, %221 : vector<16x64xf32>
    %c0_211 = arith.constant 0 : index
    %c2_212 = arith.constant 2 : index
    %223 = vector.load %arg24[%c0_211, %c2_212] : memref<16x82xf32, #tpu.memory_space<vmem>>, vector<16x64xf32>
    %224 = vector.broadcast %211 : vector<1x64xf32> to vector<16x64xf32>
    %225 = arith.mulf %223, %224 : vector<16x64xf32>
    %c2_213 = arith.constant 2 : index
    %c0_214 = arith.constant 0 : index
    %c0_215 = arith.constant 0 : index
    %226 = vector.load %arg8[%c2_213, %c0_214, %c0_215] : memref<9x16x16xf32, #tpu.memory_space<vmem>>, vector<1x16x16xf32>
    %227 = vector.shape_cast %226 : vector<1x16x16xf32> to vector<16x16xf32>
    %cst_216 = arith.constant dense<0.000000e+00> : vector<16x64xf32>
    %228 = tpu.matmul %227, %225, %cst_216 {dimension_numbers = #tpu.dot_dimension_numbers<[1], [0], [0], [1], [0, 0, 1, 1], [], []>} : vector<16x16xf32>, vector<16x64xf32>, vector<16x64xf32> -> vector<16x64xf32>
    %229 = arith.addf %222, %228 : vector<16x64xf32>
    %c0_217 = arith.constant 0 : index
    %c8_218 = arith.constant 8 : index
    %230 = vector.load %arg24[%c0_217, %c8_218] : memref<16x82xf32, #tpu.memory_space<vmem>>, vector<16x64xf32>
    %231 = vector.broadcast %210 : vector<1x64xf32> to vector<16x64xf32>
    %232 = arith.mulf %230, %231 : vector<16x64xf32>
    %c3_219 = arith.constant 3 : index
    %c0_220 = arith.constant 0 : index
    %c0_221 = arith.constant 0 : index
    %233 = vector.load %arg8[%c3_219, %c0_220, %c0_221] : memref<9x16x16xf32, #tpu.memory_space<vmem>>, vector<1x16x16xf32>
    %234 = vector.shape_cast %233 : vector<1x16x16xf32> to vector<16x16xf32>
    %cst_222 = arith.constant dense<0.000000e+00> : vector<16x64xf32>
    %235 = tpu.matmul %234, %232, %cst_222 {dimension_numbers = #tpu.dot_dimension_numbers<[1], [0], [0], [1], [0, 0, 1, 1], [], []>} : vector<16x16xf32>, vector<16x64xf32>, vector<16x64xf32> -> vector<16x64xf32>
    %236 = arith.addf %229, %235 : vector<16x64xf32>
    %c0_223 = arith.constant 0 : index
    %c9_224 = arith.constant 9 : index
    %237 = vector.load %arg24[%c0_223, %c9_224] : memref<16x82xf32, #tpu.memory_space<vmem>>, vector<16x64xf32>
    %c4_225 = arith.constant 4 : index
    %c0_226 = arith.constant 0 : index
    %c0_227 = arith.constant 0 : index
    %238 = vector.load %arg8[%c4_225, %c0_226, %c0_227] : memref<9x16x16xf32, #tpu.memory_space<vmem>>, vector<1x16x16xf32>
    %239 = vector.shape_cast %238 : vector<1x16x16xf32> to vector<16x16xf32>
    %cst_228 = arith.constant dense<0.000000e+00> : vector<16x64xf32>
    %240 = tpu.matmul %239, %237, %cst_228 {dimension_numbers = #tpu.dot_dimension_numbers<[1], [0], [0], [1], [0, 0, 1, 1], [], []>} : vector<16x16xf32>, vector<16x64xf32>, vector<16x64xf32> -> vector<16x64xf32>
    %241 = arith.addf %236, %240 : vector<16x64xf32>
    %c0_229 = arith.constant 0 : index
    %c10_230 = arith.constant 10 : index
    %242 = vector.load %arg24[%c0_229, %c10_230] : memref<16x82xf32, #tpu.memory_space<vmem>>, vector<16x64xf32>
    %243 = vector.broadcast %211 : vector<1x64xf32> to vector<16x64xf32>
    %244 = arith.mulf %242, %243 : vector<16x64xf32>
    %c5_231 = arith.constant 5 : index
    %c0_232 = arith.constant 0 : index
    %c0_233 = arith.constant 0 : index
    %245 = vector.load %arg8[%c5_231, %c0_232, %c0_233] : memref<9x16x16xf32, #tpu.memory_space<vmem>>, vector<1x16x16xf32>
    %246 = vector.shape_cast %245 : vector<1x16x16xf32> to vector<16x16xf32>
    %cst_234 = arith.constant dense<0.000000e+00> : vector<16x64xf32>
    %247 = tpu.matmul %246, %244, %cst_234 {dimension_numbers = #tpu.dot_dimension_numbers<[1], [0], [0], [1], [0, 0, 1, 1], [], []>} : vector<16x16xf32>, vector<16x64xf32>, vector<16x64xf32> -> vector<16x64xf32>
    %248 = arith.addf %241, %247 : vector<16x64xf32>
    %c0_235 = arith.constant 0 : index
    %c16_236 = arith.constant 16 : index
    %249 = vector.load %arg24[%c0_235, %c16_236] : memref<16x82xf32, #tpu.memory_space<vmem>>, vector<16x64xf32>
    %250 = vector.broadcast %210 : vector<1x64xf32> to vector<16x64xf32>
    %251 = arith.mulf %249, %250 : vector<16x64xf32>
    %c6_237 = arith.constant 6 : index
    %c0_238 = arith.constant 0 : index
    %c0_239 = arith.constant 0 : index
    %252 = vector.load %arg8[%c6_237, %c0_238, %c0_239] : memref<9x16x16xf32, #tpu.memory_space<vmem>>, vector<1x16x16xf32>
    %253 = vector.shape_cast %252 : vector<1x16x16xf32> to vector<16x16xf32>
    %cst_240 = arith.constant dense<0.000000e+00> : vector<16x64xf32>
    %254 = tpu.matmul %253, %251, %cst_240 {dimension_numbers = #tpu.dot_dimension_numbers<[1], [0], [0], [1], [0, 0, 1, 1], [], []>} : vector<16x16xf32>, vector<16x64xf32>, vector<16x64xf32> -> vector<16x64xf32>
    %255 = arith.addf %248, %254 : vector<16x64xf32>
    %c0_241 = arith.constant 0 : index
    %c17_242 = arith.constant 17 : index
    %256 = vector.load %arg24[%c0_241, %c17_242] : memref<16x82xf32, #tpu.memory_space<vmem>>, vector<16x64xf32>
    %c7_243 = arith.constant 7 : index
    %c0_244 = arith.constant 0 : index
    %c0_245 = arith.constant 0 : index
    %257 = vector.load %arg8[%c7_243, %c0_244, %c0_245] : memref<9x16x16xf32, #tpu.memory_space<vmem>>, vector<1x16x16xf32>
    %258 = vector.shape_cast %257 : vector<1x16x16xf32> to vector<16x16xf32>
    %cst_246 = arith.constant dense<0.000000e+00> : vector<16x64xf32>
    %259 = tpu.matmul %258, %256, %cst_246 {dimension_numbers = #tpu.dot_dimension_numbers<[1], [0], [0], [1], [0, 0, 1, 1], [], []>} : vector<16x16xf32>, vector<16x64xf32>, vector<16x64xf32> -> vector<16x64xf32>
    %260 = arith.addf %255, %259 : vector<16x64xf32>
    %c0_247 = arith.constant 0 : index
    %c18_248 = arith.constant 18 : index
    %261 = vector.load %arg24[%c0_247, %c18_248] : memref<16x82xf32, #tpu.memory_space<vmem>>, vector<16x64xf32>
    %262 = vector.broadcast %211 : vector<1x64xf32> to vector<16x64xf32>
    %263 = arith.mulf %261, %262 : vector<16x64xf32>
    %c8_249 = arith.constant 8 : index
    %c0_250 = arith.constant 0 : index
    %c0_251 = arith.constant 0 : index
    %264 = vector.load %arg8[%c8_249, %c0_250, %c0_251] : memref<9x16x16xf32, #tpu.memory_space<vmem>>, vector<1x16x16xf32>
    %265 = vector.shape_cast %264 : vector<1x16x16xf32> to vector<16x16xf32>
    %cst_252 = arith.constant dense<0.000000e+00> : vector<16x64xf32>
    %266 = tpu.matmul %265, %263, %cst_252 {dimension_numbers = #tpu.dot_dimension_numbers<[1], [0], [0], [1], [0, 0, 1, 1], [], []>} : vector<16x16xf32>, vector<16x64xf32>, vector<16x64xf32> -> vector<16x64xf32>
    %267 = arith.addf %260, %266 : vector<16x64xf32>
    %c0_253 = arith.constant 0 : index
    %c0_254 = arith.constant 0 : index
    %268 = vector.load %arg9[%c0_253, %c0_254] : memref<16x1xf32, #tpu.memory_space<vmem>>, vector<16x1xf32>
    %269 = vector.broadcast %268 : vector<16x1xf32> to vector<16x64xf32>
    %270 = arith.addf %267, %269 : vector<16x64xf32>
    %cst_255 = arith.constant 0.000000e+00 : f32
    %271 = vector.broadcast %cst_255 : f32 to vector<16x64xf32>
    %272 = arith.maximumf %270, %271 : vector<16x64xf32>
    %c0_256 = arith.constant 0 : index
    %c0_257 = arith.constant 0 : index
    %273 = vector.load %arg17[%c0_256, %c0_257] : memref<64x256xf32, #tpu.memory_space<vmem>>, vector<64x256xf32>
    %cst_258 = arith.constant dense<0.000000e+00> : vector<16x256xf32>
    %274 = tpu.matmul %272, %273, %cst_258 {dimension_numbers = #tpu.dot_dimension_numbers<[1], [0], [0], [1], [0, 0, 1, 1], [], []>} : vector<16x64xf32>, vector<64x256xf32>, vector<16x256xf32> -> vector<16x256xf32>
    %c0_259 = arith.constant 0 : index
    %c17_260 = arith.constant 17 : index
    %275 = vector.load %arg23[%c0_259, %c17_260] : memref<24x290xf32, #tpu.memory_space<vmem>>, vector<8x256xf32>
    tpu.vector_store %arg23[%c0_259, %c17_260], %135 {strides = array<i32>} : memref<24x290xf32, #tpu.memory_space<vmem>>, vector<8x256xf32>,
    %c8_261 = arith.constant 8 : index
    %c17_262 = arith.constant 17 : index
    %276 = vector.load %arg23[%c8_261, %c17_262] : memref<24x290xf32, #tpu.memory_space<vmem>>, vector<16x256xf32>
    tpu.vector_store %arg23[%c8_261, %c17_262], %274 {strides = array<i32>} : memref<24x290xf32, #tpu.memory_space<vmem>>, vector<16x256xf32>,
    %c0_263 = arith.constant 0 : index
    %c0_264 = arith.constant 0 : index
    %277 = vector.load %arg18[%c0_263, %c0_264] : memref<1x256xf32, #tpu.memory_space<vmem>>, vector<1x256xf32>
    %c0_265 = arith.constant 0 : index
    %c0_266 = arith.constant 0 : index
    %278 = vector.load %arg19[%c0_265, %c0_266] : memref<1x256xf32, #tpu.memory_space<vmem>>, vector<1x256xf32>
    %c0_267 = arith.constant 0 : index
    %c0_268 = arith.constant 0 : index
    %279 = vector.load %arg23[%c0_267, %c0_268] : memref<24x290xf32, #tpu.memory_space<vmem>>, vector<24x256xf32>
    %280 = vector.broadcast %277 : vector<1x256xf32> to vector<24x256xf32>
    %281 = arith.mulf %279, %280 : vector<24x256xf32>
    %c0_269 = arith.constant 0 : index
    %c0_270 = arith.constant 0 : index
    %c0_271 = arith.constant 0 : index
    %282 = vector.load %arg10[%c0_269, %c0_270, %c0_271] : memref<9x12x24xf32, #tpu.memory_space<vmem>>, vector<1x12x24xf32>
    %283 = vector.shape_cast %282 : vector<1x12x24xf32> to vector<12x24xf32>
    %cst_272 = arith.constant dense<0.000000e+00> : vector<12x256xf32>
    %284 = tpu.matmul %283, %281, %cst_272 {dimension_numbers = #tpu.dot_dimension_numbers<[1], [0], [0], [1], [0, 0, 1, 1], [], []>} : vector<12x24xf32>, vector<24x256xf32>, vector<12x256xf32> -> vector<12x256xf32>
    %c0_273 = arith.constant 0 : index
    %c1_274 = arith.constant 1 : index
    %285 = vector.load %arg23[%c0_273, %c1_274] : memref<24x290xf32, #tpu.memory_space<vmem>>, vector<24x256xf32>
    %c1_275 = arith.constant 1 : index
    %c0_276 = arith.constant 0 : index
    %c0_277 = arith.constant 0 : index
    %286 = vector.load %arg10[%c1_275, %c0_276, %c0_277] : memref<9x12x24xf32, #tpu.memory_space<vmem>>, vector<1x12x24xf32>
    %287 = vector.shape_cast %286 : vector<1x12x24xf32> to vector<12x24xf32>
    %cst_278 = arith.constant dense<0.000000e+00> : vector<12x256xf32>
    %288 = tpu.matmul %287, %285, %cst_278 {dimension_numbers = #tpu.dot_dimension_numbers<[1], [0], [0], [1], [0, 0, 1, 1], [], []>} : vector<12x24xf32>, vector<24x256xf32>, vector<12x256xf32> -> vector<12x256xf32>
    %289 = arith.addf %284, %288 : vector<12x256xf32>
    %c0_279 = arith.constant 0 : index
    %c2_280 = arith.constant 2 : index
    %290 = vector.load %arg23[%c0_279, %c2_280] : memref<24x290xf32, #tpu.memory_space<vmem>>, vector<24x256xf32>
    %291 = vector.broadcast %278 : vector<1x256xf32> to vector<24x256xf32>
    %292 = arith.mulf %290, %291 : vector<24x256xf32>
    %c2_281 = arith.constant 2 : index
    %c0_282 = arith.constant 0 : index
    %c0_283 = arith.constant 0 : index
    %293 = vector.load %arg10[%c2_281, %c0_282, %c0_283] : memref<9x12x24xf32, #tpu.memory_space<vmem>>, vector<1x12x24xf32>
    %294 = vector.shape_cast %293 : vector<1x12x24xf32> to vector<12x24xf32>
    %cst_284 = arith.constant dense<0.000000e+00> : vector<12x256xf32>
    %295 = tpu.matmul %294, %292, %cst_284 {dimension_numbers = #tpu.dot_dimension_numbers<[1], [0], [0], [1], [0, 0, 1, 1], [], []>} : vector<12x24xf32>, vector<24x256xf32>, vector<12x256xf32> -> vector<12x256xf32>
    %296 = arith.addf %289, %295 : vector<12x256xf32>
    %c0_285 = arith.constant 0 : index
    %c16_286 = arith.constant 16 : index
    %297 = vector.load %arg23[%c0_285, %c16_286] : memref<24x290xf32, #tpu.memory_space<vmem>>, vector<24x256xf32>
    %298 = vector.broadcast %277 : vector<1x256xf32> to vector<24x256xf32>
    %299 = arith.mulf %297, %298 : vector<24x256xf32>
    %c3_287 = arith.constant 3 : index
    %c0_288 = arith.constant 0 : index
    %c0_289 = arith.constant 0 : index
    %300 = vector.load %arg10[%c3_287, %c0_288, %c0_289] : memref<9x12x24xf32, #tpu.memory_space<vmem>>, vector<1x12x24xf32>
    %301 = vector.shape_cast %300 : vector<1x12x24xf32> to vector<12x24xf32>
    %cst_290 = arith.constant dense<0.000000e+00> : vector<12x256xf32>
    %302 = tpu.matmul %301, %299, %cst_290 {dimension_numbers = #tpu.dot_dimension_numbers<[1], [0], [0], [1], [0, 0, 1, 1], [], []>} : vector<12x24xf32>, vector<24x256xf32>, vector<12x256xf32> -> vector<12x256xf32>
    %303 = arith.addf %296, %302 : vector<12x256xf32>
    %c0_291 = arith.constant 0 : index
    %c17_292 = arith.constant 17 : index
    %304 = vector.load %arg23[%c0_291, %c17_292] : memref<24x290xf32, #tpu.memory_space<vmem>>, vector<24x256xf32>
    %c4_293 = arith.constant 4 : index
    %c0_294 = arith.constant 0 : index
    %c0_295 = arith.constant 0 : index
    %305 = vector.load %arg10[%c4_293, %c0_294, %c0_295] : memref<9x12x24xf32, #tpu.memory_space<vmem>>, vector<1x12x24xf32>
    %306 = vector.shape_cast %305 : vector<1x12x24xf32> to vector<12x24xf32>
    %cst_296 = arith.constant dense<0.000000e+00> : vector<12x256xf32>
    %307 = tpu.matmul %306, %304, %cst_296 {dimension_numbers = #tpu.dot_dimension_numbers<[1], [0], [0], [1], [0, 0, 1, 1], [], []>} : vector<12x24xf32>, vector<24x256xf32>, vector<12x256xf32> -> vector<12x256xf32>
    %308 = arith.addf %303, %307 : vector<12x256xf32>
    %c0_297 = arith.constant 0 : index
    %c18_298 = arith.constant 18 : index
    %309 = vector.load %arg23[%c0_297, %c18_298] : memref<24x290xf32, #tpu.memory_space<vmem>>, vector<24x256xf32>
    %310 = vector.broadcast %278 : vector<1x256xf32> to vector<24x256xf32>
    %311 = arith.mulf %309, %310 : vector<24x256xf32>
    %c5_299 = arith.constant 5 : index
    %c0_300 = arith.constant 0 : index
    %c0_301 = arith.constant 0 : index
    %312 = vector.load %arg10[%c5_299, %c0_300, %c0_301] : memref<9x12x24xf32, #tpu.memory_space<vmem>>, vector<1x12x24xf32>
    %313 = vector.shape_cast %312 : vector<1x12x24xf32> to vector<12x24xf32>
    %cst_302 = arith.constant dense<0.000000e+00> : vector<12x256xf32>
    %314 = tpu.matmul %313, %311, %cst_302 {dimension_numbers = #tpu.dot_dimension_numbers<[1], [0], [0], [1], [0, 0, 1, 1], [], []>} : vector<12x24xf32>, vector<24x256xf32>, vector<12x256xf32> -> vector<12x256xf32>
    %315 = arith.addf %308, %314 : vector<12x256xf32>
    %c0_303 = arith.constant 0 : index
    %c32_304 = arith.constant 32 : index
    %316 = vector.load %arg23[%c0_303, %c32_304] : memref<24x290xf32, #tpu.memory_space<vmem>>, vector<24x256xf32>
    %317 = vector.broadcast %277 : vector<1x256xf32> to vector<24x256xf32>
    %318 = arith.mulf %316, %317 : vector<24x256xf32>
    %c6_305 = arith.constant 6 : index
    %c0_306 = arith.constant 0 : index
    %c0_307 = arith.constant 0 : index
    %319 = vector.load %arg10[%c6_305, %c0_306, %c0_307] : memref<9x12x24xf32, #tpu.memory_space<vmem>>, vector<1x12x24xf32>
    %320 = vector.shape_cast %319 : vector<1x12x24xf32> to vector<12x24xf32>
    %cst_308 = arith.constant dense<0.000000e+00> : vector<12x256xf32>
    %321 = tpu.matmul %320, %318, %cst_308 {dimension_numbers = #tpu.dot_dimension_numbers<[1], [0], [0], [1], [0, 0, 1, 1], [], []>} : vector<12x24xf32>, vector<24x256xf32>, vector<12x256xf32> -> vector<12x256xf32>
    %322 = arith.addf %315, %321 : vector<12x256xf32>
    %c0_309 = arith.constant 0 : index
    %c33_310 = arith.constant 33 : index
    %323 = vector.load %arg23[%c0_309, %c33_310] : memref<24x290xf32, #tpu.memory_space<vmem>>, vector<24x256xf32>
    %c7_311 = arith.constant 7 : index
    %c0_312 = arith.constant 0 : index
    %c0_313 = arith.constant 0 : index
    %324 = vector.load %arg10[%c7_311, %c0_312, %c0_313] : memref<9x12x24xf32, #tpu.memory_space<vmem>>, vector<1x12x24xf32>
    %325 = vector.shape_cast %324 : vector<1x12x24xf32> to vector<12x24xf32>
    %cst_314 = arith.constant dense<0.000000e+00> : vector<12x256xf32>
    %326 = tpu.matmul %325, %323, %cst_314 {dimension_numbers = #tpu.dot_dimension_numbers<[1], [0], [0], [1], [0, 0, 1, 1], [], []>} : vector<12x24xf32>, vector<24x256xf32>, vector<12x256xf32> -> vector<12x256xf32>
    %327 = arith.addf %322, %326 : vector<12x256xf32>
    %c0_315 = arith.constant 0 : index
    %c34_316 = arith.constant 34 : index
    %328 = vector.load %arg23[%c0_315, %c34_316] : memref<24x290xf32, #tpu.memory_space<vmem>>, vector<24x256xf32>
    %329 = vector.broadcast %278 : vector<1x256xf32> to vector<24x256xf32>
    %330 = arith.mulf %328, %329 : vector<24x256xf32>
    %c8_317 = arith.constant 8 : index
    %c0_318 = arith.constant 0 : index
    %c0_319 = arith.constant 0 : index
    %331 = vector.load %arg10[%c8_317, %c0_318, %c0_319] : memref<9x12x24xf32, #tpu.memory_space<vmem>>, vector<1x12x24xf32>
    %332 = vector.shape_cast %331 : vector<1x12x24xf32> to vector<12x24xf32>
    %cst_320 = arith.constant dense<0.000000e+00> : vector<12x256xf32>
    %333 = tpu.matmul %332, %330, %cst_320 {dimension_numbers = #tpu.dot_dimension_numbers<[1], [0], [0], [1], [0, 0, 1, 1], [], []>} : vector<12x24xf32>, vector<24x256xf32>, vector<12x256xf32> -> vector<12x256xf32>
    %334 = arith.addf %327, %333 : vector<12x256xf32>
    %c0_321 = arith.constant 0 : index
    %c0_322 = arith.constant 0 : index
    %335 = vector.load %arg11[%c0_321, %c0_322] : memref<12x1xf32, #tpu.memory_space<vmem>>, vector<12x1xf32>
    %336 = vector.broadcast %335 : vector<12x1xf32> to vector<12x256xf32>
    %337 = arith.addf %334, %336 : vector<12x256xf32>
    %cst_323 = arith.constant 0.000000e+00 : f32
    %338 = vector.broadcast %cst_323 : f32 to vector<12x256xf32>
    %339 = arith.maximumf %337, %338 : vector<12x256xf32>
    %c0_324 = arith.constant 0 : index
    %c17_325 = arith.constant 17 : index
    %340 = vector.load %arg23[%c0_324, %c17_325] : memref<24x290xf32, #tpu.memory_space<vmem>>, vector<12x256xf32>
    tpu.vector_store %arg23[%c0_324, %c17_325], %339 {strides = array<i32>} : memref<24x290xf32, #tpu.memory_space<vmem>>, vector<12x256xf32>,
    %c0_326 = arith.constant 0 : index
    %c0_327 = arith.constant 0 : index
    %341 = vector.load %arg18[%c0_326, %c0_327] : memref<1x256xf32, #tpu.memory_space<vmem>>, vector<1x256xf32>
    %c0_328 = arith.constant 0 : index
    %c0_329 = arith.constant 0 : index
    %342 = vector.load %arg19[%c0_328, %c0_329] : memref<1x256xf32, #tpu.memory_space<vmem>>, vector<1x256xf32>
    %c0_330 = arith.constant 0 : index
    %c0_331 = arith.constant 0 : index
    %343 = vector.load %arg23[%c0_330, %c0_331] : memref<24x290xf32, #tpu.memory_space<vmem>>, vector<12x256xf32>
    %344 = vector.broadcast %341 : vector<1x256xf32> to vector<12x256xf32>
    %345 = arith.mulf %343, %344 : vector<12x256xf32>
    %c0_332 = arith.constant 0 : index
    %c0_333 = arith.constant 0 : index
    %c0_334 = arith.constant 0 : index
    %346 = vector.load %arg12[%c0_332, %c0_333, %c0_334] : memref<9x8x12xf32, #tpu.memory_space<vmem>>, vector<1x8x12xf32>
    %347 = vector.shape_cast %346 : vector<1x8x12xf32> to vector<8x12xf32>
    %cst_335 = arith.constant dense<0.000000e+00> : vector<8x256xf32>
    %348 = tpu.matmul %347, %345, %cst_335 {dimension_numbers = #tpu.dot_dimension_numbers<[1], [0], [0], [1], [0, 0, 1, 1], [], []>} : vector<8x12xf32>, vector<12x256xf32>, vector<8x256xf32> -> vector<8x256xf32>
    %c0_336 = arith.constant 0 : index
    %c1_337 = arith.constant 1 : index
    %349 = vector.load %arg23[%c0_336, %c1_337] : memref<24x290xf32, #tpu.memory_space<vmem>>, vector<12x256xf32>
    %c1_338 = arith.constant 1 : index
    %c0_339 = arith.constant 0 : index
    %c0_340 = arith.constant 0 : index
    %350 = vector.load %arg12[%c1_338, %c0_339, %c0_340] : memref<9x8x12xf32, #tpu.memory_space<vmem>>, vector<1x8x12xf32>
    %351 = vector.shape_cast %350 : vector<1x8x12xf32> to vector<8x12xf32>
    %cst_341 = arith.constant dense<0.000000e+00> : vector<8x256xf32>
    %352 = tpu.matmul %351, %349, %cst_341 {dimension_numbers = #tpu.dot_dimension_numbers<[1], [0], [0], [1], [0, 0, 1, 1], [], []>} : vector<8x12xf32>, vector<12x256xf32>, vector<8x256xf32> -> vector<8x256xf32>
    %353 = arith.addf %348, %352 : vector<8x256xf32>
    %c0_342 = arith.constant 0 : index
    %c2_343 = arith.constant 2 : index
    %354 = vector.load %arg23[%c0_342, %c2_343] : memref<24x290xf32, #tpu.memory_space<vmem>>, vector<12x256xf32>
    %355 = vector.broadcast %342 : vector<1x256xf32> to vector<12x256xf32>
    %356 = arith.mulf %354, %355 : vector<12x256xf32>
    %c2_344 = arith.constant 2 : index
    %c0_345 = arith.constant 0 : index
    %c0_346 = arith.constant 0 : index
    %357 = vector.load %arg12[%c2_344, %c0_345, %c0_346] : memref<9x8x12xf32, #tpu.memory_space<vmem>>, vector<1x8x12xf32>
    %358 = vector.shape_cast %357 : vector<1x8x12xf32> to vector<8x12xf32>
    %cst_347 = arith.constant dense<0.000000e+00> : vector<8x256xf32>
    %359 = tpu.matmul %358, %356, %cst_347 {dimension_numbers = #tpu.dot_dimension_numbers<[1], [0], [0], [1], [0, 0, 1, 1], [], []>} : vector<8x12xf32>, vector<12x256xf32>, vector<8x256xf32> -> vector<8x256xf32>
    %360 = arith.addf %353, %359 : vector<8x256xf32>
    %c0_348 = arith.constant 0 : index
    %c16_349 = arith.constant 16 : index
    %361 = vector.load %arg23[%c0_348, %c16_349] : memref<24x290xf32, #tpu.memory_space<vmem>>, vector<12x256xf32>
    %362 = vector.broadcast %341 : vector<1x256xf32> to vector<12x256xf32>
    %363 = arith.mulf %361, %362 : vector<12x256xf32>
    %c3_350 = arith.constant 3 : index
    %c0_351 = arith.constant 0 : index
    %c0_352 = arith.constant 0 : index
    %364 = vector.load %arg12[%c3_350, %c0_351, %c0_352] : memref<9x8x12xf32, #tpu.memory_space<vmem>>, vector<1x8x12xf32>
    %365 = vector.shape_cast %364 : vector<1x8x12xf32> to vector<8x12xf32>
    %cst_353 = arith.constant dense<0.000000e+00> : vector<8x256xf32>
    %366 = tpu.matmul %365, %363, %cst_353 {dimension_numbers = #tpu.dot_dimension_numbers<[1], [0], [0], [1], [0, 0, 1, 1], [], []>} : vector<8x12xf32>, vector<12x256xf32>, vector<8x256xf32> -> vector<8x256xf32>
    %367 = arith.addf %360, %366 : vector<8x256xf32>
    %c0_354 = arith.constant 0 : index
    %c17_355 = arith.constant 17 : index
    %368 = vector.load %arg23[%c0_354, %c17_355] : memref<24x290xf32, #tpu.memory_space<vmem>>, vector<12x256xf32>
    %c4_356 = arith.constant 4 : index
    %c0_357 = arith.constant 0 : index
    %c0_358 = arith.constant 0 : index
    %369 = vector.load %arg12[%c4_356, %c0_357, %c0_358] : memref<9x8x12xf32, #tpu.memory_space<vmem>>, vector<1x8x12xf32>
    %370 = vector.shape_cast %369 : vector<1x8x12xf32> to vector<8x12xf32>
    %cst_359 = arith.constant dense<0.000000e+00> : vector<8x256xf32>
    %371 = tpu.matmul %370, %368, %cst_359 {dimension_numbers = #tpu.dot_dimension_numbers<[1], [0], [0], [1], [0, 0, 1, 1], [], []>} : vector<8x12xf32>, vector<12x256xf32>, vector<8x256xf32> -> vector<8x256xf32>
    %372 = arith.addf %367, %371 : vector<8x256xf32>
    %c0_360 = arith.constant 0 : index
    %c18_361 = arith.constant 18 : index
    %373 = vector.load %arg23[%c0_360, %c18_361] : memref<24x290xf32, #tpu.memory_space<vmem>>, vector<12x256xf32>
    %374 = vector.broadcast %342 : vector<1x256xf32> to vector<12x256xf32>
    %375 = arith.mulf %373, %374 : vector<12x256xf32>
    %c5_362 = arith.constant 5 : index
    %c0_363 = arith.constant 0 : index
    %c0_364 = arith.constant 0 : index
    %376 = vector.load %arg12[%c5_362, %c0_363, %c0_364] : memref<9x8x12xf32, #tpu.memory_space<vmem>>, vector<1x8x12xf32>
    %377 = vector.shape_cast %376 : vector<1x8x12xf32> to vector<8x12xf32>
    %cst_365 = arith.constant dense<0.000000e+00> : vector<8x256xf32>
    %378 = tpu.matmul %377, %375, %cst_365 {dimension_numbers = #tpu.dot_dimension_numbers<[1], [0], [0], [1], [0, 0, 1, 1], [], []>} : vector<8x12xf32>, vector<12x256xf32>, vector<8x256xf32> -> vector<8x256xf32>
    %379 = arith.addf %372, %378 : vector<8x256xf32>
    %c0_366 = arith.constant 0 : index
    %c32_367 = arith.constant 32 : index
    %380 = vector.load %arg23[%c0_366, %c32_367] : memref<24x290xf32, #tpu.memory_space<vmem>>, vector<12x256xf32>
    %381 = vector.broadcast %341 : vector<1x256xf32> to vector<12x256xf32>
    %382 = arith.mulf %380, %381 : vector<12x256xf32>
    %c6_368 = arith.constant 6 : index
    %c0_369 = arith.constant 0 : index
    %c0_370 = arith.constant 0 : index
    %383 = vector.load %arg12[%c6_368, %c0_369, %c0_370] : memref<9x8x12xf32, #tpu.memory_space<vmem>>, vector<1x8x12xf32>
    %384 = vector.shape_cast %383 : vector<1x8x12xf32> to vector<8x12xf32>
    %cst_371 = arith.constant dense<0.000000e+00> : vector<8x256xf32>
    %385 = tpu.matmul %384, %382, %cst_371 {dimension_numbers = #tpu.dot_dimension_numbers<[1], [0], [0], [1], [0, 0, 1, 1], [], []>} : vector<8x12xf32>, vector<12x256xf32>, vector<8x256xf32> -> vector<8x256xf32>
    %386 = arith.addf %379, %385 : vector<8x256xf32>
    %c0_372 = arith.constant 0 : index
    %c33_373 = arith.constant 33 : index
    %387 = vector.load %arg23[%c0_372, %c33_373] : memref<24x290xf32, #tpu.memory_space<vmem>>, vector<12x256xf32>
    %c7_374 = arith.constant 7 : index
    %c0_375 = arith.constant 0 : index
    %c0_376 = arith.constant 0 : index
    %388 = vector.load %arg12[%c7_374, %c0_375, %c0_376] : memref<9x8x12xf32, #tpu.memory_space<vmem>>, vector<1x8x12xf32>
    %389 = vector.shape_cast %388 : vector<1x8x12xf32> to vector<8x12xf32>
    %cst_377 = arith.constant dense<0.000000e+00> : vector<8x256xf32>
    %390 = tpu.matmul %389, %387, %cst_377 {dimension_numbers = #tpu.dot_dimension_numbers<[1], [0], [0], [1], [0, 0, 1, 1], [], []>} : vector<8x12xf32>, vector<12x256xf32>, vector<8x256xf32> -> vector<8x256xf32>
    %391 = arith.addf %386, %390 : vector<8x256xf32>
    %c0_378 = arith.constant 0 : index
    %c34_379 = arith.constant 34 : index
    %392 = vector.load %arg23[%c0_378, %c34_379] : memref<24x290xf32, #tpu.memory_space<vmem>>, vector<12x256xf32>
    %393 = vector.broadcast %342 : vector<1x256xf32> to vector<12x256xf32>
    %394 = arith.mulf %392, %393 : vector<12x256xf32>
    %c8_380 = arith.constant 8 : index
    %c0_381 = arith.constant 0 : index
    %c0_382 = arith.constant 0 : index
    %395 = vector.load %arg12[%c8_380, %c0_381, %c0_382] : memref<9x8x12xf32, #tpu.memory_space<vmem>>, vector<1x8x12xf32>
    %396 = vector.shape_cast %395 : vector<1x8x12xf32> to vector<8x12xf32>
    %cst_383 = arith.constant dense<0.000000e+00> : vector<8x256xf32>
    %397 = tpu.matmul %396, %394, %cst_383 {dimension_numbers = #tpu.dot_dimension_numbers<[1], [0], [0], [1], [0, 0, 1, 1], [], []>} : vector<8x12xf32>, vector<12x256xf32>, vector<8x256xf32> -> vector<8x256xf32>
    %398 = arith.addf %391, %397 : vector<8x256xf32>
    %c0_384 = arith.constant 0 : index
    %c0_385 = arith.constant 0 : index
    %399 = vector.load %arg13[%c0_384, %c0_385] : memref<8x1xf32, #tpu.memory_space<vmem>>, vector<8x1xf32>
    %400 = vector.broadcast %399 : vector<8x1xf32> to vector<8x256xf32>
    %401 = arith.addf %398, %400 : vector<8x256xf32>
    %cst_386 = arith.constant 0.000000e+00 : f32
    %402 = vector.broadcast %cst_386 : f32 to vector<8x256xf32>
    %403 = arith.maximumf %401, %402 : vector<8x256xf32>
    %c0_387 = arith.constant 0 : index
    %c0_388 = arith.constant 0 : index
    %404 = vector.load %arg14[%c0_387, %c0_388] : memref<3x8xf32, #tpu.memory_space<vmem>>, vector<3x8xf32>
    %cst_389 = arith.constant dense<0.000000e+00> : vector<3x256xf32>
    %405 = tpu.matmul %404, %403, %cst_389 {dimension_numbers = #tpu.dot_dimension_numbers<[1], [0], [0], [1], [0, 0, 1, 1], [], []>} : vector<3x8xf32>, vector<8x256xf32>, vector<3x256xf32> -> vector<3x256xf32>
    %c0_390 = arith.constant 0 : index
    %c0_391 = arith.constant 0 : index
    %406 = vector.load %arg15[%c0_390, %c0_391] : memref<3x1xf32, #tpu.memory_space<vmem>>, vector<3x1xf32>
    %407 = vector.broadcast %406 : vector<3x1xf32> to vector<3x256xf32>
    %408 = arith.addf %405, %407 : vector<3x256xf32>
    %c0_392 = arith.constant 0 : index
    %c0_393 = arith.constant 0 : index
    %c0_394 = arith.constant 0 : index
    %409 = vector.load %arg22[%c0_392, %c0_393, %c0_394] : memref<1x3x256xf32, #tpu.memory_space<vmem>>, vector<1x3x256xf32>
    %410 = vector.shape_cast %409 : vector<1x3x256xf32> to vector<3x256xf32>
    %411 = vector.shape_cast %408 : vector<3x256xf32> to vector<1x3x256xf32>
    tpu.vector_store %arg22[%c0_392, %c0_393, %c0_394], %411 {strides = array<i32>} : memref<1x3x256xf32, #tpu.memory_space<vmem>>, vector<1x3x256xf32>,
    return
  }
  func.func @transform_0(%arg0: i32) -> (i32, i32, i32) {
    %c0_i32 = arith.constant 0 : i32
    %c0_i32_0 = arith.constant 0 : i32
    %c0_i32_1 = arith.constant 0 : i32
    return %arg0, %c0_i32, %c0_i32_0 : i32, i32, i32
  }
  func.func @transform_1(%arg0: i32) -> (i32, i32, i32) {
    %c0_i32 = arith.constant 0 : i32
    %c0_i32_0 = arith.constant 0 : i32
    %c0_i32_1 = arith.constant 0 : i32
    %c0_i32_2 = arith.constant 0 : i32
    return %c0_i32, %c0_i32_0, %c0_i32_1 : i32, i32, i32
  }
  func.func @transform_2(%arg0: i32) -> (i32, i32) {
    %c0_i32 = arith.constant 0 : i32
    %c0_i32_0 = arith.constant 0 : i32
    %c0_i32_1 = arith.constant 0 : i32
    return %c0_i32, %c0_i32_0 : i32, i32
  }
  func.func @transform_3(%arg0: i32) -> (i32, i32, i32) {
    %c0_i32 = arith.constant 0 : i32
    %c0_i32_0 = arith.constant 0 : i32
    %c0_i32_1 = arith.constant 0 : i32
    %c0_i32_2 = arith.constant 0 : i32
    return %c0_i32, %c0_i32_0, %c0_i32_1 : i32, i32, i32
  }
  func.func @transform_4(%arg0: i32) -> (i32, i32) {
    %c0_i32 = arith.constant 0 : i32
    %c0_i32_0 = arith.constant 0 : i32
    %c0_i32_1 = arith.constant 0 : i32
    return %c0_i32, %c0_i32_0 : i32, i32
  }
  func.func @transform_5(%arg0: i32) -> (i32, i32, i32) {
    %c0_i32 = arith.constant 0 : i32
    %c0_i32_0 = arith.constant 0 : i32
    %c0_i32_1 = arith.constant 0 : i32
    %c0_i32_2 = arith.constant 0 : i32
    return %c0_i32, %c0_i32_0, %c0_i32_1 : i32, i32, i32
  }
  func.func @transform_6(%arg0: i32) -> (i32, i32) {
    %c0_i32 = arith.constant 0 : i32
    %c0_i32_0 = arith.constant 0 : i32
    %c0_i32_1 = arith.constant 0 : i32
    return %c0_i32, %c0_i32_0 : i32, i32
  }
  func.func @transform_7(%arg0: i32) -> (i32, i32, i32) {
    %c0_i32 = arith.constant 0 : i32
    %c0_i32_0 = arith.constant 0 : i32
    %c0_i32_1 = arith.constant 0 : i32
    %c0_i32_2 = arith.constant 0 : i32
    return %c0_i32, %c0_i32_0, %c0_i32_1 : i32, i32, i32
  }
  func.func @transform_8(%arg0: i32) -> (i32, i32) {
    %c0_i32 = arith.constant 0 : i32
    %c0_i32_0 = arith.constant 0 : i32
    %c0_i32_1 = arith.constant 0 : i32
    return %c0_i32, %c0_i32_0 : i32, i32
  }
  func.func @transform_9(%arg0: i32) -> (i32, i32, i32) {
    %c0_i32 = arith.constant 0 : i32
    %c0_i32_0 = arith.constant 0 : i32
    %c0_i32_1 = arith.constant 0 : i32
    %c0_i32_2 = arith.constant 0 : i32
    return %c0_i32, %c0_i32_0, %c0_i32_1 : i32, i32, i32
  }
  func.func @transform_10(%arg0: i32) -> (i32, i32) {
    %c0_i32 = arith.constant 0 : i32
    %c0_i32_0 = arith.constant 0 : i32
    %c0_i32_1 = arith.constant 0 : i32
    return %c0_i32, %c0_i32_0 : i32, i32
  }
  func.func @transform_11(%arg0: i32) -> (i32, i32, i32) {
    %c0_i32 = arith.constant 0 : i32
    %c0_i32_0 = arith.constant 0 : i32
    %c0_i32_1 = arith.constant 0 : i32
    %c0_i32_2 = arith.constant 0 : i32
    return %c0_i32, %c0_i32_0, %c0_i32_1 : i32, i32, i32
  }
  func.func @transform_12(%arg0: i32) -> (i32, i32) {
    %c0_i32 = arith.constant 0 : i32
    %c0_i32_0 = arith.constant 0 : i32
    %c0_i32_1 = arith.constant 0 : i32
    return %c0_i32, %c0_i32_0 : i32, i32
  }
  func.func @transform_13(%arg0: i32) -> (i32, i32) {
    %c0_i32 = arith.constant 0 : i32
    %c0_i32_0 = arith.constant 0 : i32
    %c0_i32_1 = arith.constant 0 : i32
    return %c0_i32, %c0_i32_0 : i32, i32
  }
  func.func @transform_14(%arg0: i32) -> (i32, i32) {
    %c0_i32 = arith.constant 0 : i32
    %c0_i32_0 = arith.constant 0 : i32
    %c0_i32_1 = arith.constant 0 : i32
    return %c0_i32, %c0_i32_0 : i32, i32
  }
  func.func @transform_15(%arg0: i32) -> (i32, i32) {
    %c0_i32 = arith.constant 0 : i32
    %c0_i32_0 = arith.constant 0 : i32
    %c0_i32_1 = arith.constant 0 : i32
    return %c0_i32, %c0_i32_0 : i32, i32
  }
  func.func @transform_16(%arg0: i32) -> (i32, i32) {
    %c0_i32 = arith.constant 0 : i32
    %c0_i32_0 = arith.constant 0 : i32
    %c0_i32_1 = arith.constant 0 : i32
    return %c0_i32, %c0_i32_0 : i32, i32
  }
  func.func @transform_17(%arg0: i32) -> (i32, i32) {
    %c0_i32 = arith.constant 0 : i32
    %c0_i32_0 = arith.constant 0 : i32
    %c0_i32_1 = arith.constant 0 : i32
    return %c0_i32, %c0_i32_0 : i32, i32
  }
  func.func @transform_18(%arg0: i32) -> (i32, i32) {
    %c0_i32 = arith.constant 0 : i32
    %c0_i32_0 = arith.constant 0 : i32
    %c0_i32_1 = arith.constant 0 : i32
    return %c0_i32, %c0_i32_0 : i32, i32
  }
  func.func @transform_19(%arg0: i32) -> (i32, i32) {
    %c0_i32 = arith.constant 0 : i32
    %c0_i32_0 = arith.constant 0 : i32
    %c0_i32_1 = arith.constant 0 : i32
    return %c0_i32, %c0_i32_0 : i32, i32
  }
  func.func @transform_20(%arg0: i32) -> (i32, i32) {
    %c0_i32 = arith.constant 0 : i32
    %c0_i32_0 = arith.constant 0 : i32
    %c0_i32_1 = arith.constant 0 : i32
    return %c0_i32, %c0_i32_0 : i32, i32
  }
  func.func @transform_21(%arg0: i32) -> (i32, i32, i32) {
    %c0_i32 = arith.constant 0 : i32
    %c0_i32_0 = arith.constant 0 : i32
    %c0_i32_1 = arith.constant 0 : i32
    return %arg0, %c0_i32, %c0_i32_0 : i32, i32, i32
  }
}

</mosaic_0001>

<bundles_post_ra>
// kernel: unet_forward.1
= control target key start
LH: loop header
LB: loop body
LE: loop exit
PB: predicated region body
PF: predicated region fallthrough
CT: control target
= control target key end

     0   :  { %s9617_s0 = inlined_call_operand.vmem [shape: f32[2,4,256], index: 0, kind: input, shape index: {}]   ;;  %s9618_s1 = inlined_call_operand.vmem [shape: f32[9,8,4], index: 1, kind: input, shape index: {}]   ;;  %s9619_s2 = inlined_call_operand.vmem [shape: f32[8,1], index: 2, kind: input, shape index: {}]   ;;  %s9620_s3 = inlined_call_operand.vmem [shape: f32[9,8,8], index: 3, kind: input, shape index: {}]   ;;  %s9621_s4 = inlined_call_operand.vmem [shape: f32[8,1], index: 4, kind: input, shape index: {}]   ;;  %s9622_s5 = inlined_call_operand.vmem [shape: f32[9,16,8], index: 5, kind: input, shape index: {}]   ;;  %s9623_s6 = inlined_call_operand.vmem [shape: f32[16,1], index: 6, kind: input, shape index: {}]   ;;  %s9624_s7 = inlined_call_operand.vmem [shape: f32[9,16,16], index: 7, kind: input, shape index: {}]   ;;  %s9625_s8 = inlined_call_operand.vmem [shape: f32[16,1], index: 8, kind: input, shape index: {}]   ;;  %s9626_s9 = inlined_call_operand.vmem [shape: f32[9,12,24], index: 9, kind: input, shape index: {}]   ;;  %s9627_s10 = inlined_call_operand.vmem [shape: f32[12,1], index: 10, kind: input, shape index: {}]   ;;  %s9628_s11 = inlined_call_operand.vmem [shape: f32[9,8,12], index: 11, kind: input, shape index: {}]   ;;  %s9629_s12 = inlined_call_operand.vmem [shape: f32[8,1], index: 12, kind: input, shape index: {}]   ;;  %s9630_s13 = inlined_call_operand.vmem [shape: f32[3,8], index: 13, kind: input, shape index: {}]   ;;  %s9631_s14 = inlined_call_operand.vmem [shape: f32[3,1], index: 14, kind: input, shape index: {}]   ;;  %s9632_s15 = inlined_call_operand.vmem [shape: f32[256,64], index: 15, kind: input, shape index: {}]   ;;  %s9633_s16 = inlined_call_operand.vmem [shape: f32[64,256], index: 16, kind: input, shape index: {}]   ;;  %s9634_s17 = inlined_call_operand.vmem [shape: f32[1,256], index: 17, kind: input, shape index: {}]   ;;  %s9635_s18 = inlined_call_operand.vmem [shape: f32[1,256], index: 18, kind: input, shape index: {}]   ;;  %s9636_s19 = inlined_call_operand.vmem [shape: f32[1,64], index: 19, kind: input, shape index: {}]   ;;  %s9637_s20 = inlined_call_operand.vmem [shape: f32[1,64], index: 20, kind: input, shape index: {}]   ;;  %s9638_s21 = inlined_call_operand.vmem [shape: f32[2,3,256], index: 21, kind: output, shape index: {}]  }
   0x1   :  { %9692 = sst [smem:[#allocation6_spill]] %s9617_s0 }
   0x2   :  { %9693 = sst [smem:[#allocation7_spill]] %s9618_s1 }
   0x3   :  { %9694 = sst [smem:[#allocation8_spill]] %s9619_s2  ;;  %s8156_s2 = smov 0  }
   0x4   :  { %9695 = sst [smem:[#allocation9_spill]] %s9620_s3 }
   0x5   :  { %9696 = sst [smem:[#allocation10_spill]] %s9621_s4 }
   0x6   :  { %9697 = sst [smem:[#allocation11_spill]] %s9622_s5 }
   0x7   :  { %9698 = sst [smem:[#allocation12_spill]] %s9623_s6 }
   0x8   :  { %9699 = sst [smem:[#allocation13_spill]] %s9625_s8 }
   0x9   :  { %9700 = sst [smem:[#allocation14_spill]] %s9628_s11 }
   0xa   :  { %9701 = sst [smem:[#allocation15_spill]] %s9629_s12 }
   0xb   :  { %9702 = sst [smem:[#allocation16_spill]] %s9630_s13 }
   0xc   :  { %9703 = sst [smem:[#allocation17_spill]] %s9631_s14 }
   0xd   :  { %9704 = sst [smem:[#allocation18_spill]] %s9632_s15 }
   0xe   :  { %9705 = sst [smem:[#allocation19_spill]] %s9636_s19 }
   0xf   :  { %9706 = sst [smem:[#allocation20_spill]] %s9638_s21 }
  0x10 LB: > { %9707 = sst [smem:[#allocation4_spill]] %s8021_s2  ;;  %s6985_s25 = sadd.s32 4294967295, %s8021_s2   ;;  %s8021_s2 = sphi %s8156_s2, %s31_s2  }
  0x11   : > { %p6989_p0 = scmp.ge.s32.totalorder %s8021_s2, 1  ;;  %p587_p1 = scmp.lt.s32.totalorder %s8021_s2, 3 }
  0x13   : > { %p588_p2 = pnand %p6989_p0, %p587_p1 }
  0x15   : > { %591 = sbr.rel (%p588_p2) target bundleno = 4318 (0x10de), region = 104 }
  0x1c   : > { %p647_p3 = scmp.lt.s32.totalorder %s6985_s25, 1  ;;  %v692_v0 = vlaneseq  ;;  %vm657_vm0 = vcmask 138240   ;;  %vm661_vm1 = vcmask 277640   ;;  %v8023_v2 = vmov 0.0   ;;  %v688_v3 = vld [vmem:[%s9635_s18] sm:$0x3] }
  0x1d   : > { %658 = vst.msk [vmem:[#allocation2] sm:$0xff] %vm657_vm0, %v8023_v2  ;;  %659 = vst.msk [vmem:[#allocation2 + $0x18] sm:$0xff] %vm657_vm0, %v8023_v2  ;;  %793 = vmatprep.mubr.f32.mxu0 %v8023_v2  ;;  %1727 = vmatprep.mubr.f32.mxu1 %v8023_v2  ;;  %s9709_s0 = sld [smem:[#allocation6_spill]]  ;;  %s9672_s30 = smov 17   ;;  %v687_v10 = vld [vmem:[%s9634_s17] sm:$0x3] }
  0x1e   : > { %s9780_s25 = smov (!%p647_p3, %s6985_s25), 1  ;;  %v693_v1 = vshrl.u32 %v692_v0, 7  ;;  %660 = vst.msk [vmem:[#allocation2 + $0x30] sm:$0xff] %vm657_vm0, %v8023_v2  ;;  %s9670_s5 = smov 2   ;;  %vm9658_vm2 = vcmask 1043592   ;;  %vm9657_vm3 = vcmask 134144  }
  0x1f   : > { %9708 = sst [smem:[#allocation5_spill]] %s9780_s25  ;;  %662 = vst.msk [vmem:[#allocation2 + $0x10] sm:$0xff] %vm661_vm1, %v8023_v2  ;;  %663 = vst.msk [vmem:[#allocation2 + $0x28] sm:$0xff] %vm661_vm1, %v8023_v2  ;;  %s9642_s3 = sshll.u32 %s9780_s25, 3  ;;  %vm893_vm4 = vcmask 15360   ;;  %vm999_vm5 = vcmask 130048  }
  0x20   : > { %664 = vst.msk [vmem:[#allocation2 + $0x40] sm:$0xff] %vm661_vm1, %v8023_v2  ;;  %v8181_v4 = vsub.s32 0, %v693_v1  ;;  %v8183_v5 = vsub.s32 1, %v693_v1  ;;  %s9667_s1 = smov 16   ;;  %s9665_s24 = smov 18   ;;  %vm1196_vm6 = vcmask 146432  }
  0x21   : > { %s9661_s26 = smov 32   ;;  %s9663_s27 = smov 127   ;;  %vm1302_vm7 = vcmask 261120   ;;  %vm9679_vm8 = vcmask 1039360   ;;  %vm9669_vm9 = vcmask 1043456   ;;  %vm720_vm10 = vcmask 31744  }
  0x22   : > { %v884_v7 = vrot.slane %v688_v3, %v8181_v4  ;;  %v888_v9 = vrot.slane %v688_v3, %v8183_v5  ;;  %v8199_v11 = vrot.slane %v687_v10, %v8181_v4  ;;  %v8203_v12 = vrot.slane %v687_v10, %v8183_v5  ;;  %s9655_s28 = smov 34   ;;  %s9653_s29 = smov 126  }
  0x23   : > { %s651_s4 = scalar_lea.vmem %s9709_s0, %s9642_s3  ;;  %s9651_s0 = smov 112   ;;  %vm1499_vm11 = vcmask 277504   ;;  %v8037_v50 = vmov 0   ;;  %vm912_vm12 = vcmask 1031168   ;;  %vm1018_vm13 = vcmask 916480  }
  0x24   : > { %v671_v6 = vld [vmem:[%s651_s4] sm:$0xff]  ;;  %889 = vrot.lane.b32.xlu1 %v884_v7, %s9670_s5  ;;  %s9647_s4 = smov 111   ;;  %s9645_s22 = smov 110   ;;  %7717 = vset.pattern.permute.xlu0 %v8037_v50  ;;  %vm9691_vm14 = vcmask 908288   ;;  %vm9690_vm15 = vcmask 900096   ;;  %vm1321_vm1 = vcmask 785408  }
  0x25   : > { %674 = vrot.lane.b32.xlu0 %v671_v6, %s9672_s30  ;;  %v673_v8 = vcombine.high %v671_v6, %v671_v6  ;;  %s9643_s23 = smov 96   ;;  %s9649_s3 = smov 95   ;;  %7733 = vset.pattern.permute.xlu1 %v8037_v50 }
  0x26   : > { %s9723_s15 = sld [smem:[#allocation18_spill]]  ;;  %s9724_s2 = smov 2  }
  0x27   : > { %s9725_s19 = sld [smem:[#allocation19_spill]]  ;;  %s9683_s13 = smov 8  }
  0x28   : > { %891 = vrot.lane.b32.xlu1 %v888_v9, %s9670_s5  ;;  %s9726_s25 = smov 16   ;;  %s9727_s12 = smov 18  }
  0x29   : > { %676 = vrot.lane.b32.xlu0 %v673_v8, %s9672_s30  ;;  %s9729_s21 = smov 127   ;;  %s9687_s14 = smov 118  }
  0x2a   : > { %s9686_s11 = smov 119   ;;  %s9730_s6 = sld [smem:[#allocation12_spill]] }
  0x2b   : > { %s9737_s8 = sld [smem:[#allocation13_spill]] }
  0x2c   : > { %997 = vrot.lane.b32.xlu1 %v8203_v12, %s9667_s1 }
  0x2d   : > { %995 = vrot.lane.b32.xlu0 %v8199_v11, %s9667_s1 }
  0x30   : > { %1194 = vrot.lane.b32.xlu1 %v888_v9, %s9665_s24 }
  0x31   : > { %1192 = vrot.lane.b32.xlu0 %v884_v7, %s9665_s24 }
  0x34   : > { %1300 = vrot.lane.b32.xlu1 %v8203_v12, %s9661_s26 }
  0x35   : > { %1298 = vrot.lane.b32.xlu0 %v8199_v11, %s9661_s26 }
  0x96   : > { %v890_v16 = vpop.permute.xlu1 %889 }
  0x97   : > { %v675_v13 = vpop.permute.xlu0 %674 }
  0x98   : > { %683 = vst.msk [vmem:[#allocation2] sm:$0xf] %vm9658_vm2, %v675_v13  ;;  %vm1518_vm2 = vcmask 769024  }
  0x9a   : > { %v892_v20 = vpop.permute.xlu1 %891 }
  0x9b   : > { %v677_v14 = vpop.permute.xlu0 %676  ;;  %v894_v21 = vsel %vm893_vm4, %v890_v16, %v892_v20 }
  0x9c   : > { %v678_v15 = vsel %vm657_vm0, %v675_v13, %v677_v14  ;;  %686 = vst.msk [vmem:[#allocation2 + $0x10] sm:$0xf] %vm9657_vm3, %v677_v14  ;;  %vm9680_vm3 = vcmask 777216  }
  0x9d   : > { %684 = vst [vmem:[#allocation2 + $0x8] sm:$0xf] %v678_v15 }
  0x9e   : > { %v998_v25 = vpop.permute.xlu1 %997 }
  0x9f   : > { %v8218_v17 = vld [vmem:[#allocation2] sm:$0xf]  ;;  %v996_v24 = vpop.permute.xlu0 %995 }
  0xa0   : > { %711 = vrot.lane.b32.xlu0 %v8218_v17, %s9663_s27  ;;  %v1000_v26 = vsel %vm999_vm5, %v996_v24, %v998_v25  ;;  %v898_v27 = vmul.f32 %v890_v16, %v8218_v17  ;;  %v1004_v30 = vmul.f32 %v996_v24, %v8218_v17  ;;  %v702_v52 = vmul.f32 %v8199_v11, %v8218_v17 }
  0xa2   : > { %v1195_v32 = vpop.permute.xlu1 %1194 }
  0xa3   : > { %v8222_v18 = vld [vmem:[#allocation2 + $0x10] sm:$0xf]  ;;  %v1193_v31 = vpop.permute.xlu0 %1192 }
  0xa4   : > { %715 = vrot.lane.b32.xlu1 %v8222_v18, %s9663_s27  ;;  %v8226_v19 = vld [vmem:[#allocation2 + $0x8] sm:$0xf]  ;;  %v900_v23 = vmul.f32 %v892_v20, %v8222_v18  ;;  %v1006_v29 = vmul.f32 %v998_v25, %v8222_v18  ;;  %v1197_v33 = vsel %vm1196_vm6, %v1193_v31, %v1195_v32  ;;  %v1203_v37 = vmul.f32 %v1195_v32, %v8222_v18 }
  0xa5   : > { %713 = vrot.lane.b32.xlu0 %v8226_v19, %s9663_s27  ;;  %v899_v22 = vmul.f32 %v894_v21, %v8226_v19  ;;  %v1005_v28 = vmul.f32 %v1000_v26, %v8226_v19  ;;  %v1202_v34 = vmul.f32 %v1197_v33, %v8226_v19  ;;  %v1201_v38 = vmul.f32 %v1193_v31, %v8218_v17 }
  0xa6   : > { %v1301_v36 = vpop.permute.xlu1 %1300  ;;  %v703_v49 = vmul.f32 %v8203_v12, %v8226_v19 }
  0xa7   : > { %v1299_v35 = vpop.permute.xlu0 %1298  ;;  %v1309_v41 = vmul.f32 %v1301_v36, %v8222_v18 }
  0xa8   : > { %1495 = vrot.lane.b32.xlu1 %v884_v7, %s9655_s28  ;;  %v1303_v39 = vsel %vm1302_vm7, %v1299_v35, %v1301_v36  ;;  %v1307_v42 = vmul.f32 %v1299_v35, %v8218_v17 }
  0xa9   : > { %1497 = vrot.lane.b32.xlu0 %v888_v9, %s9655_s28  ;;  %v1308_v40 = vmul.f32 %v1303_v39, %v8226_v19  ;;  %s9717_s28 = smov 96  }
  0xac   : > { %908 = vrot.lane.b32.xlu1 %v899_v22, %s9653_s29 }
  0xad   : > { %910 = vrot.lane.b32.xlu0 %v900_v23, %s9653_s29 }
  0xb0   : > { %906 = vrot.lane.b32.xlu1 %v898_v27, %s9653_s29  ;;  %s9713_s29 = smov 126  }
  0xb1   : > { %1014 = vrot.lane.b32.xlu0 %v1005_v28, %s9651_s0 }
  0xb4   : > { %1016 = vrot.lane.b32.xlu1 %v1006_v29, %s9651_s0 }
  0xb5   : > { %1012 = vrot.lane.b32.xlu0 %v1004_v30, %s9651_s0  ;;  %s9711_s0 = sld [smem:[#allocation8_spill]] }
  0xb8   : > { %1105 = vrot.lane.b32.xlu1 %v8226_v19, %s9647_s4 }
  0xb9   : > { %1107 = vrot.lane.b32.xlu0 %v8222_v18, %s9647_s4 }
  0xbb   : > { %v1601_v59 = vld [vmem:[%s9711_s0] sm:$0xff]  ;;  %s9714_s0 = smov 112  }
  0xbc   : > { %1103 = vrot.lane.b32.xlu1 %v8218_v17, %s9647_s4  ;;  %s9710_s4 = sld [smem:[#allocation7_spill]] }
  0xbd   : > { %1211 = vrot.lane.b32.xlu0 %v1202_v34, %s9645_s22 }
  0xc0   : > { %1213 = vrot.lane.b32.xlu1 %v1203_v37, %s9645_s22 }
  0xc1   : > { %1209 = vrot.lane.b32.xlu0 %v1201_v38, %s9645_s22  ;;  %s9659_s22 = smov 94  }
  0xc2   : > { %v6994_v48 = vld [vmem:[%s9710_s4 + $0x8] sm:$0xff]  ;;  %v704_v61 = vld [vmem:[%s9710_s4] sm:$0xff]  ;;  %v7001_v8 = vld [vmem:[%s9710_s4 + $0x10] sm:$0xff] }
  0xc3   : > { %v7005_v15 = vld [vmem:[%s9710_s4 + $0x18] sm:$0xff]  ;;  %v7009_v21 = vld [vmem:[%s9710_s4 + $0x20] sm:$0xff]  ;;  %v7013_v26 = vld [vmem:[%s9710_s4 + $0x28] sm:$0xff] }
  0xc4   : > { %1317 = vrot.lane.b32.xlu1 %v1308_v40, %s9643_s23  ;;  %v7017_v32 = vld [vmem:[%s9710_s4 + $0x30] sm:$0xff]  ;;  %v7021_v34 = vld [vmem:[%s9710_s4 + $0x38] sm:$0xff]  ;;  %v7025_v39 = vld [vmem:[%s9710_s4 + $0x40] sm:$0xff]  ;;  %s9728_s4 = sld [smem:[#allocation11_spill]] }
  0xc5   : > { %1319 = vrot.lane.b32.xlu0 %v1309_v41, %s9643_s23  ;;  %v1626_v41 = vld [vmem:[%s9635_s18] sm:$0x3] }
  0xc8   : > { %1315 = vrot.lane.b32.xlu1 %v1307_v42, %s9643_s23  ;;  %v1812_v42 = vrot.slane %v1626_v41, %v8181_v4  ;;  %s9715_s23 = smov 111  }
  0xc9   : > { %1408 = vrot.lane.b32.xlu0 %v8226_v19, %s9649_s3 }
  0xcc   : > { %1410 = vrot.lane.b32.xlu1 %v8222_v18, %s9649_s3 }
  0xcd   : > { %1406 = vrot.lane.b32.xlu0 %v8218_v17, %s9649_s3  ;;  %s9716_s3 = smov 110  }
 0x112   : > { %v712_v43 = vpop.permute.xlu0 %711 }
 0x116   : > { %v716_v44 = vpop.permute.xlu1 %715 }
 0x117   : > { %v714_v45 = vpop.permute.xlu0 %713 }
 0x118   : > { %v719_v46 = vsel %vm9679_vm8, %v714_v45, %v716_v44  ;;  %v718_v47 = vsel %vm9679_vm8, %v712_v43, %v714_v45  ;;  %v1625_v43 = vld [vmem:[%s9634_s17] sm:$0x3] }
 0x119   : > { %6995 = vmatprep.subr.msk.mxu0 %vm9669_vm9, %v719_v46  ;;  %v8373_v44 = vrot.slane %v1625_v43, %v8181_v4 }
 0x11a   : > { %v1496_v51 = vpop.permute.xlu1 %1495  ;;  %6996 = vmatpush1.msk.msra.mxu0 %vm9669_vm9, %v718_v47 }
 0x11b   : > { %6997 = vmatmul.mubr.msk.f32.vlgmr.msra.gmra.mrb[0].mxu0 %vm720_vm10, %v6994_v48  ;;  %6998 = vmatprep.subr.msk.mxu0 %vm9669_vm9, %v703_v49  ;;  %v1498_v53 = vpop.permute.xlu0 %1497  ;;  %v1504_v62 = vmul.f32 %v1496_v51, %v8218_v17 }
 0x11c   : > { %v1500_v54 = vsel %vm1499_vm11, %v1496_v51, %v1498_v53  ;;  %v1506_v55 = vmul.f32 %v1498_v53, %v8222_v18  ;;  %6999 = vmatpush1.msk.msra.mxu0 %vm9669_vm9, %v702_v52  ;;  %873 = vmatprep.mubr.f32.mxu0 %v8023_v2  ;;  %v1816_v52 = vrot.slane %v1626_v41, %v8183_v5 }
 0x11d   : > { %v1505_v56 = vmul.f32 %v1500_v54, %v8226_v19  ;;  %v8385_v53 = vrot.slane %v1625_v43, %v8183_v5 }
 0x11e   : > { %v909_v57 = vpop.permute.xlu1 %908  ;;  %1516 = vrot.lane.b32.xlu0 %v1506_v55, %s9659_s22 }
 0x11f   : > { %1514 = vrot.lane.b32.xlu1 %v1505_v56, %s9659_s22  ;;  %v911_v58 = vpop.permute.xlu0 %910 }
 0x120   : > { %v914_v60 = vsel %vm912_vm12, %v909_v57, %v911_v58 }
 0x121   : > { %7002 = vmatprep.subr.msk.mxu0 %vm9669_vm9, %v914_v60 }
 0x122   : > { %v907_v63 = vpop.permute.xlu1 %906  ;;  %1604 = vperm.xlu0 %7717, %v1601_v59  }
 0x123   : > { %v913_v0 = vsel %vm912_vm12, %v907_v63, %v909_v57  ;;  %7000 = vmatmul.mubr.msk.f32.vlgmr.msra.gmra.mrb[0].mxu0 %vm720_vm10, %v704_v61  ;;  %1512 = vrot.lane.b32.xlu1 %v1504_v62, %s9659_s22  ;;  %v1015_v1 = vpop.permute.xlu0 %1014  ;;  %s9712_s22 = smov 34  }
 0x124   : > { %7003 = vmatpush1.msk.msra.mxu0 %vm9669_vm9, %v913_v0  ;;  %986 = vmatprep.mubr.f32.mxu0 %v8023_v2 }
 0x126   : > { %v1017_v3 = vpop.permute.xlu1 %1016  ;;  %1817 = vrot.lane.b32.xlu0 %v1812_v42, %s9670_s5 }
 0x127   : > { %v1020_v6 = vsel %vm1018_vm13, %v1015_v1, %v1017_v3  ;;  %v1013_v7 = vpop.permute.xlu0 %1012 }
 0x128   : > { %7006 = vmatprep.subr.msk.mxu0 %vm9669_vm9, %v1020_v6  ;;  %v1019_v10 = vsel %vm1018_vm13, %v1013_v7, %v1015_v1 }
 0x12a   : > { %v1106_v9 = vpop.permute.xlu1 %1105  ;;  %1919 = vrot.lane.b32.xlu0 %v8373_v44, %s9667_s1 }
 0x12b   : > { %7004 = vmatmul.mubr.msk.f32.vlgmr.msra.gmra.mrb[0].mxu0 %vm720_vm10, %v7001_v8  ;;  %v1108_v11 = vpop.permute.xlu0 %1107 }
 0x12c   : > { %7007 = vmatpush1.msk.msra.mxu0 %vm9669_vm9, %v1019_v10  ;;  %v1111_v12 = vsel %vm9691_vm14, %v1106_v9, %v1108_v11  ;;  %1092 = vmatprep.mubr.f32.mxu0 %v8023_v2 }
 0x12d   : > { %7010 = vmatprep.subr.msk.mxu0 %vm9669_vm9, %v1111_v12 }
 0x12e   : > { %v1104_v13 = vpop.permute.xlu1 %1103  ;;  %2109 = vrot.lane.b32.xlu0 %v1812_v42, %s9665_s24 }
 0x12f   : > { %v1212_v14 = vpop.permute.xlu0 %1211  ;;  %v1110_v17 = vsel %vm9691_vm14, %v1104_v13, %v1106_v9 }
 0x132   : > { %v1214_v16 = vpop.permute.xlu1 %1213  ;;  %2211 = vrot.lane.b32.xlu0 %v8373_v44, %s9661_s26 }
 0x133   : > { %v1217_v18 = vsel %vm9690_vm15, %v1212_v14, %v1214_v16  ;;  %7008 = vmatmul.mubr.msk.f32.vlgmr.msra.gmra.mrb[0].mxu0 %vm720_vm10, %v7005_v15  ;;  %v1210_v19 = vpop.permute.xlu0 %1209 }
 0x134   : > { %7011 = vmatpush1.msk.msra.mxu0 %vm9669_vm9, %v1110_v17  ;;  %1183 = vmatprep.mubr.f32.mxu0 %v8023_v2  ;;  %v1216_v23 = vsel %vm9690_vm15, %v1210_v19, %v1212_v14 }
 0x135   : > { %7014 = vmatprep.subr.msk.mxu0 %vm9669_vm9, %v1217_v18 }
 0x136   : > { %v1318_v20 = vpop.permute.xlu1 %1317 }
 0x137   : > { %v1320_v22 = vpop.permute.xlu0 %1319 }
 0x138   : > { %v1323_v25 = vsel %vm1321_vm1, %v1318_v20, %v1320_v22 }
 0x13a   : > { %v1316_v24 = vpop.permute.xlu1 %1315 }
 0x13b   : > { %7012 = vmatmul.mubr.msk.f32.vlgmr.msra.gmra.mrb[0].mxu0 %vm720_vm10, %v7009_v21  ;;  %v1409_v28 = vpop.permute.xlu0 %1408  ;;  %v1322_v29 = vsel %vm1321_vm1, %v1316_v24, %v1318_v20 }
 0x13c   : > { %7015 = vmatpush1.msk.msra.mxu0 %vm9669_vm9, %v1216_v23  ;;  %1289 = vmatprep.mubr.f32.mxu0 %v8023_v2 }
 0x13d   : > { %7018 = vmatprep.subr.msk.mxu0 %vm9669_vm9, %v1323_v25 }
 0x13e   : > { %v1411_v27 = vpop.permute.xlu1 %1410 }
 0x13f   : > { %v1414_v30 = vsel %vm9680_vm3, %v1409_v28, %v1411_v27  ;;  %v1407_v31 = vpop.permute.xlu0 %1406 }
 0x140   : > { %v1413_v33 = vsel %vm9680_vm3, %v1407_v31, %v1409_v28 }
 0x143   : > { %7016 = vmatmul.mubr.msk.f32.vlgmr.msra.gmra.mrb[0].mxu0 %vm720_vm10, %v7013_v26 }
 0x144   : > { %7019 = vmatpush1.msk.msra.mxu0 %vm9669_vm9, %v1322_v29  ;;  %1395 = vmatprep.mubr.f32.mxu0 %v8023_v2 }
 0x145   : > { %7022 = vmatprep.subr.msk.mxu0 %vm9669_vm9, %v1414_v30 }
 0x14b   : > { %7020 = vmatmul.mubr.msk.f32.vlgmr.msra.gmra.mrb[0].mxu0 %vm720_vm10, %v7017_v32 }
 0x14c   : > { %7023 = vmatpush1.msk.msra.mxu0 %vm9669_vm9, %v1413_v33  ;;  %1486 = vmatprep.mubr.f32.mxu0 %v8023_v2 }
 0x153   : > { %7024 = vmatmul.mubr.msk.f32.vlgmr.msra.gmra.mrb[0].mxu0 %vm720_vm10, %v7021_v34 }
 0x154   : > { %1592 = vmatprep.mubr.f32.mxu0 %v8023_v2 }
 0x190   : > { %v1517_v35 = vpop.permute.xlu0 %1516 }
 0x191   : > { %v1515_v36 = vpop.permute.xlu1 %1514 }
 0x192   : > { %v1520_v37 = vsel %vm1518_vm2, %v1515_v36, %v1517_v35 }
 0x193   : > { %7026 = vmatprep.subr.msk.mxu0 %vm9669_vm9, %v1520_v37 }
 0x195   : > { %v1513_v38 = vpop.permute.xlu1 %1512 }
 0x196   : > { %v1519_v40 = vsel %vm1518_vm2, %v1513_v38, %v1515_v36 }
 0x197   : > { %7027 = vmatpush1.msk.msra.mxu0 %vm9669_vm9, %v1519_v40  ;;  %vm9689_vm9 = vcmask 64512  }
 0x198   : > { %7028 = vmatmul.mubr.msk.f32.vlgmr.msra.gmra.mrb[0].mxu0 %vm720_vm10, %v7025_v39  ;;  %vm1621_vm10 = vcmask 1047688  }
 0x1a1   : > { %v1605_v45 = vpop.permute.xlu0 %1604 }
 0x1a5   : > { %v1818_v60 = vpop.permute.xlu0 %1817 }
 0x1a9   : > { %v1920_v63 = vpop.permute.xlu0 %1919 }
 0x1ad   : > { %v2110_v11 = vpop.permute.xlu0 %2109 }
 0x1b1   : > { %v2212_v16 = vpop.permute.xlu0 %2211 }
 0x26b   : > { %v1594_v46 = vpop.f32.mrb[0].mxu0 }
 0x26c   : > { %v1607_v47 = vadd.f32 %v1605_v45, %v1594_v46  ;;  %v1596_v48 = vpop.f32.mrb[1].mxu0 }
 0x26d   : > { %v1608_v49 = vadd.f32 %v1605_v45, %v1596_v48 }
 0x26e   : > { %v1609_v50 = vmax.f32 %v1607_v47, 0.0 }
 0x26f   : > { %v1610_v51 = vmax.f32 %v1608_v49, 0.0 }
 0x270   : > { %1613 = vrot.lane.b32.xlu1 %v1609_v50, %s9672_s30 }
 0x274   : > { %1615 = vrot.lane.b32.xlu1 %v1610_v51, %s9672_s30  ;;  %s9721_s30 = sld [smem:[#allocation10_spill]] }
 0x278   : > { %1819 = vrot.lane.b32.xlu1 %v1816_v52, %s9670_s5  ;;  %s9684_s5 = smov 9  }
 0x27a   : > { %v2503_v37 = vld [vmem:[%s9721_s30] sm:$0xff]  ;;  %s9682_s30 = smov 10  }
 0x27c   : > { %1921 = vrot.lane.b32.xlu1 %v8385_v53, %s9667_s1  ;;  %s9719_s1 = sld [smem:[#allocation9_spill]] }
 0x280   : > { %2111 = vrot.lane.b32.xlu1 %v1816_v52, %s9665_s24  ;;  %s9720_s24 = smov 94  }
 0x282   : > { %v7029_v27 = vld [vmem:[%s9719_s1 + $0x8] sm:$0xff]  ;;  %v1642_v39 = vld [vmem:[%s9719_s1] sm:$0xff]  ;;  %v7032_v47 = vld [vmem:[%s9719_s1 + $0x10] sm:$0xff] }
 0x284   : > { %2213 = vrot.lane.b32.xlu1 %v8385_v53, %s9661_s26  ;;  %s9718_s26 = smov 95  }
 0x2e2   : > { %v1614_v54 = vpop.permute.xlu1 %1613 }
 0x2e3   : > { %1622 = vst.msk [vmem:[#allocation2] sm:$0xff] %vm1621_vm10, %v1614_v54 }
 0x2e6   : > { %v1616_v55 = vpop.permute.xlu1 %1615 }
 0x2e7   : > { %1624 = vst.msk [vmem:[#allocation2 + $0x10] sm:$0xff] %vm657_vm0, %v1616_v55  ;;  %v8399_v58 = vsel %vm657_vm0, %v1614_v54, %v1616_v55  ;;  %v7034_v54 = vld [vmem:[%s9719_s1 + $0x18] sm:$0xff] }
 0x2e8   : > { %v1641_v28 = vmul.f32 %v8385_v53, %v8399_v58 }
 0x2ea   : > { %v8394_v56 = vld [vmem:[#allocation2] sm:$0xff]  ;;  %v1820_v57 = vpop.permute.xlu1 %1819 }
 0x2eb   : > { %1649 = vrot.lane.b32.xlu0 %v8394_v56, %s9663_s27  ;;  %v1821_v61 = vsel %vm893_vm4, %v1818_v60, %v1820_v57  ;;  %v1825_v6 = vmul.f32 %v1818_v60, %v8394_v56  ;;  %v1927_v8 = vmul.f32 %v1920_v63, %v8394_v56  ;;  %v2117_v15 = vmul.f32 %v2110_v11, %v8394_v56  ;;  %v7036_v60 = vld [vmem:[%s9719_s1 + $0x20] sm:$0xff] }
 0x2ec   : > { %v1826_v1 = vmul.f32 %v1821_v61, %v8399_v58  ;;  %v2219_v21 = vmul.f32 %v2212_v16, %v8394_v56  ;;  %v1640_v29 = vmul.f32 %v8373_v44, %v8394_v56 }
 0x2ee   : > { %v8401_v59 = vld [vmem:[#allocation2 + $0x10] sm:$0xff]  ;;  %v1922_v62 = vpop.permute.xlu1 %1921 }
 0x2ef   : > { %1653 = vrot.lane.b32.xlu1 %v8401_v59, %s9663_s27  ;;  %1651 = vrot.lane.b32.xlu0 %v8399_v58, %s9663_s27  ;;  %v1827_v0 = vmul.f32 %v1820_v57, %v8401_v59  ;;  %v1923_v3 = vsel %vm999_vm5, %v1920_v63, %v1922_v62  ;;  %v1929_v9 = vmul.f32 %v1922_v62, %v8401_v59  ;;  %s9722_s27 = smov 17  }
 0x2f0   : > { %v1928_v7 = vmul.f32 %v1923_v3, %v8399_v58 }
 0x2f2   : > { %v2112_v10 = vpop.permute.xlu1 %2111 }
 0x2f3   : > { %2401 = vrot.lane.b32.xlu1 %v1812_v42, %s9712_s22  ;;  %2403 = vrot.lane.b32.xlu0 %v1816_v52, %s9712_s22  ;;  %v2113_v12 = vsel %vm1196_vm6, %v2110_v11, %v2112_v10  ;;  %v2119_v17 = vmul.f32 %v2112_v10, %v8401_v59  ;;  %v7040_v10 = vld [vmem:[%s9719_s1 + $0x30] sm:$0xff] }
 0x2f4   : > { %v2118_v13 = vmul.f32 %v2113_v12, %v8399_v58  ;;  %v7042_v12 = vld [vmem:[%s9719_s1 + $0x38] sm:$0xff] }
 0x2f6   : > { %v2214_v14 = vpop.permute.xlu1 %2213 }
 0x2f7   : > { %1835 = vrot.lane.b32.xlu1 %v1826_v1, %s9713_s29  ;;  %1837 = vrot.lane.b32.xlu0 %v1827_v0, %s9713_s29  ;;  %v2215_v18 = vsel %vm1302_vm7, %v2212_v16, %v2214_v14  ;;  %v2221_v19 = vmul.f32 %v2214_v14, %v8401_v59  ;;  %v7038_v1 = vld [vmem:[%s9719_s1 + $0x28] sm:$0xff] }
 0x2f8   : > { %v2220_v20 = vmul.f32 %v2215_v18, %v8399_v58 }
 0x2fb   : > { %1833 = vrot.lane.b32.xlu1 %v1825_v6, %s9713_s29  ;;  %1937 = vrot.lane.b32.xlu0 %v1928_v7, %s9714_s0 }
 0x2ff   : > { %1939 = vrot.lane.b32.xlu1 %v1929_v9, %s9714_s0  ;;  %1935 = vrot.lane.b32.xlu0 %v1927_v8, %s9714_s0 }
 0x303   : > { %2025 = vrot.lane.b32.xlu1 %v8399_v58, %s9715_s23  ;;  %2027 = vrot.lane.b32.xlu0 %v8401_v59, %s9715_s23 }
 0x307   : > { %2023 = vrot.lane.b32.xlu1 %v8394_v56, %s9715_s23  ;;  %2127 = vrot.lane.b32.xlu0 %v2118_v13, %s9716_s3 }
 0x30b   : > { %2129 = vrot.lane.b32.xlu1 %v2119_v17, %s9716_s3  ;;  %2125 = vrot.lane.b32.xlu0 %v2117_v15, %s9716_s3  ;;  %v7044_v17 = vld [vmem:[%s9719_s1 + $0x40] sm:$0xff]  ;;  %s9681_s1 = smov 120  }
 0x30f   : > { %2229 = vrot.lane.b32.xlu1 %v2220_v20, %s9717_s28  ;;  %2231 = vrot.lane.b32.xlu0 %v2221_v19, %s9717_s28 }
 0x313   : > { %2227 = vrot.lane.b32.xlu1 %v2219_v21, %s9717_s28  ;;  %2317 = vrot.lane.b32.xlu0 %v8399_v58, %s9718_s26 }
 0x317   : > { %2319 = vrot.lane.b32.xlu1 %v8401_v59, %s9718_s26  ;;  %2315 = vrot.lane.b32.xlu0 %v8394_v56, %s9718_s26 }
 0x35d   : > { %v1650_v22 = vpop.permute.xlu0 %1649 }
 0x361   : > { %v1654_v23 = vpop.permute.xlu1 %1653  ;;  %v1652_v24 = vpop.permute.xlu0 %1651 }
 0x362   : > { %v1656_v25 = vsel %vm9679_vm8, %v1652_v24, %v1654_v23  ;;  %v1655_v26 = vsel %vm9679_vm8, %v1650_v22, %v1652_v24  ;;  %vm665_vm8 = vcmask 72704  }
 0x363   : > { %1663 = vmatprep.subr.mxu1 %v1656_v25  ;;  %666 = vst.msk [vmem:[#allocation3] sm:$0xff] %vm665_vm8, %v8023_v2  ;;  %667 = vst.msk [vmem:[#allocation3 + $0x8] sm:$0xff] %vm665_vm8, %v8023_v2  ;;  %vm4439_vm8 = vcmask 523264  }
 0x364   : > { %1664 = vmatpush1.msra.mxu1 %v1655_v26  ;;  %v2584_v26 = vld [vmem:[%s9723_s15 + $0x80] sm:$0xff] }
 0x365   : > { %v2402_v30 = vpop.permute.xlu1 %2401  ;;  %7030 = vmatmul.mubr.msk.f32.vlgmr.msra.gmra.mrb[0].mxu1 %vm9689_vm9, %v7029_v27  ;;  %1737 = vmatprep.subr.mxu1 %v1641_v28  ;;  %v2404_v31 = vpop.permute.xlu0 %2403  ;;  %v2585_v27 = vld [vmem:[%s9723_s15 + $0x88] sm:$0xff]  ;;  %v2568_v28 = vld [vmem:[%s9723_s15] sm:$0xff] }
 0x366   : > { %v2405_v32 = vsel %vm1499_vm11, %v2402_v30, %v2404_v31  ;;  %v2411_v33 = vmul.f32 %v2404_v31, %v8401_v59  ;;  %1738 = vmatpush1.msra.mxu1 %v1640_v29  ;;  %1801 = vmatprep.mubr.f32.mxu1 %v8023_v2  ;;  %v2409_v40 = vmul.f32 %v2402_v30, %v8394_v56  ;;  %v2569_v30 = vld [vmem:[%s9723_s15 + $0x8] sm:$0xff]  ;;  %v2586_v31 = vld [vmem:[%s9723_s15 + $0x90] sm:$0xff] }
 0x367   : > { %v2410_v34 = vmul.f32 %v2405_v32, %v8399_v58  ;;  %v7400_v29 = vpack.c.bf16 %v2585_v27, %v2584_v26  ;;  %v2587_v32 = vld [vmem:[%s9723_s15 + $0x98] sm:$0xff] }
 0x368   : > { %2421 = vrot.lane.b32.xlu0 %v2411_v33, %s9720_s24  ;;  %v7402_v33 = vpack.c.bf16 %v2569_v30, %v2568_v28 }
 0x369   : > { %v1836_v35 = vpop.permute.xlu1 %1835  ;;  %2419 = vrot.lane.b32.xlu1 %v2410_v34, %s9720_s24  ;;  %v1838_v36 = vpop.permute.xlu0 %1837  ;;  %v7404_v34 = vpack.c.bf16 %v2587_v32, %v2586_v31  ;;  %7401 = vmatprep.subr.bf16.mxu0 %v7400_v29 }
 0x36a   : > { %v1840_v38 = vsel %vm912_vm12, %v1836_v35, %v1838_v36  ;;  %v2571_v36 = vld [vmem:[%s9723_s15 + $0x18] sm:$0xff]  ;;  %7403 = vmatpush3.bf16.msra.mxu0 %v7402_v33 }
 0x36b   : > { %1846 = vmatprep.subr.mxu1 %v1840_v38  ;;  %v2589_v38 = vld [vmem:[%s9723_s15 + $0xa8] sm:$0xff]  ;;  %7405 = vmatprep.subr.bf16.mxu0 %v7404_v34 }
 0x36c   : > { %2506 = vperm.xlu0 %7717, %v2503_v37   ;;  %v2588_v37 = vld [vmem:[%s9723_s15 + $0xa0] sm:$0xff] }
 0x36d   : > { %v1834_v41 = vpop.permute.xlu1 %1833  ;;  %7031 = vmatmul.mubr.msk.f32.vlgmr.msra.gmra.mrb[0].mxu1 %vm9689_vm9, %v1642_v39  ;;  %2417 = vrot.lane.b32.xlu1 %v2409_v40, %s9720_s24  ;;  %v1938_v42 = vpop.permute.xlu0 %1937  ;;  %v7408_v40 = vpack.c.bf16 %v2589_v38, %v2588_v37 }
 0x36e   : > { %v1839_v43 = vsel %vm912_vm12, %v1834_v41, %v1836_v35  ;;  %1910 = vmatprep.mubr.f32.mxu1 %v8023_v2  ;;  %v2570_v35 = vld [vmem:[%s9723_s15 + $0x10] sm:$0xff]  ;;  %v2572_v41 = vld [vmem:[%s9723_s15 + $0x20] sm:$0xff] }
 0x36f   : > { %1847 = vmatpush1.msra.mxu1 %v1839_v43  ;;  %v7406_v39 = vpack.c.bf16 %v2571_v36, %v2570_v35  ;;  %v2590_v43 = vld [vmem:[%s9723_s15 + $0xb0] sm:$0xff] }
 0x371   : > { %v1940_v44 = vpop.permute.xlu1 %1939  ;;  %v1936_v45 = vpop.permute.xlu0 %1935  ;;  %7407 = vmatpush3.bf16.msra.mxu0 %v7406_v39 }
 0x372   : > { %v1942_v46 = vsel %vm1018_vm13, %v1938_v42, %v1940_v44  ;;  %v1941_v48 = vsel %vm1018_vm13, %v1936_v45, %v1938_v42  ;;  %v2573_v42 = vld [vmem:[%s9723_s15 + $0x28] sm:$0xff]  ;;  %v2591_v44 = vld [vmem:[%s9723_s15 + $0xb8] sm:$0xff]  ;;  %7409 = vmatprep.subr.bf16.mxu0 %v7408_v40 }
 0x373   : > { %1948 = vmatprep.subr.mxu1 %v1942_v46  ;;  %v7410_v45 = vpack.c.bf16 %v2573_v42, %v2572_v41  ;;  %v7412_v46 = vpack.c.bf16 %v2591_v44, %v2590_v43 }
 0x375   : > { %v2026_v49 = vpop.permute.xlu1 %2025  ;;  %7033 = vmatmul.mubr.msk.f32.vlgmr.msra.gmra.mrb[0].mxu1 %vm9689_vm9, %v7032_v47  ;;  %v2028_v50 = vpop.permute.xlu0 %2027  ;;  %v2574_v47 = vld [vmem:[%s9723_s15 + $0x30] sm:$0xff]  ;;  %7411 = vmatpush3.bf16.msra.mxu0 %v7410_v45 }
 0x376   : > { %1949 = vmatpush1.msra.mxu1 %v1941_v48  ;;  %v2030_v51 = vsel %vm9691_vm14, %v2026_v49, %v2028_v50  ;;  %2012 = vmatprep.mubr.f32.mxu1 %v8023_v2  ;;  %v2575_v48 = vld [vmem:[%s9723_s15 + $0x38] sm:$0xff]  ;;  %v2592_v50 = vld [vmem:[%s9723_s15 + $0xc0] sm:$0xff] }
 0x377   : > { %2036 = vmatprep.subr.mxu1 %v2030_v51  ;;  %7413 = vmatprep.subr.bf16.mxu0 %v7412_v46  ;;  %v2593_v51 = vld [vmem:[%s9723_s15 + $0xc8] sm:$0xff] }
 0x379   : > { %v2024_v52 = vpop.permute.xlu1 %2023  ;;  %v2128_v53 = vpop.permute.xlu0 %2127 }
 0x37a   : > { %v2029_v55 = vsel %vm9691_vm14, %v2024_v52, %v2026_v49  ;;  %v7414_v49 = vpack.c.bf16 %v2575_v48, %v2574_v47  ;;  %v2576_v52 = vld [vmem:[%s9723_s15 + $0x40] sm:$0xff]  ;;  %v7047_v48 = vld [vmem:[%s9728_s4 + $0x10] sm:$0xff] }
 0x37b   : > { %v8672_v47 = vld [vmem:[%s9725_s19] ss:$0 sm:$0xff]  ;;  %s9736_s19 = smov 119  }
 0x37c   : > { %7415 = vmatpush3.bf16.msra.mxu0 %v7414_v49 }
 0x37d   : > { %v2130_v56 = vpop.permute.xlu1 %2129  ;;  %7035 = vmatmul.mubr.msk.f32.vlgmr.msra.gmra.mrb[0].mxu1 %vm9689_vm9, %v7034_v54  ;;  %v2126_v57 = vpop.permute.xlu0 %2125  ;;  %v2577_v54 = vld [vmem:[%s9723_s15 + $0x48] sm:$0xff] }
 0x37e   : > { %2037 = vmatpush1.msra.mxu1 %v2029_v55  ;;  %v2132_v58 = vsel %vm9690_vm15, %v2128_v53, %v2130_v56  ;;  %2100 = vmatprep.mubr.f32.mxu1 %v8023_v2  ;;  %v2131_v62 = vsel %vm9690_vm15, %v2126_v57, %v2128_v53  ;;  %v7416_v53 = vpack.c.bf16 %v2593_v51, %v2592_v50  ;;  %v2594_v56 = vld [vmem:[%s9723_s15 + $0xd0] sm:$0xff]  ;;  %v2595_v57 = vld [vmem:[%s9723_s15 + $0xd8] sm:$0xff] }
 0x37f   : > { %2138 = vmatprep.subr.mxu1 %v2132_v58  ;;  %v7418_v55 = vpack.c.bf16 %v2577_v54, %v2576_v52 }
 0x380   : > { %7417 = vmatprep.subr.bf16.mxu0 %v7416_v53 }
 0x381   : > { %v2230_v59 = vpop.permute.xlu1 %2229  ;;  %v2232_v61 = vpop.permute.xlu0 %2231  ;;  %7419 = vmatpush3.bf16.msra.mxu0 %v7418_v55 }
 0x382   : > { %v2234_v0 = vsel %vm1321_vm1, %v2230_v59, %v2232_v61  ;;  %v2579_v61 = vld [vmem:[%s9723_s15 + $0x58] sm:$0xff] }
 0x385   : > { %v2228_v63 = vpop.permute.xlu1 %2227  ;;  %7037 = vmatmul.mubr.msk.f32.vlgmr.msra.gmra.mrb[0].mxu1 %vm9689_vm9, %v7036_v60  ;;  %v2318_v6 = vpop.permute.xlu0 %2317  ;;  %v2578_v60 = vld [vmem:[%s9723_s15 + $0x50] sm:$0xff] }
 0x386   : > { %2139 = vmatpush1.msra.mxu1 %v2131_v62  ;;  %2202 = vmatprep.mubr.f32.mxu1 %v8023_v2  ;;  %v2233_v7 = vsel %vm1321_vm1, %v2228_v63, %v2230_v59  ;;  %v7420_v59 = vpack.c.bf16 %v2595_v57, %v2594_v56  ;;  %v7422_v63 = vpack.c.bf16 %v2579_v61, %v2578_v60  ;;  %v3511_v61 = vld [vmem:[%s9730_s6 + $0x8] sm:$0xff] }
 0x387   : > { %2240 = vmatprep.subr.mxu1 %v2234_v0  ;;  %v2596_v0 = vld [vmem:[%s9723_s15 + $0xe0] sm:$0xff] }
 0x388   : > { %7421 = vmatprep.subr.bf16.mxu0 %v7420_v59 }
 0x389   : > { %v2320_v3 = vpop.permute.xlu1 %2319  ;;  %v2316_v9 = vpop.permute.xlu0 %2315  ;;  %7423 = vmatpush3.bf16.msra.mxu0 %v7422_v63 }
 0x38a   : > { %v2322_v8 = vsel %vm9680_vm3, %v2318_v6, %v2320_v3  ;;  %v2321_v11 = vsel %vm9680_vm3, %v2316_v9, %v2318_v6  ;;  %v2580_v6 = vld [vmem:[%s9723_s15 + $0x60] sm:$0xff]  ;;  %v2598_v9 = vld [vmem:[%s9723_s15 + $0xf0] sm:$0xff] }
 0x38d   : > { %7039 = vmatmul.mubr.msk.f32.vlgmr.msra.gmra.mrb[0].mxu1 %vm9689_vm9, %v7038_v1  ;;  %v2597_v1 = vld [vmem:[%s9723_s15 + $0xe8] sm:$0xff] }
 0x38e   : > { %2241 = vmatpush1.msra.mxu1 %v2233_v7  ;;  %2304 = vmatprep.mubr.f32.mxu1 %v8023_v2  ;;  %v7424_v3 = vpack.c.bf16 %v2597_v1, %v2596_v0  ;;  %v2581_v7 = vld [vmem:[%s9723_s15 + $0x68] sm:$0xff]  ;;  %v7048_v0 = vld [vmem:[%s9728_s4 + $0x18] sm:$0xff] }
 0x38f   : > { %2328 = vmatprep.subr.mxu1 %v2322_v8  ;;  %v7426_v8 = vpack.c.bf16 %v2581_v7, %v2580_v6  ;;  %v2687_v7 = vld [vmem:[%s9728_s4 + $0x8] sm:$0xff] }
 0x390   : > { %7425 = vmatprep.subr.bf16.mxu0 %v7424_v3  ;;  %v2686_v3 = vld [vmem:[%s9728_s4] sm:$0xff] }
 0x391   : > { %7427 = vmatpush3.bf16.msra.mxu0 %v7426_v8  ;;  %v7054_v8 = vld [vmem:[%s9728_s4 + $0x20] sm:$0xff] }
 0x395   : > { %7041 = vmatmul.mubr.msk.f32.vlgmr.msra.gmra.mrb[0].mxu1 %vm9689_vm9, %v7040_v10  ;;  %v2599_v10 = vld [vmem:[%s9723_s15 + $0xf8] sm:$0xff] }
 0x396   : > { %2329 = vmatpush1.msra.mxu1 %v2321_v11  ;;  %2392 = vmatprep.mubr.f32.mxu1 %v8023_v2 }
 0x39d   : > { %7043 = vmatmul.mubr.msk.f32.vlgmr.msra.gmra.mrb[0].mxu1 %vm9689_vm9, %v7042_v12  ;;  %v7428_v12 = vpack.c.bf16 %v2599_v10, %v2598_v9  ;;  %v7055_v10 = vld [vmem:[%s9728_s4 + $0x28] sm:$0xff] }
 0x39e   : > { %2494 = vmatprep.mubr.f32.mxu1 %v8023_v2 }
 0x39f   : > { %7429 = vmatprep.subr.bf16.mxu0 %v7428_v12 }
 0x3da   : > { %v2422_v13 = vpop.permute.xlu0 %2421 }
 0x3db   : > { %v2420_v14 = vpop.permute.xlu1 %2419 }
 0x3dc   : > { %v2424_v15 = vsel %vm1518_vm2, %v2420_v14, %v2422_v13  ;;  %v2582_v13 = vld [vmem:[%s9723_s15 + $0x70] sm:$0xff] }
 0x3dd   : > { %2430 = vmatprep.subr.mxu1 %v2424_v15 }
 0x3df   : > { %v2418_v16 = vpop.permute.xlu1 %2417 }
 0x3e0   : > { %v2423_v18 = vsel %vm1518_vm2, %v2418_v16, %v2420_v14  ;;  %v2583_v14 = vld [vmem:[%s9723_s15 + $0x78] sm:$0xff]  ;;  %s9735_s15 = smov 118  }
 0x3e1   : > { %2431 = vmatpush1.msra.mxu1 %v2423_v18 }
 0x3e2   : > { %7045 = vmatmul.mubr.msk.f32.vlgmr.msra.gmra.mrb[0].mxu1 %vm9689_vm9, %v7044_v17  ;;  %v7430_v17 = vpack.c.bf16 %v2583_v14, %v2582_v13  ;;  %v7059_v13 = vld [vmem:[%s9728_s4 + $0x38] sm:$0xff]  ;;  %v7062_v14 = vld [vmem:[%s9728_s4 + $0x40] sm:$0xff] }
 0x3e3   : > { %7294 = vmatprep.mubr.msk.f32.mxu1 %vm9689_vm9, %v7047_v48 }
 0x3e4   : > { %7431 = vmatpush3.bf16.msra.mxu0 %v7430_v17  ;;  %v7063_v17 = vld [vmem:[%s9728_s4 + $0x48] sm:$0xff] }
 0x3eb   : > { %v2507_v19 = vpop.permute.xlu0 %2506 }
 0x4b5   : > { %v2496_v20 = vpop.f32.mrb[0].mxu1 }
 0x4b6   : > { %v8523_v21 = vadd.f32 %v2507_v19, %v2496_v20  ;;  %v2498_v22 = vpop.f32.mrb[1].mxu1 }
 0x4b7   : > { %v8525_v23 = vadd.f32 %v2507_v19, %v2498_v22 }
 0x4b8   : > { %v2511_v24 = vmax.f32 %v8523_v21, 0.0  ;;  %v8658_v21 = vld [vmem:[%s9637_s20] ss:$0 sm:$0xff] }
 0x4b9   : > { %v2512_v25 = vmax.f32 %v8525_v23, 0.0 }
 0x4ba   : > { %2515 = vrot.lane.b32.xlu1 %v2511_v24, %s9722_s27 }
 0x4bb   : > { %2517 = vrot.lane.b32.xlu0 %v2512_v25, %s9722_s27 }
 0x52c   : > { %v2516_v58 = vpop.permute.xlu1 %2515 }
 0x52d   : > { %2523 = vst.msk [vmem:[#allocation2] sm:$0xff] %vm1621_vm10, %v2516_v58  ;;  %v2518_v62 = vpop.permute.xlu0 %2517 }
 0x52e   : > { %2525 = vst.msk [vmem:[#allocation2 + $0x10] sm:$0xff] %vm657_vm0, %v2518_v62  ;;  %v8634_v15 = vsel %vm657_vm0, %v2516_v58, %v2518_v62 }
 0x534   : > { %v2526_v11 = vld [vmem:[#allocation2] sm:$0xff] }
 0x535   : > { %v2528_v16 = vld [vmem:[#allocation2 + $0x10] sm:$0xff]  ;;  %2532 = vrot.lane.b32.xlu0 %v2526_v11, %s9716_s3  ;;  %4523 = vst.msk [vmem:[#allocation2] sm:$0xff] %vm1621_vm10, %v2516_v58 }
 0x536   : > { %4525 = vst.msk [vmem:[#allocation2 + $0x10] sm:$0xff] %vm657_vm0, %v2518_v62  ;;  %v7718_v18 = vpack.i.bf16 %v2528_v16, %v8634_v15  ;;  %v3510_v62 = vld [vmem:[%s9730_s6] sm:$0xff] }
 0x538   : > { %7719 = vrot.lane.b32.xlu1 %v7718_v18, %s9716_s3 }
 0x539   : > { %2544 = vrot.lane.b32.xlu0 %v2526_v11, %s9718_s26 }
 0x53c   : > { %7724 = vrot.lane.b32.xlu1 %v7718_v18, %s9718_s26 }
 0x53d   : > { %2556 = vrot.lane.b32.xlu0 %v2526_v11, %s9720_s24  ;;  %v7058_v11 = vld [vmem:[%s9728_s4 + $0x30] sm:$0xff] }
 0x540   : > { %7729 = vrot.lane.b32.xlu1 %v7718_v18, %s9720_s24  ;;  %v7066_v18 = vld [vmem:[%s9728_s4 + $0x50] sm:$0xff] }
 0x541   : > { %2862 = vrot.lane.b32.xlu0 %v8658_v21, %s9724_s2 }
 0x545   : > { %3139 = vrot.lane.b32.xlu0 %v8658_v21, %s9682_s30  ;;  %s9733_s30 = smov 10  }
 0x5a7   : > { %v2533_v19 = vpop.permute.xlu0 %2532 }
 0x5aa   : > { %v7720_v20 = vpop.permute.xlu1 %7719 }
 0x5ab   : > { %v7722_v22 = vunpack.i.h.bf16 %v7720_v20  ;;  %v7721_v26 = vunpack.i.l.bf16 %v7720_v20  ;;  %v2545_v27 = vpop.permute.xlu0 %2544  ;;  %v7067_v20 = vld [vmem:[%s9728_s4 + $0x58] sm:$0xff] }
 0x5ad   : > { %v2538_v29 = vsel %vm9690_vm15, %v2533_v19, %v7721_v26  ;;  %v2539_v30 = vsel %vm9690_vm15, %v7721_v26, %v7722_v22  ;;  %v7070_v22 = vld [vmem:[%s9728_s4 + $0x60] sm:$0xff] }
 0x5ae   : > { %v7725_v28 = vpop.permute.xlu1 %7724  ;;  %v2542_v35 = vmax.f32 %v2511_v24, %v2538_v29  ;;  %v2543_v37 = vmax.f32 %v2512_v25, %v2539_v30  ;;  %v7075_v30 = vld [vmem:[%s9728_s4 + $0x78] sm:$0xff] }
 0x5af   : > { %v7727_v31 = vunpack.i.h.bf16 %v7725_v28  ;;  %v7726_v32 = vunpack.i.l.bf16 %v7725_v28  ;;  %v2557_v40 = vpop.permute.xlu0 %2556  ;;  %v7074_v28 = vld [vmem:[%s9728_s4 + $0x70] sm:$0xff] }
 0x5b1   : > { %v2550_v33 = vsel %vm9680_vm3, %v2545_v27, %v7726_v32  ;;  %v2551_v34 = vsel %vm9680_vm3, %v7726_v32, %v7727_v31  ;;  %vm668_vm3 = vcmask 671304   ;;  %v7071_v27 = vld [vmem:[%s9728_s4 + $0x68] sm:$0xff]  ;;  %v7078_v31 = vld [vmem:[%s9728_s4 + $0x80] sm:$0xff] }
 0x5b2   : > { %v7730_v36 = vpop.permute.xlu1 %7729  ;;  %v2554_v41 = vmax.f32 %v2542_v35, %v2550_v33  ;;  %v2555_v42 = vmax.f32 %v2543_v37, %v2551_v34  ;;  %669 = vst.msk [vmem:[#allocation3] sm:$0xff] %vm668_vm3, %v8023_v2  ;;  %670 = vst.msk [vmem:[#allocation3 + $0x8] sm:$0xff] %vm668_vm3, %v8023_v2  ;;  %vm2674_vm3 = vcmask 597064   ;;  %v7079_v32 = vld [vmem:[%s9728_s4 + $0x88] sm:$0xff] }
 0x5b3   : > { %v7732_v38 = vunpack.i.h.bf16 %v7730_v36  ;;  %v7731_v39 = vunpack.i.l.bf16 %v7730_v36  ;;  %v2863_v50 = vpop.permute.xlu0 %2862 }
 0x5b5   : > { %v2562_v43 = vsel %vm1518_vm2, %v2557_v40, %v7731_v39  ;;  %v2563_v44 = vsel %vm1518_vm2, %v7731_v39, %v7732_v38 }
 0x5b6   : > { %v2567_v45 = vmax.f32 %v2555_v42, %v2563_v44  ;;  %v2566_v46 = vmax.f32 %v2554_v41, %v2562_v43  ;;  %v7083_v44 = vld [vmem:[%s9624_s7 + $0x10] sm:$0xff] }
 0x5b7   : > { %v3140_v54 = vpop.permute.xlu0 %3139 }
 0x5b8   : > { %2664 = vmatprep.mubr.f32.mxu0 %v2567_v45 }
 0x5b9   : > { %2665 = vmatmul.mubr.f32.vlgmr.msra.gmra.mrb[2].mxu0 %v2566_v46 }
 0x5ba   : > { %7341 = vmatprep.mubr.msk.f32.mxu0 %vm999_vm5, %v7083_v44  ;;  %v7090_v44 = vld [vmem:[%s9624_s7 + $0x20] sm:$0xff] }
 0x68c   : > { %v7226_v23 = vpop.f32.mrb[2].mxu0 }
 0x68d   : > { %v7227_v24 = vpop.f32.mrb[3].mxu0 }
 0x68e   : > { %v7228_v25 = vadd.f32 %v7227_v24, %v7226_v23 }
 0x690   : > { %2671 = vrot.lane.b32.xlu1 %v7228_v25, %s9684_s5 }
 0x694   : > { %2956 = vrot.lane.b32.xlu1 %v8672_v47, %s9683_s13 }
 0x698   : > { %3233 = vrot.lane.b32.xlu1 %v8672_v47, %s9726_s25 }
 0x69c   : > { %3416 = vrot.lane.b32.xlu1 %v8658_v21, %s9727_s12 }
 0x702   : > { %v2672_v49 = vpop.permute.xlu1 %2671 }
 0x703   : > { %2675 = vst.msk [vmem:[#allocation3] sm:$0xff] %vm2674_vm3, %v2672_v49 }
 0x706   : > { %v2957_v52 = vpop.permute.xlu1 %2956 }
 0x70a   : > { %v2678_v51 = vld [vmem:[#allocation3] sm:$0xff]  ;;  %v3234_v57 = vpop.permute.xlu1 %3233 }
 0x70b   : > { %v2959_v53 = vmul.f32 %v2957_v52, %v2678_v51  ;;  %2692 = vrot.lane.b32.xlu0 %v2678_v51, %s9729_s21  ;;  %v2865_v55 = vmul.f32 %v2863_v50, %v2678_v51  ;;  %v3142_v56 = vmul.f32 %v3140_v54, %v2678_v51  ;;  %v3236_v58 = vmul.f32 %v3234_v57, %v2678_v51 }
 0x70c   : > { %v2685_v1 = vmul.f32 %v8672_v47, %v2678_v51 }
 0x70d   : > { %2964 = vrot.lane.b32.xlu1 %v2959_v53, %s9681_s1  ;;  %s9734_s1 = smov 120  }
 0x70e   : > { %v3417_v59 = vpop.permute.xlu1 %3416 }
 0x70f   : > { %2870 = vrot.lane.b32.xlu0 %v2865_v55, %s9713_s29  ;;  %v3419_v60 = vmul.f32 %v3417_v59, %v2678_v51 }
 0x711   : > { %3147 = vrot.lane.b32.xlu1 %v3142_v56, %s9687_s14  ;;  %s9731_s14 = smov 9  }
 0x713   : > { %3053 = vrot.lane.b32.xlu0 %v2678_v51, %s9686_s11  ;;  %s9732_s11 = smov 8  }
 0x715   : > { %3330 = vrot.lane.b32.xlu1 %v2678_v51, %s9715_s23 }
 0x717   : > { %3241 = vrot.lane.b32.xlu0 %v3236_v58, %s9714_s0 }
 0x719   : > { %3514 = vperm.xlu1 %7733, %v3510_v62  }
 0x71b   : > { %3424 = vrot.lane.b32.xlu0 %v3419_v60, %s9716_s3 }
 0x71f   : > { %3519 = vperm.xlu0 %7717, %v3511_v61  }
 0x77d   : > { %v2693_v63 = vpop.permute.xlu0 %2692 }
 0x77e   : > { %7292 = vmatprep.subr.mxu1 %v2693_v63 }
 0x77f   : > { %7293 = vmatpush3.msra.mxu1 %v2693_v63  ;;  %v2965_v9 = vpop.permute.xlu1 %2964 }
 0x780   : > { %7295 = vmatmul.mubr.msk.f32.vlgmr.msra.gmra.mrb[2].mxu1 %vm9689_vm9, %v7048_v0  ;;  %7297 = vmatprep.subr.mxu1 %v2685_v1 }
 0x781   : > { %v2871_v6 = vpop.permute.xlu0 %2870  ;;  %7298 = vmatpush3.msra.mxu1 %v2685_v1  ;;  %7299 = vmatprep.mubr.msk.f32.mxu1 %vm9689_vm9, %v2686_v3  ;;  %v4407_v1 = vld [vmem:[%s9737_s8] sm:$0xff] }
 0x782   : > { %7302 = vmatprep.subr.mxu1 %v2871_v6 }
 0x783   : > { %v3148_v16 = vpop.permute.xlu1 %3147 }
 0x785   : > { %v3054_v12 = vpop.permute.xlu0 %3053 }
 0x787   : > { %v3331_v26 = vpop.permute.xlu1 %3330 }
 0x788   : > { %7300 = vmatmul.mubr.msk.f32.vlgmr.msra.gmra.mrb[2].mxu1 %vm9689_vm9, %v2687_v7  ;;  %v4424_v7 = vld [vmem:[%s9633_s16 + $0x8] sm:$0xff] }
 0x789   : > { %7303 = vmatpush3.msra.mxu1 %v2871_v6  ;;  %7304 = vmatprep.mubr.msk.f32.mxu1 %vm9689_vm9, %v7054_v8  ;;  %v3242_v19 = vpop.permute.xlu0 %3241  ;;  %v4408_v6 = vld [vmem:[%s9737_s8 + $0x8] sm:$0xff]  ;;  %v4426_v8 = vld [vmem:[%s9633_s16 + $0x18] sm:$0xff] }
 0x78a   : > { %7307 = vmatprep.subr.mxu1 %v2965_v9 }
 0x78d   : > { %v3425_v29 = vpop.permute.xlu0 %3424 }
 0x790   : > { %7305 = vmatmul.mubr.msk.f32.vlgmr.msra.gmra.mrb[2].mxu1 %vm9689_vm9, %v7055_v10  ;;  %v7468_v10 = vpack.c.bf16 %v4426_v8, %v4424_v7  ;;  %v7107_v8 = vld [vmem:[%s9624_s7 + $0x68] sm:$0xff] }
 0x791   : > { %7308 = vmatpush3.msra.mxu1 %v2965_v9  ;;  %7309 = vmatprep.mubr.msk.f32.mxu1 %vm9689_vm9, %v7058_v11  ;;  %v4423_v9 = vld [vmem:[%s9633_s16] sm:$0xff]  ;;  %v4425_v11 = vld [vmem:[%s9633_s16 + $0x10] sm:$0xff] }
 0x792   : > { %7312 = vmatprep.subr.mxu1 %v3054_v12 }
 0x798   : > { %7310 = vmatmul.mubr.msk.f32.vlgmr.msra.gmra.mrb[2].mxu1 %vm9689_vm9, %v7059_v13  ;;  %v3515_v33 = vpop.permute.xlu1 %3514  ;;  %v4430_v13 = vld [vmem:[%s9633_s16 + $0x38] sm:$0xff] }
 0x799   : > { %7313 = vmatpush3.msra.mxu1 %v3054_v12  ;;  %7314 = vmatprep.mubr.msk.f32.mxu1 %vm9689_vm9, %v7062_v14  ;;  %v4428_v12 = vld [vmem:[%s9633_s16 + $0x28] sm:$0xff]  ;;  %v7470_v14 = vpack.c.bf16 %v4425_v11, %v4423_v9  ;;  %v7110_v9 = vld [vmem:[%s9624_s7 + $0x70] sm:$0xff]  ;;  %v7111_v11 = vld [vmem:[%s9624_s7 + $0x78] sm:$0xff] }
 0x79a   : > { %7317 = vmatprep.subr.mxu1 %v3148_v16 }
 0x79e   : > { %v3520_v34 = vpop.permute.xlu0 %3519 }
 0x7a0   : > { %7315 = vmatmul.mubr.msk.f32.vlgmr.msra.gmra.mrb[2].mxu1 %vm9689_vm9, %v7063_v17  ;;  %v4427_v17 = vld [vmem:[%s9633_s16 + $0x20] sm:$0xff] }
 0x7a1   : > { %7318 = vmatpush3.msra.mxu1 %v3148_v16  ;;  %7319 = vmatprep.mubr.msk.f32.mxu1 %vm9689_vm9, %v7066_v18  ;;  %v7472_v16 = vpack.c.bf16 %v4430_v13, %v4428_v12  ;;  %v4429_v18 = vld [vmem:[%s9633_s16 + $0x30] sm:$0xff]  ;;  %v7114_v12 = vld [vmem:[%s9624_s7 + $0x80] sm:$0xff]  ;;  %v7115_v13 = vld [vmem:[%s9624_s7 + $0x88] sm:$0xff] }
 0x7a2   : > { %7322 = vmatprep.subr.mxu1 %v3242_v19 }
 0x7a8   : > { %7320 = vmatmul.mubr.msk.f32.vlgmr.msra.gmra.mrb[2].mxu1 %vm9689_vm9, %v7067_v20  ;;  %v4434_v20 = vld [vmem:[%s9633_s16 + $0x58] sm:$0xff] }
 0x7a9   : > { %7323 = vmatpush3.msra.mxu1 %v3242_v19  ;;  %7324 = vmatprep.mubr.msk.f32.mxu1 %vm9689_vm9, %v7070_v22  ;;  %v4432_v19 = vld [vmem:[%s9633_s16 + $0x48] sm:$0xff]  ;;  %v7474_v22 = vpack.c.bf16 %v4429_v18, %v4427_v17  ;;  %v4435_v18 = vld [vmem:[%s9633_s16 + $0x60] sm:$0xff] }
 0x7aa   : > { %7327 = vmatprep.subr.mxu1 %v3331_v26 }
 0x7b0   : > { %7325 = vmatmul.mubr.msk.f32.vlgmr.msra.gmra.mrb[2].mxu1 %vm9689_vm9, %v7071_v27  ;;  %v4431_v27 = vld [vmem:[%s9633_s16 + $0x40] sm:$0xff] }
 0x7b1   : > { %7328 = vmatpush3.msra.mxu1 %v3331_v26  ;;  %7329 = vmatprep.mubr.msk.f32.mxu1 %vm9689_vm9, %v7074_v28  ;;  %v7476_v26 = vpack.c.bf16 %v4434_v20, %v4432_v19  ;;  %v4433_v28 = vld [vmem:[%s9633_s16 + $0x50] sm:$0xff] }
 0x7b2   : > { %7332 = vmatprep.subr.mxu1 %v3425_v29  ;;  %v4437_v19 = vld [vmem:[%s9633_s16 + $0x70] sm:$0xff] }
 0x7b3   : > { %v7482_v20 = vpack.c.bf16 %v4437_v19, %v4435_v18 }
 0x7b8   : > { %7330 = vmatmul.mubr.msk.f32.vlgmr.msra.gmra.mrb[2].mxu1 %vm9689_vm9, %v7075_v30 }
 0x7b9   : > { %7333 = vmatpush3.msra.mxu1 %v3425_v29  ;;  %7334 = vmatprep.mubr.msk.f32.mxu1 %vm9689_vm9, %v7078_v31  ;;  %v7478_v29 = vpack.c.bf16 %v4433_v28, %v4431_v27 }
 0x7ba   : > { %7469 = vmatprep.subr.bf16.mxu1 %v7468_v10 }
 0x7c0   : > { %7335 = vmatmul.mubr.msk.f32.vlgmr.msra.gmra.mrb[2].mxu1 %vm9689_vm9, %v7079_v32 }
 0x7c1   : > { %4510 = vmatprep.mubr.f32.mxu1 %v8023_v2  ;;  %7471 = vmatpush1.bf16.msra.mxu1 %v7470_v14  ;;  %v4436_v14 = vld [vmem:[%s9633_s16 + $0x68] sm:$0xff] }
 0x7c2   : > { %7473 = vmatprep.subr.bf16.mxu1 %v7472_v16  ;;  %v4438_v16 = vld [vmem:[%s9633_s16 + $0x78] sm:$0xff] }
 0x7c3   : > { %v7480_v17 = vpack.c.bf16 %v4438_v16, %v4436_v14 }
 0x7c5   : > { %7475 = vmatpush1.bf16.msra.mxu1 %v7474_v22 }
 0x7c6   : > { %7477 = vmatprep.subr.bf16.mxu1 %v7476_v26 }
 0x7c9   : > { %7479 = vmatpush1.bf16.msra.mxu1 %v7478_v29 }
 0x7ca   : > { %7481 = vmatprep.subr.bf16.mxu1 %v7480_v17 }
 0x7cd   : > { %7483 = vmatpush1.bf16.msra.mxu1 %v7482_v20 }
 0x893   : > { %v7336_v35 = vpop.f32.mrb[2].mxu1 }
 0x894   : > { %v3523_v36 = vadd.f32 %v7336_v35, %v3520_v34  ;;  %v3499_v37 = vpop.f32.mrb[3].mxu1 }
 0x895   : > { %v3522_v38 = vadd.f32 %v3515_v33, %v3499_v37  ;;  %v7084_v37 = vld [vmem:[%s9624_s7 + $0x18] sm:$0xff] }
 0x896   : > { %v3525_v39 = vmax.f32 %v3523_v36, 0.0 }
 0x897   : > { %v3524_v40 = vmax.f32 %v3522_v38, 0.0  ;;  %v3548_v38 = vld [vmem:[%s9624_s7] sm:$0xff] }
 0x898   : > { %3530 = vrot.lane.b32.xlu0 %v3525_v39, %s9731_s14 }
 0x899   : > { %3528 = vrot.lane.b32.xlu1 %v3524_v40, %s9731_s14  ;;  %s9738_s14 = smov 32  }
 0x89c   : > { %3827 = vrot.lane.b32.xlu0 %v8672_v47, %s9732_s11 }
 0x89d   : > { %3728 = vrot.lane.b32.xlu1 %v8658_v21, %s9724_s2 }
 0x8a0   : > { %4117 = vrot.lane.b32.xlu0 %v8672_v47, %s9726_s25 }
 0x8a1   : > { %4018 = vrot.lane.b32.xlu1 %v8658_v21, %s9733_s30 }
 0x8a4   : > { %4308 = vrot.lane.b32.xlu0 %v8658_v21, %s9727_s12 }
 0x90a   : > { %v3531_v41 = vpop.permute.xlu0 %3530 }
 0x90b   : > { %3535 = vst.msk [vmem:[#allocation3 + $0x8] sm:$0xff] %vm2674_vm3, %v3531_v41  ;;  %v3529_v42 = vpop.permute.xlu1 %3528 }
 0x90c   : > { %3534 = vst.msk [vmem:[#allocation3] sm:$0xff] %vm2674_vm3, %v3529_v42  ;;  %vm4624_vm3 = vcmask 195584  }
 0x90e   : > { %v3828_v46 = vpop.permute.xlu0 %3827 }
 0x90f   : > { %v3729_v43 = vpop.permute.xlu1 %3728 }
 0x912   : > { %v3539_v45 = vld [vmem:[#allocation3 + $0x8] sm:$0xff]  ;;  %v4118_v56 = vpop.permute.xlu0 %4117 }
 0x913   : > { %v3538_v23 = vld [vmem:[#allocation3] sm:$0xff]  ;;  %v3831_v24 = vmul.f32 %v3828_v46, %v3539_v45  ;;  %v4019_v25 = vpop.permute.xlu1 %4018  ;;  %v3547_v21 = vmul.f32 %v8672_v47, %v3539_v45  ;;  %v3732_v50 = vmul.f32 %v3729_v43, %v3539_v45  ;;  %v4121_v61 = vmul.f32 %v4118_v56, %v3539_v45 }
 0x914   : > { %v3830_v48 = vmul.f32 %v3828_v46, %v3538_v23  ;;  %v3731_v49 = vmul.f32 %v3729_v43, %v3538_v23  ;;  %v7734_v51 = vpack.i.bf16 %v3539_v45, %v3538_v23  ;;  %v4021_v53 = vmul.f32 %v4019_v25, %v3538_v23  ;;  %v3549_v43 = vld [vmem:[%s9624_s7 + $0x8] sm:$0xff] }
 0x915   : > { %v4022_v54 = vmul.f32 %v4019_v25, %v3539_v45  ;;  %v3546_v55 = vmul.f32 %v8672_v47, %v3538_v23  ;;  %v4120_v60 = vmul.f32 %v4118_v56, %v3538_v23  ;;  %v7091_v25 = vld [vmem:[%s9624_s7 + $0x28] sm:$0xff] }
 0x916   : > { %v7744_v52 = vpack.i.bf16 %v3831_v24, %v3830_v48  ;;  %7735 = vrot.lane.b32.xlu1 %v7734_v51, %s9729_s21  ;;  %v7739_v58 = vpack.i.bf16 %v3732_v50, %v3731_v49  ;;  %v4309_v62 = vpop.permute.xlu0 %4308  ;;  %v7094_v48 = vld [vmem:[%s9624_s7 + $0x30] sm:$0xff] }
 0x917   : > { %v7436_v57 = vpack.c.bf16 %v3547_v21, %v3546_v55  ;;  %v7754_v59 = vpack.i.bf16 %v4022_v54, %v4021_v53  ;;  %v7759_v47 = vpack.i.bf16 %v4121_v61, %v4120_v60  ;;  %v4311_v63 = vmul.f32 %v4309_v62, %v3538_v23  ;;  %v7098_v53 = vld [vmem:[%s9624_s7 + $0x40] sm:$0xff] }
 0x918   : > { %7745 = vrot.lane.b32.xlu0 %v7744_v52, %s9734_s1  ;;  %v4312_v0 = vmul.f32 %v4309_v62, %v3539_v45  ;;  %v7095_v52 = vld [vmem:[%s9624_s7 + $0x38] sm:$0xff] }
 0x91a   : > { %7740 = vrot.lane.b32.xlu1 %v7739_v58, %s9713_s29  ;;  %v7769_v3 = vpack.i.bf16 %v4312_v0, %v4311_v63  ;;  %v7099_v58 = vld [vmem:[%s9624_s7 + $0x48] sm:$0xff]  ;;  %v7103_v63 = vld [vmem:[%s9624_s7 + $0x58] sm:$0xff]  ;;  %v7106_v0 = vld [vmem:[%s9624_s7 + $0x60] sm:$0xff] }
 0x91c   : > { %7755 = vrot.lane.b32.xlu0 %v7754_v59, %s9735_s15  ;;  %v7102_v59 = vld [vmem:[%s9624_s7 + $0x50] sm:$0xff] }
 0x91e   : > { %7750 = vrot.lane.b32.xlu1 %v7734_v51, %s9736_s19 }
 0x920   : > { %7765 = vrot.lane.b32.xlu0 %v7734_v51, %s9715_s23 }
 0x922   : > { %7760 = vrot.lane.b32.xlu1 %v7759_v47, %s9714_s0 }
 0x924   : > { %4411 = vperm.xlu0 %7717, %v4407_v1  }
 0x926   : > { %7770 = vrot.lane.b32.xlu1 %v7769_v3, %s9716_s3 }
 0x92a   : > { %4416 = vperm.xlu1 %7733, %v4408_v6  }
 0x988   : > { %v7736_v30 = vpop.permute.xlu1 %7735 }
 0x989   : > { %v7738_v31 = vunpack.i.h.bf16 %v7736_v30  ;;  %v7737_v32 = vunpack.i.l.bf16 %v7736_v30 }
 0x98a   : > { %v7746_v40 = vpop.permute.xlu0 %7745 }
 0x98b   : > { %v7432_v33 = vpack.c.bf16 %v7738_v31, %v7737_v32  ;;  %v7748_v41 = vunpack.i.h.bf16 %v7746_v40  ;;  %v7747_v42 = vunpack.i.l.bf16 %v7746_v40  ;;  %v4552_v40 = vld [vmem:[%s9634_s17] sm:$0x3] }
 0x98c   : > { %v7741_v34 = vpop.permute.xlu1 %7740 }
 0x98d   : > { %v7743_v35 = vunpack.i.h.bf16 %v7741_v34  ;;  %v7742_v36 = vunpack.i.l.bf16 %v7741_v34  ;;  %7433 = vmatprep.subr.bf16.mxu0 %v7432_v33  ;;  %v7444_v45 = vpack.c.bf16 %v7748_v41, %v7747_v42  ;;  %v4564_v41 = vrot.slane %v4552_v40, %v8181_v4 }
 0x98e   : > { %7435 = vmatpush3.bf16.msra.mxu0 %v7432_v33  ;;  %v7756_v49 = vpop.permute.xlu0 %7755  ;;  %v4568_v42 = vrot.slane %v4552_v40, %v8183_v5 }
 0x98f   : > { %7437 = vmatprep.subr.bf16.mxu0 %v7436_v57  ;;  %v7440_v39 = vpack.c.bf16 %v7743_v35, %v7742_v36  ;;  %v7758_v50 = vunpack.i.h.bf16 %v7756_v49  ;;  %v7757_v51 = vunpack.i.l.bf16 %v7756_v49  ;;  %v4553_v35 = vld [vmem:[%s9635_s18] sm:$0x3] }
 0x990   : > { %v7751_v46 = vpop.permute.xlu1 %7750  ;;  %v8959_v49 = vld [vmem:[#allocation2] sm:$0xff] }
 0x991   : > { %7342 = vmatmul.mubr.msk.f32.vlgmr.msra.gmra.mrb[4].mxu0 %vm999_vm5, %v7084_v37  ;;  %v7753_v23 = vunpack.i.h.bf16 %v7751_v46  ;;  %v7752_v24 = vunpack.i.l.bf16 %v7751_v46  ;;  %v7452_v54 = vpack.c.bf16 %v7758_v50, %v7757_v51  ;;  %v4572_v46 = vmul.f32 %v4568_v42, %v8634_v15 }
 0x992   : > { %7439 = vmatpush3.bf16.msra.mxu0 %v7436_v57  ;;  %7348 = vmatprep.mubr.msk.f32.mxu0 %vm999_vm5, %v3548_v38  ;;  %v7766_v61 = vpop.permute.xlu0 %7765  ;;  %v4795_v38 = vrot.slane %v4553_v35, %v8181_v4 }
 0x993   : > { %7441 = vmatprep.subr.bf16.mxu0 %v7440_v39  ;;  %v7448_v21 = vpack.c.bf16 %v7753_v23, %v7752_v24  ;;  %v7768_v62 = vunpack.i.h.bf16 %v7766_v61  ;;  %v7767_v47 = vunpack.i.l.bf16 %v7766_v61 }
 0x994   : > { %v7761_v55 = vpop.permute.xlu1 %7760 }
 0x995   : > { %v7763_v56 = vunpack.i.h.bf16 %v7761_v55  ;;  %v7762_v57 = vunpack.i.l.bf16 %v7761_v55  ;;  %v7460_v1 = vpack.c.bf16 %v7768_v62, %v7767_v47  ;;  %v4571_v55 = vmul.f32 %v4564_v41, %v8959_v49 }
 0x997   : > { %v7456_v60 = vpack.c.bf16 %v7763_v56, %v7762_v57 }
 0x998   : > { %v7771_v3 = vpop.permute.xlu1 %7770 }
 0x999   : > { %7349 = vmatmul.mubr.msk.f32.vlgmr.msra.gmra.mrb[4].mxu0 %vm999_vm5, %v3549_v43  ;;  %v7773_v6 = vunpack.i.h.bf16 %v7771_v3  ;;  %v7772_v7 = vunpack.i.l.bf16 %v7771_v3 }
 0x99a   : > { %7443 = vmatpush3.bf16.msra.mxu0 %v7440_v39  ;;  %7355 = vmatprep.mubr.msk.f32.mxu0 %vm999_vm5, %v7090_v44  ;;  %v4799_v39 = vrot.slane %v4553_v35, %v8183_v5 }
 0x99b   : > { %7445 = vmatprep.subr.bf16.mxu0 %v7444_v45  ;;  %v7464_v10 = vpack.c.bf16 %v7773_v6, %v7772_v7 }
 0x9a1   : > { %7356 = vmatmul.mubr.msk.f32.vlgmr.msra.gmra.mrb[4].mxu0 %vm999_vm5, %v7091_v25 }
 0x9a2   : > { %7447 = vmatpush3.bf16.msra.mxu0 %v7444_v45  ;;  %7362 = vmatprep.mubr.msk.f32.mxu0 %vm999_vm5, %v7094_v48 }
 0x9a3   : > { %7449 = vmatprep.subr.bf16.mxu0 %v7448_v21  ;;  %v4412_v26 = vpop.permute.xlu0 %4411 }
 0x9a9   : > { %7363 = vmatmul.mubr.msk.f32.vlgmr.msra.gmra.mrb[4].mxu0 %vm999_vm5, %v7095_v52  ;;  %v4417_v29 = vpop.permute.xlu1 %4416  ;;  %v8965_v52 = vld [vmem:[#allocation2 + $0x10] sm:$0xff] }
 0x9aa   : > { %7451 = vmatpush3.bf16.msra.mxu0 %v7448_v21  ;;  %7369 = vmatprep.mubr.msk.f32.mxu0 %vm999_vm5, %v7098_v53 }
 0x9ab   : > { %7453 = vmatprep.subr.bf16.mxu0 %v7452_v54 }
 0x9b1   : > { %7370 = vmatmul.mubr.msk.f32.vlgmr.msra.gmra.mrb[4].mxu0 %vm999_vm5, %v7099_v58 }
 0x9b2   : > { %7455 = vmatpush3.bf16.msra.mxu0 %v7452_v54  ;;  %7376 = vmatprep.mubr.msk.f32.mxu0 %vm999_vm5, %v7102_v59 }
 0x9b3   : > { %7457 = vmatprep.subr.bf16.mxu0 %v7456_v60 }
 0x9b9   : > { %7377 = vmatmul.mubr.msk.f32.vlgmr.msra.gmra.mrb[4].mxu0 %vm999_vm5, %v7103_v63 }
 0x9ba   : > { %7459 = vmatpush3.bf16.msra.mxu0 %v7456_v60  ;;  %7383 = vmatprep.mubr.msk.f32.mxu0 %vm999_vm5, %v7106_v0 }
 0x9bb   : > { %7461 = vmatprep.subr.bf16.mxu0 %v7460_v1 }
 0x9c1   : > { %7384 = vmatmul.mubr.msk.f32.vlgmr.msra.gmra.mrb[4].mxu0 %vm999_vm5, %v7107_v8 }
 0x9c2   : > { %7463 = vmatpush3.bf16.msra.mxu0 %v7460_v1  ;;  %7390 = vmatprep.mubr.msk.f32.mxu0 %vm999_vm5, %v7110_v9 }
 0x9c3   : > { %7465 = vmatprep.subr.bf16.mxu0 %v7464_v10 }
 0x9c9   : > { %7391 = vmatmul.mubr.msk.f32.vlgmr.msra.gmra.mrb[4].mxu0 %vm999_vm5, %v7111_v11 }
 0x9ca   : > { %7467 = vmatpush3.bf16.msra.mxu0 %v7464_v10  ;;  %7397 = vmatprep.mubr.msk.f32.mxu0 %vm999_vm5, %v7114_v12 }
 0x9d1   : > { %7398 = vmatmul.mubr.msk.f32.vlgmr.msra.gmra.mrb[4].mxu0 %vm999_vm5, %v7115_v13 }
 0x9d2   : > { %4695 = vmatprep.mubr.f32.mxu0 %v8023_v2 }
 0xaa4   : > { %v7399_v22 = vpop.f32.mrb[4].mxu0 }
 0xaa5   : > { %v4396_v27 = vpop.f32.mrb[5].mxu0  ;;  %v4420_v30 = vadd.f32 %v7399_v22, %v4417_v29 }
 0xaa6   : > { %v4419_v28 = vadd.f32 %v4412_v26, %v4396_v27 }
 0xaa7   : > { %v4422_v32 = vmax.f32 %v4420_v30, 0.0 }
 0xaa8   : > { %v4421_v31 = vmax.f32 %v4419_v28, 0.0  ;;  %v9028_v28 = vpack.i.bf16 %v8965_v52, %v8634_v15 }
 0xaaa   : > { %7118 = vmatmul.mubr.msk.f32.vlgmr.msra.gmra.mrb[4].mxu1 %vm4439_vm8, %v4421_v31 }
 0xaab   : > { %4516 = vmatprep.mubr.f32.mxu1 %v8023_v2 }
 0xaae   : > { %7119 = vmatmul.mubr.msk.f32.gmra.mrb[6].mxu1 %vm4439_vm8, %v4422_v32  ;;  %vm9739_vm8 = vcmask 777216  }
 0xaaf   : > { %4778 = vmatprep.mubr.f32.mxu1 %v8023_v2  ;;  %vm9740_vm9 = vmmov %vm9739_vm8 }
 0xb7d   : > { %v4512_v33 = vpop.f32.mrb[4].mxu1 }
 0xb7e   : > { %4530 = vrot.lane.b32.xlu0 %v4512_v33, %s9722_s27  ;;  %v4514_v34 = vpop.f32.mrb[5].mxu1 }
 0xb7f   : > { %4532 = vrot.lane.b32.xlu1 %v4514_v34, %s9722_s27 }
 0xb81   : > { %v4518_v36 = vpop.f32.mrb[6].mxu1 }
 0xb82   : > { %4534 = vrot.lane.b32.xlu0 %v4518_v36, %s9722_s27  ;;  %v4520_v37 = vpop.f32.mrb[7].mxu1 }
 0xb83   : > { %4536 = vrot.lane.b32.xlu1 %v4520_v37, %s9722_s27 }
 0xb86   : > { %4800 = vrot.lane.b32.xlu0 %v4795_v38, %s9724_s2 }
 0xb87   : > { %4802 = vrot.lane.b32.xlu1 %v4799_v39, %s9724_s2 }
 0xb8a   : > { %4946 = vrot.lane.b32.xlu0 %v4564_v41, %s9726_s25 }
 0xb8b   : > { %4948 = vrot.lane.b32.xlu1 %v4568_v42, %s9726_s25 }
 0xb8e   : > { %5212 = vrot.lane.b32.xlu0 %v4795_v38, %s9727_s12 }
 0xb8f   : > { %5214 = vrot.lane.b32.xlu1 %v4799_v39, %s9727_s12 }
 0xb92   : > { %5358 = vrot.lane.b32.xlu0 %v4564_v41, %s9738_s14 }
 0xb93   : > { %5360 = vrot.lane.b32.xlu1 %v4568_v42, %s9738_s14 }
 0xb96   : > { %5624 = vrot.lane.b32.xlu0 %v4795_v38, %s9712_s22 }
 0xb97   : > { %5626 = vrot.lane.b32.xlu1 %v4799_v39, %s9712_s22 }
 0xbf0   : > { %v4531_v43 = vpop.permute.xlu0 %4530 }
 0xbf1   : > { %4546 = vst.msk [vmem:[#allocation2 + $0x18] sm:$0xff] %vm1621_vm10, %v4531_v43  ;;  %v4533_v44 = vpop.permute.xlu1 %4532 }
 0xbf2   : > { %v8948_v45 = vsel %vm657_vm0, %v4531_v43, %v4533_v44  ;;  %4548 = vst.msk [vmem:[#allocation2 + $0x28] sm:$0xff] %vm657_vm0, %v4533_v44  ;;  %v4577_v43 = vld [vmem:[%s9626_s9] sm:$0xff] }
 0xbf3   : > { %4547 = vst [vmem:[#allocation2 + $0x20] sm:$0xff] %v8948_v45  ;;  %v4574_v23 = vmul.f32 %v4568_v42, %v8948_v45 }
 0xbf4   : > { %v4535_v24 = vpop.permute.xlu0 %4534 }
 0xbf5   : > { %4549 = vst.msk [vmem:[#allocation2 + $0x30] sm:$0xff] %vm1621_vm10, %v4535_v24  ;;  %v4537_v25 = vpop.permute.xlu1 %4536  ;;  %v7488_v48 = vpack.c.bf16 %v4574_v23, %v4572_v46 }
 0xbf6   : > { %v8956_v21 = vsel %vm657_vm0, %v4535_v24, %v4537_v25  ;;  %4551 = vst.msk [vmem:[#allocation2 + $0x40] sm:$0xff] %vm657_vm0, %v4537_v25 }
 0xbf7   : > { %7489 = vmatprep.subr.bf16.mxu1 %v7488_v48  ;;  %v4576_v0 = vmul.f32 %v4568_v42, %v8956_v21 }
 0xbf8   : > { %v8961_v50 = vld [vmem:[#allocation2 + $0x18] sm:$0xff]  ;;  %v8963_v51 = vpop.permute.xlu0 %4800 }
 0xbf9   : > { %v8967_v53 = vld [vmem:[#allocation2 + $0x28] sm:$0xff]  ;;  %v8969_v54 = vpop.permute.xlu1 %4802  ;;  %v4573_v56 = vmul.f32 %v4564_v41, %v8961_v50  ;;  %v4808_v40 = vmul.f32 %v8963_v51, %v8959_v49  ;;  %v9060_v42 = vpack.i.bf16 %v8961_v50, %v8959_v49 }
 0xbfa   : > { %v8976_v57 = vsel %vm893_vm4, %v8963_v51, %v8969_v54  ;;  %v4810_v58 = vmul.f32 %v8969_v54, %v8965_v52  ;;  %v8982_v59 = vpack.i.bf16 %v8967_v53, %v8948_v45  ;;  %v4813_v60 = vmul.f32 %v8969_v54, %v8967_v53 }
 0xbfb   : > { %v4809_v61 = vmul.f32 %v8976_v57, %v8634_v15  ;;  %v7490_v62 = vpack.c.bf16 %v4573_v56, %v4571_v55  ;;  %v4812_v47 = vmul.f32 %v8976_v57, %v8948_v45  ;;  %v4578_v56 = vld [vmem:[%s9626_s9 + $0x8] sm:$0xf] }
 0xbfc   : > { %v4947_v63 = vpop.permute.xlu0 %4946  ;;  %7815 = vrot.lane.b32.xlu1 %v8982_v59, %s9715_s23  ;;  %v8993_v1 = vld [vmem:[#allocation2 + $0x30] sm:$0xff] }
 0xbfd   : > { %v8995_v3 = vpop.permute.xlu1 %4948  ;;  %v7774_v6 = vpack.i.bf16 %v4810_v58, %v4809_v61  ;;  %7491 = vmatpush1.bf16.msra.mxu1 %v7490_v62  ;;  %v7824_v12 = vpack.i.bf16 %v4813_v60, %v4812_v47  ;;  %v4575_v14 = vmul.f32 %v4564_v41, %v8993_v1  ;;  %v4811_v41 = vmul.f32 %v8963_v51, %v8961_v50  ;;  %v4581_v61 = vld [vmem:[#allocation2 + $0x40] sm:$0xff] }
 0xbfe   : > { %v8999_v7 = vsel %vm999_vm5, %v4947_v63, %v8995_v3  ;;  %v4956_v8 = vmul.f32 %v8995_v3, %v8965_v52  ;;  %4718 = vmatprep.subr.mxu1 %v4576_v0  ;;  %v4959_v11 = vmul.f32 %v8995_v3, %v8967_v53  ;;  %v4814_v44 = vmul.f32 %v8963_v51, %v8993_v1 }
 0xbff   : > { %v4955_v9 = vmul.f32 %v8999_v7, %v8634_v15  ;;  %v4958_v10 = vmul.f32 %v8999_v7, %v8948_v45  ;;  %7775 = vrot.lane.b32.xlu0 %v7774_v6, %s9713_s29  ;;  %v4954_v46 = vmul.f32 %v4947_v63, %v8959_v49  ;;  %v4957_v23 = vmul.f32 %v4947_v63, %v8961_v50 }
 0xc00   : > { %v5213_v13 = vpop.permute.xlu0 %5212  ;;  %7825 = vrot.lane.b32.xlu1 %v7824_v12, %s9713_s29  ;;  %v7804_v24 = vpack.i.bf16 %v4811_v41, %v4808_v40  ;;  %v4960_v25 = vmul.f32 %v4947_v63, %v8993_v1  ;;  %v4815_v62 = vmul.f32 %v8976_v57, %v8956_v21  ;;  %v4816_v0 = vmul.f32 %v8969_v54, %v4581_v61 }
 0xc01   : > { %v9012_v16 = vpop.permute.xlu1 %5214  ;;  %v7779_v17 = vpack.i.bf16 %v4956_v8, %v4955_v9  ;;  %4719 = vmatpush1.msra.mxu1 %v4575_v14  ;;  %v7829_v19 = vpack.i.bf16 %v4959_v11, %v4958_v10  ;;  %v5220_v48 = vmul.f32 %v5213_v13, %v8959_v49  ;;  %v5223_v55 = vmul.f32 %v5213_v13, %v8961_v50 }
 0xc02   : > { %v9016_v18 = vsel %vm1196_vm6, %v5213_v13, %v9012_v16  ;;  %v5222_v26 = vmul.f32 %v9012_v16, %v8965_v52  ;;  %v5225_v31 = vmul.f32 %v9012_v16, %v8967_v53  ;;  %7124 = vmatmul.mubr.msk.f32.vlgmr.msra.gmra.mrb[8].mxu1 %vm4624_vm3, %v4577_v43  ;;  %v7809_v51 = vpack.i.bf16 %v4957_v23, %v4954_v46 }
 0xc03   : > { %7780 = vrot.lane.b32.xlu0 %v7779_v17, %s9714_s0  ;;  %v5221_v22 = vmul.f32 %v9016_v18, %v8634_v15  ;;  %v5224_v30 = vmul.f32 %v9016_v18, %v8948_v45  ;;  %4784 = vmatprep.mubr.f32.mxu1 %v8023_v2  ;;  %v7819_v58 = vpack.i.bf16 %v5223_v55, %v5220_v48 }
 0xc04   : > { %v5359_v20 = vpop.permute.xlu0 %5358  ;;  %7830 = vrot.lane.b32.xlu1 %v7829_v19, %s9714_s0  ;;  %v5226_v60 = vmul.f32 %v5213_v13, %v8993_v1  ;;  %v4961_v57 = vmul.f32 %v8999_v7, %v8956_v21  ;;  %v4962_v9 = vmul.f32 %v8995_v3, %v4581_v61  ;;  %v5228_v54 = vmul.f32 %v9012_v16, %v4581_v61 }
 0xc05   : > { %v9024_v27 = vpop.permute.xlu1 %5360  ;;  %v7789_v34 = vpack.i.bf16 %v5222_v26, %v5221_v22  ;;  %v7834_v37 = vpack.i.bf16 %v5225_v31, %v5224_v30  ;;  %v5366_v47 = vmul.f32 %v5359_v20, %v8959_v49  ;;  %v5369_v63 = vmul.f32 %v5359_v20, %v8961_v50  ;;  %v5770_v22 = vld [vmem:[%s9627_s10] sm:$0xff] }
 0xc06   : > { %v9032_v29 = vsel %vm1302_vm7, %v5359_v20, %v9024_v27  ;;  %v5368_v33 = vmul.f32 %v9024_v27, %v8965_v52  ;;  %v5371_v36 = vmul.f32 %v9024_v27, %v8967_v53  ;;  %7125 = vmatmul.mubr.msk.f32.gmra.mrb[10].mxu1 %vm4624_vm3, %v4578_v56  ;;  %v5372_v6 = vmul.f32 %v5359_v20, %v8993_v1 }
 0xc07   : > { %7785 = vrot.lane.b32.xlu0 %v9028_v28, %s9715_s23  ;;  %v5367_v32 = vmul.f32 %v9032_v29, %v8634_v15  ;;  %v5370_v35 = vmul.f32 %v9032_v29, %v8948_v45  ;;  %4929 = vmatprep.mubr.f32.mxu1 %v8023_v2  ;;  %v7844_v8 = vpack.i.bf16 %v5369_v63, %v5366_v47 }
 0xc08   : > { %5107 = vrot.lane.b32.xlu1 %v8993_v1, %s9715_s23  ;;  %v5374_v10 = vmul.f32 %v9024_v27, %v4581_v61  ;;  %v5227_v3 = vmul.f32 %v9016_v18, %v8956_v21  ;;  %v5625_v7 = vpop.permute.xlu0 %5624  ;;  %v5373_v16 = vmul.f32 %v9032_v29, %v8956_v21 }
 0xc09   : > { %v7794_v38 = vpack.i.bf16 %v5368_v33, %v5367_v32  ;;  %v7839_v39 = vpack.i.bf16 %v5371_v36, %v5370_v35  ;;  %v5627_v11 = vpop.permute.xlu1 %5626  ;;  %v5632_v19 = vmul.f32 %v5625_v7, %v8959_v49  ;;  %v5635_v20 = vmul.f32 %v5625_v7, %v8961_v50 }
 0xc0a   : > { %v5628_v12 = vsel %vm1499_vm11, %v5625_v7, %v5627_v11  ;;  %v5637_v14 = vmul.f32 %v5627_v11, %v8967_v53  ;;  %v5634_v18 = vmul.f32 %v5627_v11, %v8965_v52  ;;  %v5638_v50 = vmul.f32 %v5625_v7, %v8993_v1  ;;  %v5771_v52 = vld [vmem:[%s9627_s10 + $0x8] sm:$0xf] }
 0xc0b   : > { %7790 = vrot.lane.b32.xlu0 %v7789_v34, %s9716_s3  ;;  %v5636_v13 = vmul.f32 %v5628_v12, %v8948_v45  ;;  %v5633_v17 = vmul.f32 %v5628_v12, %v8634_v15  ;;  %v5640_v15 = vmul.f32 %v5627_v11, %v4581_v61  ;;  %v5639_v49 = vmul.f32 %v5628_v12, %v8956_v21  ;;  %v7126_v12 = vld [vmem:[%s9626_s9 + $0x20] sm:$0xff] }
 0xc0c   : > { %7835 = vrot.lane.b32.xlu1 %v7834_v37, %s9716_s3 }
 0xc0d   : > { %v7879_v45 = vpack.i.bf16 %v5637_v14, %v5636_v13  ;;  %v7874_v53 = vpack.i.bf16 %v5634_v18, %v5633_v17 }
 0xc0f   : > { %7795 = vrot.lane.b32.xlu0 %v7794_v38, %s9717_s28 }
 0xc10   : > { %7840 = vrot.lane.b32.xlu1 %v7839_v39, %s9717_s28 }
 0xc13   : > { %7800 = vrot.lane.b32.xlu0 %v9060_v42, %s9715_s23 }
 0xc14   : > { %4841 = vrot.lane.b32.xlu1 %v4814_v44, %s9713_s29 }
 0xc17   : > { %7805 = vrot.lane.b32.xlu0 %v7804_v24, %s9713_s29 }
 0xc18   : > { %4987 = vrot.lane.b32.xlu1 %v4960_v25, %s9714_s0 }
 0xc1b   : > { %7810 = vrot.lane.b32.xlu0 %v7809_v51, %s9714_s0 }
 0xc1c   : > { %5109 = vrot.lane.b32.xlu1 %v8956_v21, %s9715_s23 }
 0xc1f   : > { %7820 = vrot.lane.b32.xlu0 %v7819_v58, %s9716_s3 }
 0xc20   : > { %5253 = vrot.lane.b32.xlu1 %v5226_v60, %s9716_s3 }
 0xc23   : > { %5111 = vrot.lane.b32.xlu0 %v4581_v61, %s9715_s23 }
 0xc24   : > { %4843 = vrot.lane.b32.xlu1 %v4815_v62, %s9713_s29 }
 0xc27   : > { %4845 = vrot.lane.b32.xlu0 %v4816_v0, %s9713_s29 }
 0xc28   : > { %5399 = vrot.lane.b32.xlu1 %v5372_v6, %s9717_s28 }
 0xc2b   : > { %7845 = vrot.lane.b32.xlu0 %v7844_v8, %s9717_s28 }
 0xc2c   : > { %4989 = vrot.lane.b32.xlu1 %v4961_v57, %s9714_s0 }
 0xc2f   : > { %4991 = vrot.lane.b32.xlu0 %v4962_v9, %s9714_s0 }
 0xc30   : > { %7855 = vrot.lane.b32.xlu1 %v8982_v59, %s9718_s26 }
 0xc33   : > { %5257 = vrot.lane.b32.xlu0 %v5228_v54, %s9716_s3 }
 0xc34   : > { %5521 = vrot.lane.b32.xlu1 %v8956_v21, %s9718_s26 }
 0xc37   : > { %5403 = vrot.lane.b32.xlu0 %v5374_v10, %s9717_s28 }
 0xc38   : > { %5519 = vrot.lane.b32.xlu1 %v8993_v1, %s9718_s26 }
 0xc3b   : > { %7850 = vrot.lane.b32.xlu0 %v9028_v28, %s9718_s26 }
 0xc3c   : > { %5255 = vrot.lane.b32.xlu1 %v5227_v3, %s9716_s3 }
 0xc3f   : > { %7860 = vrot.lane.b32.xlu0 %v9060_v42, %s9718_s26 }
 0xc40   : > { %7870 = vrot.lane.b32.xlu1 %v8982_v59, %s9729_s21  ;;  %v7889_v59 = vpack.i.bf16 %v5635_v20, %v5632_v19 }
 0xc43   : > { %5523 = vrot.lane.b32.xlu0 %v4581_v61, %s9718_s26 }
 0xc44   : > { %5401 = vrot.lane.b32.xlu1 %v5373_v16, %s9717_s28 }
 0xc47   : > { %7865 = vrot.lane.b32.xlu0 %v9028_v28, %s9729_s21 }
 0xc48   : > { %7880 = vrot.lane.b32.xlu1 %v7879_v45, %s9720_s24 }
 0xc4b   : > { %7875 = vrot.lane.b32.xlu0 %v7874_v53, %s9720_s24 }
 0xc4c   : > { %7890 = vrot.lane.b32.xlu1 %v7889_v59, %s9720_s24 }
 0xc4f   : > { %7885 = vrot.lane.b32.xlu0 %v9060_v42, %s9729_s21 }
 0xc50   : > { %4610 = vrot.lane.b32.xlu1 %v4581_v61, %s9729_s21 }
 0xc53   : > { %4608 = vrot.lane.b32.xlu0 %v8956_v21, %s9729_s21 }
 0xc54   : > { %5669 = vrot.lane.b32.xlu1 %v5640_v15, %s9720_s24 }
 0xc57   : > { %5667 = vrot.lane.b32.xlu0 %v5639_v49, %s9720_s24  ;;  %v7127_v49 = vld [vmem:[%s9626_s9 + $0x28] sm:$0xf] }
 0xc58   : > { %5665 = vrot.lane.b32.xlu1 %v5638_v50, %s9720_s24 }
 0xc5b   : > { %4606 = vrot.lane.b32.xlu0 %v8993_v1, %s9729_s21 }
 0xc5c   : > { %5779 = vperm.xlu1 %7733, %v5771_v52  }
 0xc5f   : > { %5774 = vperm.xlu0 %7717, %v5770_v22  }
 0xc6e   : > { %v9159_v21 = vpop.permute.xlu1 %7815 }
 0xc6f   : > { %v7818_v20 = vunpack.i.h.bf16 %v9159_v21  ;;  %v7817_v45 = vunpack.i.l.bf16 %v9159_v21 }
 0xc71   : > { %v7776_v26 = vpop.permute.xlu0 %7775 }
 0xc72   : > { %v7778_v27 = vunpack.i.h.bf16 %v7776_v26  ;;  %v7777_v28 = vunpack.i.l.bf16 %v7776_v26  ;;  %v7826_v29 = vpop.permute.xlu1 %7825 }
 0xc73   : > { %v7828_v30 = vunpack.i.h.bf16 %v7826_v29  ;;  %v7827_v31 = vunpack.i.l.bf16 %v7826_v29 }
 0xc74   : > { %v4848_v32 = vsel %vm912_vm12, %v7777_v28, %v7778_v27 }
 0xc75   : > { %v7781_v33 = vpop.permute.xlu0 %7780  ;;  %v4850_v34 = vsel %vm912_vm12, %v7827_v31, %v7828_v30 }
 0xc76   : > { %v7831_v1 = vpop.permute.xlu1 %7830  ;;  %v7492_v35 = vpack.c.bf16 %v4850_v34, %v4848_v32  ;;  %v7783_v61 = vunpack.i.h.bf16 %v7781_v33  ;;  %v7782_v62 = vunpack.i.l.bf16 %v7781_v33  ;;  %v7130_v33 = vld [vmem:[%s9626_s9 + $0x30] sm:$0xff] }
 0xc77   : > { %v7833_v47 = vunpack.i.h.bf16 %v7831_v1  ;;  %v7832_v63 = vunpack.i.l.bf16 %v7831_v1 }
 0xc78   : > { %7493 = vmatprep.subr.bf16.mxu1 %v7492_v35  ;;  %v4994_v9 = vsel %vm1018_vm13, %v7782_v62, %v7783_v61 }
 0xc79   : > { %v7786_v36 = vpop.permute.xlu0 %7785  ;;  %v4996_v54 = vsel %vm1018_vm13, %v7832_v63, %v7833_v47 }
 0xc7a   : > { %v9163_v37 = vpop.permute.xlu1 %5107  ;;  %v7496_v16 = vpack.c.bf16 %v4996_v54, %v4994_v9  ;;  %v7788_v17 = vunpack.i.h.bf16 %v7786_v36  ;;  %v7787_v18 = vunpack.i.l.bf16 %v7786_v36 }
 0xc7c   : > { %v5114_v52 = vsel %vm9691_vm14, %v7787_v18, %v7788_v17 }
 0xc7d   : > { %v9165_v38 = vpop.permute.xlu0 %7790 }
 0xc7e   : > { %v9167_v39 = vpop.permute.xlu1 %7835  ;;  %v7793_v22 = vunpack.i.h.bf16 %v9165_v38  ;;  %v7792_v29 = vunpack.i.l.bf16 %v9165_v38 }
 0xc7f   : > { %v7838_v30 = vunpack.i.h.bf16 %v9167_v39 }
 0xc81   : > { %v9169_v40 = vpop.permute.xlu0 %7795 }
 0xc82   : > { %v9171_v41 = vpop.permute.xlu1 %7840  ;;  %v7798_v61 = vunpack.i.h.bf16 %v9169_v40 }
 0xc83   : > { %v7843_v47 = vunpack.i.h.bf16 %v9171_v41 }
 0xc85   : > { %v7801_v42 = vpop.permute.xlu0 %7800 }
 0xc86   : > { %v4842_v43 = vpop.permute.xlu1 %4841  ;;  %v7803_v53 = vunpack.i.h.bf16 %v7801_v42  ;;  %v7802_v59 = vunpack.i.l.bf16 %v7801_v42 }
 0xc88   : > { %v5115_v21 = vsel %vm9691_vm14, %v7803_v53, %v7817_v45  ;;  %v5113_v26 = vsel %vm9691_vm14, %v7802_v59, %v7787_v18 }
 0xc89   : > { %v7806_v44 = vpop.permute.xlu0 %7805  ;;  %v7502_v36 = vpack.c.bf16 %v5115_v21, %v5113_v26 }
 0xc8a   : > { %v7808_v46 = vunpack.i.h.bf16 %v7806_v44  ;;  %v7807_v23 = vunpack.i.l.bf16 %v7806_v44  ;;  %v4988_v24 = vpop.permute.xlu1 %4987  ;;  %v7131_v44 = vld [vmem:[%s9626_s9 + $0x38] sm:$0xf] }
 0xc8c   : > { %v4849_v25 = vsel %vm912_vm12, %v7808_v46, %v7827_v31  ;;  %v4847_v48 = vsel %vm912_vm12, %v7807_v23, %v7777_v28  ;;  %v5116_v28 = vsel %vm9691_vm14, %v7817_v45, %v7818_v20  ;;  %v7837_v31 = vunpack.i.l.bf16 %v9167_v39 }
 0xc8d   : > { %v7494_v55 = vpack.c.bf16 %v4849_v25, %v4847_v48  ;;  %v7811_v51 = vpop.permute.xlu0 %7810  ;;  %v7500_v35 = vpack.c.bf16 %v5116_v28, %v5114_v52  ;;  %v5260_v46 = vsel %vm9690_vm15, %v7792_v29, %v7793_v22 }
 0xc8e   : > { %v9175_v56 = vpop.permute.xlu1 %5109  ;;  %v7813_v0 = vunpack.i.h.bf16 %v7811_v51  ;;  %v7812_v6 = vunpack.i.l.bf16 %v7811_v51  ;;  %v5262_v23 = vsel %vm9690_vm15, %v7837_v31, %v7838_v30 }
 0xc8f   : > { %7495 = vmatpush1.bf16.msra.mxu1 %v7494_v55  ;;  %v5117_v25 = vsel %vm9691_vm14, %v9163_v37, %v9175_v56  ;;  %v7134_v37 = vld [vmem:[%s9626_s9 + $0x40] sm:$0xff] }
 0xc90   : > { %v4995_v10 = vsel %vm1018_vm13, %v7813_v0, %v7832_v63  ;;  %v4993_v3 = vsel %vm1018_vm13, %v7812_v6, %v7782_v62  ;;  %v7797_v62 = vunpack.i.l.bf16 %v9169_v40  ;;  %v7842_v63 = vunpack.i.l.bf16 %v9171_v41  ;;  %v7135_v41 = vld [vmem:[%s9626_s9 + $0x48] sm:$0xf] }
 0xc91   : > { %v9177_v58 = vpop.permute.xlu0 %7820  ;;  %v7498_v19 = vpack.c.bf16 %v4995_v10, %v4993_v3 }
 0xc92   : > { %v9179_v60 = vpop.permute.xlu1 %5253  ;;  %v7823_v38 = vunpack.i.h.bf16 %v9177_v58  ;;  %v7822_v39 = vunpack.i.l.bf16 %v9177_v58  ;;  %v7504_v58 = vpack.c.bf16 %v5262_v23, %v5260_v46  ;;  %v5408_v9 = vsel %vm1321_vm1, %v7842_v63, %v7843_v47 }
 0xc94   : > { %v5261_v48 = vsel %vm9690_vm15, %v7823_v38, %v7837_v31  ;;  %v5259_v55 = vsel %vm9690_vm15, %v7822_v39, %v7792_v29 }
 0xc95   : > { %v5112_v8 = vpop.permute.xlu0 %5111  ;;  %v7506_v0 = vpack.c.bf16 %v5261_v48, %v5259_v55  ;;  %v7143_v48 = vld [vmem:[%s9626_s9 + $0x68] sm:$0xf] }
 0xc96   : > { %v4844_v57 = vpop.permute.xlu1 %4843 }
 0xc97   : > { %v4851_v13 = vsel %vm912_vm12, %v4842_v43, %v4844_v57  ;;  %v5118_v43 = vsel %vm9691_vm14, %v9175_v56, %v5112_v8  ;;  %vm9742_vm14 = vmmov %vm9739_vm8 }
 0xc99   : > { %v4846_v7 = vpop.permute.xlu0 %4845 }
 0xc9a   : > { %v4852_v11 = vsel %vm912_vm12, %v4844_v57, %v4846_v7  ;;  %v9190_v14 = vpop.permute.xlu1 %5399  ;;  %v5406_v57 = vsel %vm1321_vm1, %v7797_v62, %v7798_v61 }
 0xc9b   : > { %4869 = vmatprep.subr.mxu1 %v4852_v11 }
 0xc9c   : > { %4870 = vmatpush1.msra.mxu1 %v4851_v13  ;;  %v7508_v13 = vpack.c.bf16 %v5408_v9, %v5406_v57 }
 0xc9d   : > { %v9194_v15 = vpop.permute.xlu0 %7845  ;;  %7128 = vmatmul.mubr.msk.f32.vlgmr.msra.gmra.mrb[8].mxu1 %vm4624_vm3, %v7126_v12  ;;  %7497 = vmatprep.subr.bf16.mxu1 %v7496_v16 }
 0xc9e   : > { %7499 = vmatpush1.bf16.msra.mxu1 %v7498_v19  ;;  %4935 = vmatprep.mubr.f32.mxu1 %v8023_v2  ;;  %v4990_v50 = vpop.permute.xlu1 %4989  ;;  %v7848_v6 = vunpack.i.h.bf16 %v9194_v15  ;;  %v7847_v8 = vunpack.i.l.bf16 %v9194_v15 }
 0xc9f   : > { %v4997_v34 = vsel %vm1018_vm13, %v4988_v24, %v4990_v50 }
 0xca0   : > { %v5407_v7 = vsel %vm1321_vm1, %v7848_v6, %v7842_v63  ;;  %v5405_v11 = vsel %vm1321_vm1, %v7847_v8, %v7797_v62 }
 0xca1   : > { %v4992_v27 = vpop.permute.xlu0 %4991  ;;  %7129 = vmatmul.mubr.msk.f32.gmra.mrb[10].mxu1 %vm4624_vm3, %v7127_v49  ;;  %v7510_v59 = vpack.c.bf16 %v5407_v7, %v5405_v11  ;;  %v7139_v49 = vld [vmem:[%s9626_s9 + $0x58] sm:$0xf] }
 0xca2   : > { %v4998_v32 = vsel %vm1018_vm13, %v4990_v50, %v4992_v27  ;;  %5075 = vmatprep.mubr.f32.mxu1 %v8023_v2  ;;  %v9216_v1 = vpop.permute.xlu1 %7855  ;;  %v7147_v7 = vld [vmem:[%s9626_s9 + $0x78] sm:$0xf] }
 0xca3   : > { %5015 = vmatprep.subr.mxu1 %v4998_v32  ;;  %v7858_v18 = vunpack.i.h.bf16 %v9216_v1  ;;  %v7857_v19 = vunpack.i.l.bf16 %v9216_v1  ;;  %v7142_v1 = vld [vmem:[%s9626_s9 + $0x60] sm:$0xff] }
 0xca4   : > { %5016 = vmatpush1.msra.mxu1 %v4997_v34 }
 0xca5   : > { %v5258_v42 = vpop.permute.xlu0 %5257  ;;  %7132 = vmatmul.mubr.msk.f32.vlgmr.msra.gmra.mrb[8].mxu1 %vm4624_vm3, %v7130_v33  ;;  %7501 = vmatprep.subr.bf16.mxu1 %v7500_v35  ;;  %v5528_v26 = vsel %vm9742_vm14, %v7857_v19, %v7858_v18 }
 0xca6   : > { %7503 = vmatpush1.bf16.msra.mxu1 %v7502_v36  ;;  %5081 = vmatprep.mubr.f32.mxu1 %v8023_v2  ;;  %v9229_v24 = vpop.permute.xlu1 %5521 }
 0xca7   : > { %5135 = vmatprep.subr.mxu1 %v5118_v43 }
 0xca9   : > { %v5404_v51 = vpop.permute.xlu0 %5403  ;;  %7133 = vmatmul.mubr.msk.f32.gmra.mrb[10].mxu1 %vm4624_vm3, %v7131_v44 }
 0xcaa   : > { %5136 = vmatpush1.msra.mxu1 %v5117_v25  ;;  %5195 = vmatprep.mubr.f32.mxu1 %v8023_v2  ;;  %v9245_v56 = vpop.permute.xlu1 %5519 }
 0xcab   : > { %7505 = vmatprep.subr.bf16.mxu1 %v7504_v58  ;;  %v5529_v47 = vsel %vm9739_vm8, %v9245_v56, %v9229_v24 }
 0xcad   : > { %v7851_v40 = vpop.permute.xlu0 %7850  ;;  %7136 = vmatmul.mubr.msk.f32.vlgmr.msra.gmra.mrb[8].mxu1 %vm4624_vm3, %v7134_v37 }
 0xcae   : > { %7507 = vmatpush1.bf16.msra.mxu1 %v7506_v0  ;;  %5201 = vmatprep.mubr.f32.mxu1 %v8023_v2  ;;  %v5256_v54 = vpop.permute.xlu1 %5255  ;;  %v7853_v16 = vunpack.i.h.bf16 %v7851_v40  ;;  %v7852_v17 = vunpack.i.l.bf16 %v7851_v40 }
 0xcaf   : > { %v5263_v10 = vsel %vm9690_vm15, %v9179_v60, %v5256_v54  ;;  %v5264_v3 = vsel %vm9690_vm15, %v5256_v54, %v5258_v42  ;;  %v7138_v60 = vld [vmem:[%s9626_s9 + $0x50] sm:$0xff]  ;;  %vm9741_vm15 = vmmov %vm9739_vm8 }
 0xcb0   : > { %5281 = vmatprep.subr.mxu1 %v5264_v3  ;;  %v5526_v50 = vsel %vm9739_vm8, %v7852_v17, %v7853_v16 }
 0xcb1   : > { %v7861_v12 = vpop.permute.xlu0 %7860  ;;  %7137 = vmatmul.mubr.msk.f32.gmra.mrb[10].mxu1 %vm4624_vm3, %v7135_v41  ;;  %v7512_v32 = vpack.c.bf16 %v5528_v26, %v5526_v50  ;;  %v7146_v41 = vld [vmem:[%s9626_s9 + $0x70] sm:$0xff] }
 0xcb2   : > { %5282 = vmatpush1.msra.mxu1 %v5263_v10  ;;  %5341 = vmatprep.mubr.f32.mxu1 %v8023_v2  ;;  %v7863_v20 = vunpack.i.h.bf16 %v7861_v12  ;;  %v7862_v45 = vunpack.i.l.bf16 %v7861_v12  ;;  %v9268_v53 = vpop.permute.xlu1 %7870 }
 0xcb3   : > { %7509 = vmatprep.subr.bf16.mxu1 %v7508_v13  ;;  %v7873_v27 = vunpack.i.h.bf16 %v9268_v53  ;;  %v7872_v28 = vunpack.i.l.bf16 %v9268_v53  ;;  %v7121_v53 = vld [vmem:[%s9626_s9 + $0x18] sm:$0xf] }
 0xcb4   : > { %v5527_v52 = vsel %vm9740_vm9, %v7863_v20, %v7857_v19  ;;  %v5525_v22 = vsel %vm9741_vm15, %v7862_v45, %v7852_v17  ;;  %vm9743_vm9 = vcmask 1039360   ;;  %vm9745_vm15 = vmmov %vm9739_vm8  ;;  %v7150_v17 = vld [vmem:[%s9626_s9 + $0x80] sm:$0xff]  ;;  %v7120_v19 = vld [vmem:[%s9626_s9 + $0x10] sm:$0xff] }
 0xcb5   : > { %v5524_v15 = vpop.permute.xlu0 %5523  ;;  %7140 = vmatmul.mubr.msk.f32.vlgmr.msra.gmra.mrb[8].mxu1 %vm4624_vm3, %v7138_v60  ;;  %v7514_v35 = vpack.c.bf16 %v5527_v52, %v5525_v22  ;;  %vm9744_vm14 = vmmov %vm9743_vm9  ;;  %v7151_v45 = vld [vmem:[%s9626_s9 + $0x88] sm:$0xf] }
 0xcb6   : > { %7511 = vmatpush1.bf16.msra.mxu1 %v7510_v59  ;;  %5347 = vmatprep.mubr.f32.mxu1 %v8023_v2  ;;  %v5402_v21 = vpop.permute.xlu1 %5401  ;;  %v4615_v42 = vsel %vm9744_vm14, %v7872_v28, %v7873_v27  ;;  %v5530_v25 = vsel %vm9745_vm15, %v9229_v24, %v5524_v15  ;;  %vm9746_vm14 = vmmov %vm9743_vm9 }
 0xcb7   : > { %v5409_v29 = vsel %vm1321_vm1, %v9190_v14, %v5402_v21  ;;  %v5410_v30 = vsel %vm1321_vm1, %v5402_v21, %v5404_v51  ;;  %vm9747_vm15 = vmmov %vm9743_vm9 }
 0xcb8   : > { %5427 = vmatprep.subr.mxu1 %v5410_v30  ;;  %vm9748_vm8 = vmmov %vm9743_vm9 }
 0xcb9   : > { %v7866_v31 = vpop.permute.xlu0 %7865  ;;  %7141 = vmatmul.mubr.msk.f32.gmra.mrb[10].mxu1 %vm4624_vm3, %v7139_v49 }
 0xcba   : > { %v7868_v33 = vunpack.i.h.bf16 %v7866_v31  ;;  %v7867_v34 = vunpack.i.l.bf16 %v7866_v31  ;;  %5428 = vmatpush1.msra.mxu1 %v5409_v29  ;;  %5487 = vmatprep.mubr.f32.mxu1 %v8023_v2  ;;  %v7881_v36 = vpop.permute.xlu1 %7880 }
 0xcbb   : > { %7513 = vmatprep.subr.bf16.mxu1 %v7512_v32  ;;  %v7883_v14 = vunpack.i.h.bf16 %v7881_v36  ;;  %v7882_v38 = vunpack.i.l.bf16 %v7881_v36 }
 0xcbc   : > { %v4613_v39 = vsel %vm9743_vm9, %v7867_v34, %v7868_v33 }
 0xcbd   : > { %v7876_v43 = vpop.permute.xlu0 %7875  ;;  %7144 = vmatmul.mubr.msk.f32.vlgmr.msra.gmra.mrb[8].mxu1 %vm4624_vm3, %v7142_v1  ;;  %v7484_v44 = vpack.c.bf16 %v4615_v42, %v4613_v39  ;;  %v5674_v62 = vsel %vm1518_vm2, %v7882_v38, %v7883_v14 }
 0xcbe   : > { %v7878_v46 = vunpack.i.h.bf16 %v7876_v43  ;;  %v7877_v23 = vunpack.i.l.bf16 %v7876_v43  ;;  %7515 = vmatpush1.bf16.msra.mxu1 %v7514_v35  ;;  %5493 = vmatprep.mubr.f32.mxu1 %v8023_v2  ;;  %v7891_v55 = vpop.permute.xlu1 %7890 }
 0xcbf   : > { %5547 = vmatprep.subr.mxu1 %v5530_v25  ;;  %7485 = vmatprep.subr.bf16.mxu0 %v7484_v44  ;;  %v7893_v51 = vunpack.i.h.bf16 %v7891_v55  ;;  %v7892_v58 = vunpack.i.l.bf16 %v7891_v55 }
 0xcc0   : > { %v5672_v61 = vsel %vm1518_vm2, %v7877_v23, %v7878_v46  ;;  %v5816_v46 = vld [vmem:[%s9634_s17] sm:$0x3] }
 0xcc1   : > { %v7886_v63 = vpop.permute.xlu0 %7885  ;;  %7145 = vmatmul.mubr.msk.f32.gmra.mrb[10].mxu1 %vm4624_vm3, %v7143_v48  ;;  %v7516_v37 = vpack.c.bf16 %v5674_v62, %v5672_v61  ;;  %v5671_v0 = vsel %vm1518_vm2, %v7892_v58, %v7877_v23  ;;  %v5673_v6 = vsel %vm1518_vm2, %v7893_v51, %v7882_v38  ;;  %v5817_v38 = vld [vmem:[%s9635_s18] sm:$0x3]  ;;  %v9356_v23 = vrot.slane %v5816_v46, %v8181_v4 }
 0xcc2   : > { %v7888_v8 = vunpack.i.h.bf16 %v7886_v63  ;;  %v7887_v40 = vunpack.i.l.bf16 %v7886_v63  ;;  %5548 = vmatpush1.msra.mxu1 %v5529_v47  ;;  %5607 = vmatprep.mubr.f32.mxu1 %v8023_v2  ;;  %v7518_v57 = vpack.c.bf16 %v5673_v6, %v5671_v0  ;;  %v4611_v9 = vpop.permute.xlu1 %4610  ;;  %v6029_v43 = vrot.slane %v5817_v38, %v8181_v4 }
 0xcc3   : > { %7517 = vmatprep.subr.bf16.mxu1 %v7516_v37  ;;  %v6033_v44 = vrot.slane %v5817_v38, %v8183_v5  ;;  %v9360_v25 = vrot.slane %v5816_v46, %v8183_v5 }
 0xcc4   : > { %v4614_v24 = vsel %vm9743_vm9, %v7888_v8, %v7872_v28  ;;  %v4612_v56 = vsel %vm9746_vm14, %v7887_v40, %v7867_v34  ;;  %vm9750_vm9 = vcmask 134144  }
 0xcc5   : > { %v7486_v54 = vpack.c.bf16 %v4614_v24, %v4612_v56  ;;  %v4609_v10 = vpop.permute.xlu0 %4608  ;;  %7148 = vmatmul.mubr.msk.f32.vlgmr.msra.gmra.mrb[8].mxu1 %vm4624_vm3, %v7146_v41 }
 0xcc6   : > { %7519 = vmatpush1.bf16.msra.mxu1 %v7518_v57  ;;  %v4617_v3 = vsel %vm9747_vm15, %v4609_v10, %v4611_v9  ;;  %5613 = vmatprep.mubr.f32.mxu1 %v8023_v2  ;;  %v5670_v11 = vpop.permute.xlu1 %5669  ;;  %vm5866_vm15 = vcmask 97280  }
 0xcc7   : > { %7487 = vmatpush1.bf16.msra.mxu0 %v7486_v54 }
 0xcc8   : > { %4635 = vmatprep.subr.mxu0 %v4617_v3 }
 0xcc9   : > { %v5668_v12 = vpop.permute.xlu0 %5667  ;;  %7149 = vmatmul.mubr.msk.f32.gmra.mrb[10].mxu1 %vm4624_vm3, %v7147_v7 }
 0xcca   : > { %v5676_v13 = vsel %vm1518_vm2, %v5668_v12, %v5670_v11  ;;  %5753 = vmatprep.mubr.f32.mxu1 %v8023_v2  ;;  %v5666_v16 = vpop.permute.xlu1 %5665 }
 0xccb   : > { %5693 = vmatprep.subr.mxu1 %v5676_v13  ;;  %v5675_v60 = vsel %vm1518_vm2, %v5666_v16, %v5668_v12 }
 0xccc   : > { %5694 = vmatpush1.msra.mxu1 %v5675_v60 }
 0xccd   : > { %v4607_v18 = vpop.permute.xlu0 %4606  ;;  %7152 = vmatmul.mubr.msk.f32.vlgmr.msra.gmra.mrb[8].mxu1 %vm4624_vm3, %v7150_v17 }
 0xcce   : > { %v4616_v20 = vsel %vm9748_vm8, %v4607_v18, %v4609_v10  ;;  %5759 = vmatprep.mubr.f32.mxu1 %v8023_v2 }
 0xccf   : > { %4636 = vmatpush1.msra.mxu0 %v4616_v20 }
 0xcd0   : > { %7122 = vmatmul.mubr.msk.f32.vlgmr.msra.gmra.mrb[6].mxu0 %vm4624_vm3, %v7120_v19 }
 0xcd1   : > { %4701 = vmatprep.mubr.f32.mxu0 %v8023_v2  ;;  %7153 = vmatmul.mubr.msk.f32.gmra.mrb[10].mxu1 %vm4624_vm3, %v7151_v45 }
 0xcd4   : > { %7123 = vmatmul.mubr.msk.f32.gmra.mrb[8].mxu0 %vm4624_vm3, %v7121_v53  ;;  %vm9749_vm3 = vcmask 1043592  }
 0xcd5   : > { %5938 = vmatprep.mubr.f32.mxu0 %v8023_v2 }
 0xcdb   : > { %v5780_v34 = vpop.permute.xlu1 %5779 }
 0xcde   : > { %v5775_v22 = vpop.permute.xlu0 %5774 }
 0xda0   : > { %v5755_v59 = vpop.f32.mrb[8].mxu1 }
 0xda1   : > { %v5757_v15 = vpop.f32.mrb[9].mxu1 }
 0xda3   : > { %v4697_v49 = vpop.f32.mrb[6].mxu0 }
 0xda4   : > { %v7574_v50 = vadd.f32 %v5755_v59, %v4697_v49  ;;  %v4699_v52 = vpop.f32.mrb[7].mxu0  ;;  %v5761_v26 = vpop.f32.mrb[10].mxu1 }
 0xda5   : > { %v7575_v21 = vadd.f32 %v5757_v15, %v4699_v52  ;;  %v5763_v28 = vpop.f32.mrb[11].mxu1 }
 0xda6   : > { %v5782_v27 = vadd.f32 %v7574_v50, %v5775_v22 }
 0xda7   : > { %v5783_v29 = vadd.f32 %v7575_v21, %v5775_v22  ;;  %v4703_v30 = vpop.f32.mrb[8].mxu0 }
 0xda8   : > { %v5786_v31 = vmax.f32 %v5782_v27, 0.0  ;;  %v7576_v32 = vadd.f32 %v5761_v26, %v4703_v30  ;;  %v4705_v33 = vpop.f32.mrb[9].mxu0 }
 0xda9   : > { %v5787_v1 = vmax.f32 %v5783_v29, 0.0  ;;  %v7577_v35 = vadd.f32 %v5763_v28, %v4705_v33 }
 0xdaa   : > { %v5784_v36 = vadd.f32 %v7576_v32, %v5780_v34  ;;  %5794 = vrot.lane.b32.xlu0 %v5786_v31, %s9722_s27 }
 0xdab   : > { %v5785_v14 = vadd.f32 %v7577_v35, %v5780_v34  ;;  %5796 = vrot.lane.b32.xlu1 %v5787_v1, %s9722_s27 }
 0xdac   : > { %v5788_v39 = vmax.f32 %v5784_v36, 0.0 }
 0xdad   : > { %v5789_v42 = vmax.f32 %v5785_v14, 0.0 }
 0xdae   : > { %5798 = vrot.lane.b32.xlu0 %v5788_v39, %s9722_s27 }
 0xdaf   : > { %5800 = vrot.lane.b32.xlu1 %v5789_v42, %s9722_s27 }
 0xdb2   : > { %6034 = vrot.lane.b32.xlu0 %v6029_v43, %s9724_s2 }
 0xdb3   : > { %6036 = vrot.lane.b32.xlu1 %v6033_v44, %s9724_s2 }
 0xdb6   : > { %6154 = vrot.lane.b32.xlu0 %v9356_v23, %s9726_s25 }
 0xdb7   : > { %6156 = vrot.lane.b32.xlu1 %v9360_v25, %s9726_s25  ;;  %s9777_s25 = sld [smem:[#allocation20_spill]] }
 0xdba   : > { %6374 = vrot.lane.b32.xlu0 %v6029_v43, %s9727_s12 }
 0xdbb   : > { %6376 = vrot.lane.b32.xlu1 %v6033_v44, %s9727_s12  ;;  %s9760_s12 = sld [smem:[#allocation17_spill]] }
 0xdbe   : > { %6494 = vrot.lane.b32.xlu0 %v9356_v23, %s9738_s14 }
 0xdbf   : > { %6496 = vrot.lane.b32.xlu1 %v9360_v25, %s9738_s14 }
 0xe1c   : > { %v5795_v4 = vpop.permute.xlu0 %5794 }
 0xe1d   : > { %5810 = vst.msk [vmem:[#allocation2] sm:$0xff] %vm1621_vm10, %v5795_v4  ;;  %v5797_v5 = vpop.permute.xlu1 %5796  ;;  %vm9755_vm10 = vcmask 1043456  }
 0xe1e   : > { %v9374_v48 = vsel %vm657_vm0, %v5795_v4, %v5797_v5  ;;  %5812 = vst.msk [vmem:[#allocation2 + $0x10] sm:$0xff] %vm657_vm0, %v5797_v5 }
 0xe1f   : > { %5811 = vst [vmem:[#allocation2 + $0x8] sm:$0xff] %v9374_v48 }
 0xe20   : > { %v5799_v55 = vpop.permute.xlu0 %5798 }
 0xe21   : > { %5813 = vst.msk [vmem:[#allocation2 + $0x18] sm:$0xf] %vm9749_vm3, %v5799_v55  ;;  %v5801_v51 = vpop.permute.xlu1 %5800  ;;  %vm9765_vm3 = vcmask 900096  }
 0xe22   : > { %v5803_v58 = vsel %vm657_vm0, %v5799_v55, %v5801_v51  ;;  %5815 = vst.msk [vmem:[#allocation2 + $0x28] sm:$0xf] %vm9750_vm9, %v5801_v51  ;;  %vm9751_vm0 = vmmov %vm9748_vm8 }
 0xe23   : > { %5814 = vst [vmem:[#allocation2 + $0x20] sm:$0xf] %v5803_v58  ;;  %vm9766_vm9 = vmmov %vm9765_vm3 }
 0xe24   : > { %v6035_v47 = vpop.permute.xlu0 %6034  ;;  %v9395_v8 = vld [vmem:[#allocation2] sm:$0xff] }
 0xe25   : > { %v9381_v61 = vld [vmem:[#allocation2 + $0x10] sm:$0xff]  ;;  %v6037_v63 = vpop.permute.xlu1 %6036  ;;  %v6042_v60 = vmul.f32 %v6035_v47, %v9395_v8 }
 0xe26   : > { %v9385_v62 = vpack.i.bf16 %v9381_v61, %v9374_v48  ;;  %v6038_v57 = vsel %vm893_vm4, %v6035_v47, %v6037_v63  ;;  %v6044_v56 = vmul.f32 %v6037_v63, %v9381_v61  ;;  %vm9752_vm4 = vmmov %vm9751_vm0 }
 0xe27   : > { %v6043_v3 = vmul.f32 %v6038_v57, %v9374_v48 }
 0xe28   : > { %7895 = vrot.lane.b32.xlu0 %v9385_v62, %s9729_s21  ;;  %v9389_v37 = vld [vmem:[#allocation2 + $0x18] sm:$0xf]  ;;  %v6155_v9 = vpop.permute.xlu0 %6154 }
 0xe29   : > { %v9391_v0 = vld [vmem:[#allocation2 + $0x28] sm:$0xf]  ;;  %v9399_v40 = vpack.i.bf16 %v9389_v37, %v9395_v8  ;;  %v6157_v24 = vpop.permute.xlu1 %6156  ;;  %v6045_v11 = vmul.f32 %v6035_v47, %v9389_v37  ;;  %v7909_v13 = vpack.i.bf16 %v6044_v56, %v6043_v3  ;;  %v6162_v18 = vmul.f32 %v6155_v9, %v9395_v8 }
 0xe2a   : > { %v9393_v6 = vld [vmem:[#allocation2 + $0x20] sm:$0xf]  ;;  %v6047_v10 = vmul.f32 %v6037_v63, %v9391_v0  ;;  %v6158_v7 = vsel %vm999_vm5, %v6155_v9, %v6157_v24  ;;  %v6164_v16 = vmul.f32 %v6157_v24, %v9381_v61  ;;  %v6165_v19 = vmul.f32 %v6155_v9, %v9389_v37  ;;  %vm9753_vm5 = vmmov %vm9751_vm0 }
 0xe2b   : > { %v9403_v41 = vpack.i.bf16 %v9391_v0, %v9393_v6  ;;  %v6046_v54 = vmul.f32 %v6038_v57, %v9393_v6  ;;  %v6163_v17 = vmul.f32 %v6158_v7, %v9374_v48  ;;  %v7919_v20 = vpack.i.bf16 %v6045_v11, %v6042_v60 }
 0xe2c   : > { %7900 = vrot.lane.b32.xlu0 %v9399_v40, %s9729_s21  ;;  %v6166_v45 = vmul.f32 %v6158_v7, %v9393_v6  ;;  %v6167_v53 = vmul.f32 %v6157_v24, %v9391_v0  ;;  %v6375_v15 = vpop.permute.xlu0 %6374  ;;  %v7934_v50 = vpack.i.bf16 %v6165_v19, %v6162_v18  ;;  %v5835_v60 = vmul.f32 %v9356_v23, %v9389_v37 }
 0xe2d   : > { %7905 = vrot.lane.b32.xlu1 %v9403_v41, %s9729_s21  ;;  %v7914_v12 = vpack.i.bf16 %v6047_v10, %v6046_v54  ;;  %v7924_v59 = vpack.i.bf16 %v6164_v16, %v6163_v17  ;;  %v6377_v49 = vpop.permute.xlu1 %6376  ;;  %v6382_v29 = vmul.f32 %v6375_v15, %v9395_v8  ;;  %v6385_v30 = vmul.f32 %v6375_v15, %v9389_v37 }
 0xe2e   : > { %v7929_v52 = vpack.i.bf16 %v6167_v53, %v6166_v45  ;;  %v6378_v22 = vsel %vm1196_vm6, %v6375_v15, %v6377_v49  ;;  %v6384_v21 = vmul.f32 %v6377_v49, %v9381_v61  ;;  %v6387_v32 = vmul.f32 %v6377_v49, %v9391_v0  ;;  %vm9754_vm6 = vmmov %vm9751_vm0 }
 0xe2f   : > { %v6383_v26 = vmul.f32 %v6378_v22, %v9374_v48  ;;  %v6386_v31 = vmul.f32 %v6378_v22, %v9393_v6  ;;  %v7964_v1 = vpack.i.bf16 %v6385_v30, %v6382_v29 }
 0xe30   : > { %6716 = vrot.lane.b32.xlu0 %v6033_v44, %s9712_s22  ;;  %v6495_v27 = vpop.permute.xlu0 %6494 }
 0xe31   : > { %6714 = vrot.lane.b32.xlu1 %v6029_v43, %s9712_s22  ;;  %v6497_v28 = vpop.permute.xlu1 %6496  ;;  %v7954_v33 = vpack.i.bf16 %v6384_v21, %v6383_v26  ;;  %v7959_v35 = vpack.i.bf16 %v6387_v32, %v6386_v31  ;;  %v6502_v42 = vmul.f32 %v6495_v27, %v9395_v8  ;;  %v6505_v43 = vmul.f32 %v6495_v27, %v9389_v37  ;;  %s9773_s22 = sld [smem:[#allocation5_spill]] }
 0xe32   : > { %v6498_v34 = vsel %vm1302_vm7, %v6495_v27, %v6497_v28  ;;  %v6504_v36 = vmul.f32 %v6497_v28, %v9381_v61  ;;  %v6507_v38 = vmul.f32 %v6497_v28, %v9391_v0  ;;  %vm8045_vm7 = vmmov 1  }
 0xe33   : > { %v6506_v14 = vmul.f32 %v6498_v34, %v9393_v6  ;;  %v6503_v39 = vmul.f32 %v6498_v34, %v9374_v48  ;;  %v7979_v4 = vpack.i.bf16 %v6505_v43, %v6502_v42  ;;  %vm9470_vm14 = vmpackc.low %vm9755_vm10, %vm8045_vm7 }
 0xe34   : > { %7915 = vrot.lane.b32.xlu0 %v7914_v12, %s9713_s29 }
 0xe35   : > { %7910 = vrot.lane.b32.xlu1 %v7909_v13, %s9713_s29  ;;  %v7974_v44 = vpack.i.bf16 %v6507_v38, %v6506_v14  ;;  %v7969_v46 = vpack.i.bf16 %v6504_v36, %v6503_v39  ;;  %v5834_v13 = vmul.f32 %v9360_v25, %v9374_v48  ;;  %v6845_v38 = vld [vmem:[%s9760_s12] sm:$0x7] }
 0xe38   : > { %7925 = vrot.lane.b32.xlu0 %v7924_v59, %s9714_s0 }
 0xe39   : > { %7920 = vrot.lane.b32.xlu1 %v7919_v20, %s9713_s29  ;;  %s9758_s29 = sld [smem:[#allocation14_spill]] }
 0xe3c   : > { %7935 = vrot.lane.b32.xlu0 %v7934_v50, %s9714_s0 }
 0xe3d   : > { %7930 = vrot.lane.b32.xlu1 %v7929_v52, %s9714_s0 }
 0xe40   : > { %7945 = vrot.lane.b32.xlu0 %v9403_v41, %s9715_s23 }
 0xe41   : > { %7940 = vrot.lane.b32.xlu1 %v9385_v62, %s9715_s23 }
 0xe44   : > { %7955 = vrot.lane.b32.xlu0 %v7954_v33, %s9716_s3  ;;  %v5837_v33 = vld [vmem:[%s9758_s29] sm:$0xff] }
 0xe45   : > { %7950 = vrot.lane.b32.xlu1 %v9399_v40, %s9715_s23 }
 0xe48   : > { %7965 = vrot.lane.b32.xlu0 %v7964_v1, %s9716_s3 }
 0xe49   : > { %7960 = vrot.lane.b32.xlu1 %v7959_v35, %s9716_s3  ;;  %s9759_s3 = sld [smem:[#allocation15_spill]] }
 0xe4c   : > { %7975 = vrot.lane.b32.xlu0 %v7974_v44, %s9717_s28 }
 0xe4d   : > { %7970 = vrot.lane.b32.xlu1 %v7969_v46, %s9717_s28 }
 0xe4f   : > { %v6834_v27 = vld [vmem:[%s9759_s3] sm:$0xff]  ;;  %s9774_s3 = sld [smem:[#allocation16_spill]] }
 0xe50   : > { %7985 = vrot.lane.b32.xlu0 %v9385_v62, %s9718_s26  ;;  %v5836_v62 = vmul.f32 %v9360_v25, %v9393_v6  ;;  %v7154_v25 = vld [vmem:[%s9758_s29 + $0x8] sm:$0xff] }
 0xe51   : > { %7980 = vrot.lane.b32.xlu1 %v7979_v4, %s9717_s28  ;;  %s9776_s28 = sshll.u32 %s9773_s22, 3 }
 0xe52   : > { %v7526_v17 = vpack.c.bf16 %v5836_v62, %v5834_v13  ;;  %s656_s12 = scalar_lea.vmem %s9777_s25, %s9776_s28 }
 0xe54   : > { %7995 = vrot.lane.b32.xlu0 %v9399_v40, %s9718_s26 }
 0xe55   : > { %7990 = vrot.lane.b32.xlu1 %v9403_v41, %s9718_s26  ;;  %v6844_v10 = vld [vmem:[%s9774_s3] sm:$0x7] }
 0xe9a   : > { %v7896_v5 = vpop.permute.xlu0 %7895 }
 0xe9b   : > { %v7898_v55 = vunpack.i.h.bf16 %v7896_v5  ;;  %v7897_v51 = vunpack.i.l.bf16 %v7896_v5 }
 0xe9d   : > { %v5861_v56 = vsel %vm9751_vm0, %v7897_v51, %v7898_v55  ;;  %vm9767_vm0 = vmmov %vm9765_vm3 }
 0xe9e   : > { %v7901_v58 = vpop.permute.xlu0 %7900 }
 0xe9f   : > { %v7906_v47 = vpop.permute.xlu1 %7905  ;;  %v7903_v63 = vunpack.i.h.bf16 %v7901_v58  ;;  %v7902_v57 = vunpack.i.l.bf16 %v7901_v58 }
 0xea0   : > { %v7908_v9 = vunpack.i.h.bf16 %v7906_v47  ;;  %v7907_v24 = vunpack.i.l.bf16 %v7906_v47 }
 0xea1   : > { %v5860_v54 = vsel %vm9752_vm4, %v7902_v57, %v7897_v51  ;;  %vm9768_vm4 = vmmov %vm9767_vm0 }
 0xea2   : > { %v5862_v40 = vsel %vm9753_vm5, %v7903_v63, %v7907_v24  ;;  %v5863_v41 = vsel %vm9754_vm6, %v7907_v24, %v7908_v9  ;;  %v6717_v11 = vpop.permute.xlu0 %6716  ;;  %vm9769_vm5 = vcmask 777216  }
 0xea3   : > { %v7520_v3 = vpack.c.bf16 %v5863_v41, %v5861_v56  ;;  %v7523_v7 = vpack.c.bf16 %v5862_v40, %v5860_v54  ;;  %v6715_v12 = vpop.permute.xlu1 %6714  ;;  %v6724_v18 = vmul.f32 %v6717_v11, %v9381_v61  ;;  %v6727_v19 = vmul.f32 %v6717_v11, %v9391_v0  ;;  %v7161_v54 = vld [vmem:[%s9758_s29 + $0x10] sm:$0xff]  ;;  %vm9770_vm6 = vmmov %vm9769_vm5 }
 0xea4   : > { %v6718_v16 = vsel %vm1499_vm11, %v6715_v12, %v6717_v11  ;;  %v6722_v53 = vmul.f32 %v6715_v12, %v9395_v8  ;;  %v6725_v59 = vmul.f32 %v6715_v12, %v9389_v37  ;;  %v5833_v61 = vmul.f32 %v9356_v23, %v9395_v8 }
 0xea5   : > { %7522 = vmatprep.subr.msk.bf16.mxu0 %vm9470_vm14, %v7520_v3  ;;  %v6726_v20 = vmul.f32 %v6718_v16, %v9393_v6  ;;  %v6723_v45 = vmul.f32 %v6718_v16, %v9374_v48  ;;  %vm9761_vm11 = vcmask 908288  }
 0xea6   : > { %7525 = vmatpush1.bf16.msk.msra.mxu0 %vm9470_vm14, %v7523_v7  ;;  %v7916_v15 = vpop.permute.xlu0 %7915  ;;  %v7529_v21 = vpack.c.bf16 %v5835_v60, %v5833_v61  ;;  %v8009_v28 = vpack.i.bf16 %v6725_v59, %v6722_v53  ;;  %vm9764_vm8 = vmmov %vm9761_vm11  ;;  %v7165_v53 = vld [vmem:[%s9758_s29 + $0x18] sm:$0xff] }
 0xea7   : > { %v7911_v49 = vpop.permute.xlu1 %7910  ;;  %7528 = vmatprep.subr.msk.bf16.mxu0 %vm9470_vm14, %v7526_v17  ;;  %v8004_v48 = vpack.i.bf16 %v6727_v19, %v6726_v20  ;;  %v7999_v0 = vpack.i.bf16 %v6724_v18, %v6723_v45  ;;  %v7918_v6 = vunpack.i.h.bf16 %v7916_v15  ;;  %v7917_v50 = vunpack.i.l.bf16 %v7916_v15 }
 0xea8   : > { %v7913_v52 = vunpack.i.h.bf16 %v7911_v49  ;;  %v7912_v22 = vunpack.i.l.bf16 %v7911_v49 }
 0xea9   : > { %7157 = vmatmul.mubr.msk.f32.vlgmr.msra.gmra.mrb[10].mxu0 %vm5866_vm15, %v7154_v25  ;;  %v6071_v26 = vsel %vm912_vm12, %v7917_v50, %v7918_v6  ;;  %8005 = vrot.lane.b32.xlu0 %v8004_v48, %s9720_s24 }
 0xeaa   : > { %8000 = vrot.lane.b32.xlu1 %v7999_v0, %s9720_s24  ;;  %v6069_v37 = vsel %vm912_vm12, %v7912_v22, %v7913_v52  ;;  %7531 = vmatpush1.bf16.msk.msra.mxu0 %vm9470_vm14, %v7529_v21  ;;  %v7926_v23 = vpop.permute.xlu0 %7925 }
 0xeab   : > { %v7921_v8 = vpop.permute.xlu1 %7920  ;;  %6018 = vmatprep.mubr.f32.mxu0 %v8023_v2  ;;  %v7532_v29 = vpack.c.bf16 %v6071_v26, %v6069_v37  ;;  %v7928_v34 = vunpack.i.h.bf16 %v7926_v23  ;;  %v7927_v1 = vunpack.i.l.bf16 %v7926_v23 }
 0xeac   : > { %v7923_v30 = vunpack.i.h.bf16 %v7921_v8  ;;  %v7922_v31 = vunpack.i.l.bf16 %v7921_v8 }
 0xead   : > { %6837 = vperm.xlu0 %7717, %v6834_v27   ;;  %7534 = vmatprep.subr.msk.bf16.mxu0 %vm9470_vm14, %v7532_v29  ;;  %v6189_v4 = vsel %vm1018_vm13, %v7927_v1, %v7928_v34  ;;  %v7169_v29 = vld [vmem:[%s9758_s29 + $0x20] sm:$0xff] }
 0xeae   : > { %v6070_v32 = vsel %vm912_vm12, %v7923_v30, %v7917_v50  ;;  %8010 = vrot.lane.b32.xlu1 %v8009_v28, %s9720_s24  ;;  %v6068_v35 = vsel %vm912_vm12, %v7922_v31, %v7912_v22  ;;  %v7936_v36 = vpop.permute.xlu0 %7935  ;;  %vm9762_vm12 = vmmov %vm9761_vm11 }
 0xeaf   : > { %v7931_v14 = vpop.permute.xlu1 %7930  ;;  %v7535_v39 = vpack.c.bf16 %v6070_v32, %v6068_v35  ;;  %v7938_v43 = vunpack.i.h.bf16 %v7936_v36  ;;  %v7937_v44 = vunpack.i.l.bf16 %v7936_v36 }
 0xeb0   : > { %v7933_v42 = vunpack.i.h.bf16 %v7931_v14  ;;  %v7932_v46 = vunpack.i.l.bf16 %v7931_v14 }
 0xeb1   : > { %7160 = vmatmul.mubr.msk.f32.vlgmr.msra.gmra.mrb[10].mxu0 %vm5866_vm15, %v5837_v33  ;;  %v6188_v57 = vsel %vm1018_vm13, %v7937_v44, %v7927_v1 }
 0xeb2   : > { %6848 = vperm.xlu1 %7733, %v6845_v38   ;;  %7537 = vmatpush1.bf16.msk.msra.mxu0 %vm9470_vm14, %v7535_v39  ;;  %v6191_v5 = vsel %vm1018_vm13, %v7932_v46, %v7933_v42  ;;  %v7946_v55 = vpop.permute.xlu0 %7945  ;;  %v6190_v9 = vsel %vm1018_vm13, %v7938_v43, %v7932_v46  ;;  %vm9763_vm13 = vmmov %vm9761_vm11  ;;  %v7173_v46 = vld [vmem:[%s9758_s29 + $0x28] sm:$0xff] }
 0xeb3   : > { %v7941_v51 = vpop.permute.xlu1 %7940  ;;  %6145 = vmatprep.mubr.f32.mxu0 %v8023_v2  ;;  %v7538_v58 = vpack.c.bf16 %v6191_v5, %v6189_v4  ;;  %v7948_v47 = vunpack.i.h.bf16 %v7946_v55  ;;  %v7947_v63 = vunpack.i.l.bf16 %v7946_v55  ;;  %v7541_v7 = vpack.c.bf16 %v6190_v9, %v6188_v57  ;;  %v7177_v57 = vld [vmem:[%s9758_s29 + $0x30] sm:$0xff] }
 0xeb4   : > { %v7943_v24 = vunpack.i.h.bf16 %v7941_v51  ;;  %v7942_v62 = vunpack.i.l.bf16 %v7941_v51 }
 0xeb5   : > { %v6291_v56 = vsel %vm9761_vm11, %v7947_v63, %v7948_v47  ;;  %7540 = vmatprep.subr.msk.bf16.mxu0 %vm9470_vm14, %v7538_v58 }
 0xeb6   : > { %v6289_v40 = vsel %vm9762_vm12, %v7942_v62, %v7943_v24  ;;  %v7956_v41 = vpop.permute.xlu0 %7955  ;;  %v7181_v24 = vld [vmem:[%s9758_s29 + $0x38] sm:$0xff] }
 0xeb7   : > { %v7951_v3 = vpop.permute.xlu1 %7950  ;;  %v7544_v11 = vpack.c.bf16 %v6291_v56, %v6289_v40  ;;  %v7958_v16 = vunpack.i.h.bf16 %v7956_v41  ;;  %v7957_v17 = vunpack.i.l.bf16 %v7956_v41 }
 0xeb8   : > { %v7953_v12 = vunpack.i.h.bf16 %v7951_v3  ;;  %v7952_v13 = vunpack.i.l.bf16 %v7951_v3 }
 0xeb9   : > { %7164 = vmatmul.mubr.msk.f32.vlgmr.msra.gmra.mrb[10].mxu0 %vm5866_vm15, %v7161_v54  ;;  %v6409_v59 = vsel %vm9765_vm3, %v7957_v17, %v7958_v16 }
 0xeba   : > { %7543 = vmatpush1.bf16.msk.msra.mxu0 %vm9470_vm14, %v7541_v7  ;;  %6265 = vmatprep.mubr.f32.mxu0 %v8023_v2  ;;  %v7966_v60 = vpop.permute.xlu0 %7965  ;;  %v6290_v20 = vsel %vm9763_vm13, %v7953_v12, %v7947_v63  ;;  %v6288_v45 = vsel %vm9764_vm8, %v7952_v13, %v7942_v62 }
 0xebb   : > { %7546 = vmatprep.subr.msk.bf16.mxu0 %vm9470_vm14, %v7544_v11  ;;  %v7961_v18 = vpop.permute.xlu1 %7960  ;;  %v7547_v48 = vpack.c.bf16 %v6290_v20, %v6288_v45  ;;  %v7968_v6 = vunpack.i.h.bf16 %v7966_v60  ;;  %v7967_v50 = vunpack.i.l.bf16 %v7966_v60  ;;  %v7185_v20 = vld [vmem:[%s9758_s29 + $0x40] sm:$0xff] }
 0xebc   : > { %v7963_v19 = vunpack.i.h.bf16 %v7961_v18  ;;  %v7962_v25 = vunpack.i.l.bf16 %v7961_v18 }
 0xebd   : > { %v6408_v23 = vsel %vm9767_vm0, %v7967_v50, %v7957_v17 }
 0xebe   : > { %v6411_v15 = vsel %vm9766_vm9, %v7962_v25, %v7963_v19  ;;  %v7976_v49 = vpop.permute.xlu0 %7975  ;;  %v6410_v8 = vsel %vm9768_vm4, %v7968_v6, %v7962_v25 }
 0xebf   : > { %v7971_v61 = vpop.permute.xlu1 %7970  ;;  %v7550_v0 = vpack.c.bf16 %v6411_v15, %v6409_v59  ;;  %v7978_v52 = vunpack.i.h.bf16 %v7976_v49  ;;  %v7977_v22 = vunpack.i.l.bf16 %v7976_v49  ;;  %v7553_v31 = vpack.c.bf16 %v6410_v8, %v6408_v23 }
 0xec0   : > { %v7973_v21 = vunpack.i.h.bf16 %v7971_v61  ;;  %v7972_v26 = vunpack.i.l.bf16 %v7971_v61 }
 0xec1   : > { %7168 = vmatmul.mubr.msk.f32.vlgmr.msra.gmra.mrb[10].mxu0 %vm5866_vm15, %v7165_v53  ;;  %v6531_v27 = vsel %vm1321_vm1, %v7977_v22, %v7978_v52 }
 0xec2   : > { %7549 = vmatpush1.bf16.msk.msra.mxu0 %vm9470_vm14, %v7547_v48  ;;  %6365 = vmatprep.mubr.f32.mxu0 %v8023_v2  ;;  %v6529_v28 = vsel %vm1321_vm1, %v7972_v26, %v7973_v21  ;;  %v7986_v32 = vpop.permute.xlu0 %7985 }
 0xec3   : > { %7552 = vmatprep.subr.msk.bf16.mxu0 %vm9470_vm14, %v7550_v0  ;;  %v7981_v37 = vpop.permute.xlu1 %7980  ;;  %v7556_v33 = vpack.c.bf16 %v6531_v27, %v6529_v28  ;;  %v7988_v14 = vunpack.i.h.bf16 %v7986_v32  ;;  %v7987_v38 = vunpack.i.l.bf16 %v7986_v32 }
 0xec4   : > { %v7983_v34 = vunpack.i.h.bf16 %v7981_v37  ;;  %v7982_v1 = vunpack.i.l.bf16 %v7981_v37 }
 0xec5   : > { %v6629_v4 = vsel %vm9770_vm6, %v7987_v38, %v7988_v14 }
 0xec6   : > { %v6530_v39 = vsel %vm1321_vm1, %v7983_v34, %v7977_v22  ;;  %v6528_v42 = vsel %vm1321_vm1, %v7982_v1, %v7972_v26  ;;  %v7996_v43 = vpop.permute.xlu0 %7995  ;;  %vm9771_vm1 = vmmov %vm9769_vm5 }
 0xec7   : > { %v7991_v30 = vpop.permute.xlu1 %7990  ;;  %v7559_v5 = vpack.c.bf16 %v6530_v39, %v6528_v42  ;;  %v7998_v55 = vunpack.i.h.bf16 %v7996_v43  ;;  %v7997_v51 = vunpack.i.l.bf16 %v7996_v43  ;;  %vm9772_vm7 = vmmov %vm9771_vm1 }
 0xec8   : > { %v7993_v35 = vunpack.i.h.bf16 %v7991_v30  ;;  %v7992_v36 = vunpack.i.l.bf16 %v7991_v30 }
 0xec9   : > { %7172 = vmatmul.mubr.msk.f32.vlgmr.msra.gmra.mrb[10].mxu0 %vm5866_vm15, %v7169_v29  ;;  %v6628_v47 = vsel %vm9771_vm1, %v7997_v51, %v7987_v38 }
 0xeca   : > { %7555 = vmatpush1.bf16.msk.msra.mxu0 %vm9470_vm14, %v7553_v31  ;;  %6485 = vmatprep.mubr.f32.mxu0 %v8023_v2  ;;  %v6631_v44 = vsel %vm9769_vm5, %v7992_v36, %v7993_v35  ;;  %v6630_v63 = vsel %vm9772_vm7, %v7998_v55, %v7992_v36 }
 0xecb   : > { %7558 = vmatprep.subr.msk.bf16.mxu0 %vm9470_vm14, %v7556_v33  ;;  %v7562_v58 = vpack.c.bf16 %v6631_v44, %v6629_v4  ;;  %v7565_v9 = vpack.c.bf16 %v6630_v63, %v6628_v47 }
 0xed1   : > { %7176 = vmatmul.mubr.msk.f32.vlgmr.msra.gmra.mrb[10].mxu0 %vm5866_vm15, %v7173_v46 }
 0xed2   : > { %7561 = vmatpush1.bf16.msk.msra.mxu0 %vm9470_vm14, %v7559_v5  ;;  %6605 = vmatprep.mubr.f32.mxu0 %v8023_v2 }
 0xed3   : > { %7564 = vmatprep.subr.msk.bf16.mxu0 %vm9470_vm14, %v7562_v58 }
 0xed9   : > { %7180 = vmatmul.mubr.msk.f32.vlgmr.msra.gmra.mrb[10].mxu0 %vm5866_vm15, %v7177_v57 }
 0xeda   : > { %7567 = vmatpush1.bf16.msk.msra.mxu0 %vm9470_vm14, %v7565_v9  ;;  %6705 = vmatprep.mubr.f32.mxu0 %v8023_v2 }
 0xee1   : > { %7184 = vmatmul.mubr.msk.f32.vlgmr.msra.gmra.mrb[10].mxu0 %vm5866_vm15, %v7181_v24 }
 0xee2   : > { %6825 = vmatprep.mubr.f32.mxu0 %v8023_v2 }
 0xf1b   : > { %v8006_v62 = vpop.permute.xlu0 %8005 }
 0xf1c   : > { %v8001_v56 = vpop.permute.xlu1 %8000  ;;  %v8008_v54 = vunpack.i.h.bf16 %v8006_v62  ;;  %v8007_v40 = vunpack.i.l.bf16 %v8006_v62 }
 0xf1d   : > { %v8003_v41 = vunpack.i.h.bf16 %v8001_v56  ;;  %v8002_v3 = vunpack.i.l.bf16 %v8001_v56 }
 0xf1e   : > { %v6751_v7 = vsel %vm1518_vm2, %v8007_v40, %v8008_v54 }
 0xf1f   : > { %v6749_v11 = vsel %vm1518_vm2, %v8002_v3, %v8003_v41 }
 0xf20   : > { %v7568_v12 = vpack.c.bf16 %v6751_v7, %v6749_v11  ;;  %v8011_v13 = vpop.permute.xlu1 %8010 }
 0xf21   : > { %v8013_v16 = vunpack.i.h.bf16 %v8011_v13  ;;  %v8012_v17 = vunpack.i.l.bf16 %v8011_v13 }
 0xf22   : > { %7570 = vmatprep.subr.msk.bf16.mxu0 %vm9470_vm14, %v7568_v12 }
 0xf23   : > { %v6750_v60 = vsel %vm1518_vm2, %v8013_v16, %v8007_v40  ;;  %v6748_v18 = vsel %vm1518_vm2, %v8012_v17, %v8002_v3  ;;  %vm9775_vm2 = vcmask 64512  }
 0xf24   : > { %v7571_v19 = vpack.c.bf16 %v6750_v60, %v6748_v18 }
 0xf26   : > { %7573 = vmatpush1.bf16.msk.msra.mxu0 %vm9470_vm14, %v7571_v19 }
 0xf29   : > { %7188 = vmatmul.mubr.msk.f32.vlgmr.msra.gmra.mrb[10].mxu0 %vm5866_vm15, %v7185_v20 }
 0xf2a   : > { %6918 = vmatprep.mubr.f32.mxu0 %v8023_v2 }
 0xf2c   : > { %v6838_v45 = vpop.permute.xlu0 %6837 }
 0xf31   : > { %v6849_v48 = vpop.permute.xlu1 %6848 }
 0xffc   : > { %v6827_v25 = vpop.f32.mrb[10].mxu0 }
 0xffd   : > { %v6840_v53 = vadd.f32 %v6838_v45, %v6827_v25  ;;  %v6829_v59 = vpop.f32.mrb[11].mxu0 }
 0xffe   : > { %v6841_v15 = vadd.f32 %v6838_v45, %v6829_v59 }
 0xfff   : > { %v6842_v61 = vmax.f32 %v6840_v53, 0.0 }
0x1000   : > { %v6843_v49 = vmax.f32 %v6841_v15, 0.0 }
0x1002   : > { %6854 = vmatprep.subr.mxu0 %v6843_v49 }
0x1003   : > { %6855 = vmatpush1.msra.mxu0 %v6842_v61 }
0x1004   : > { %7189 = vmatmul.mubr.msk.f32.vlgmr.msra.gmra.mrb[12].mxu0 %vm9775_vm2, %v6844_v10 }
0x10d7   : > { %v6920_v0 = vpop.f32.mrb[12].mxu0 }
0x10d8   : > { %v6921_v6 = vadd.f32 %v6920_v0, %v6849_v48  ;;  %v6922_v2 = vpop.f32.mrb[13].mxu0 }
0x10d9   : > { %v6923_v50 = vadd.f32 %v6922_v2, %v6849_v48 }
0x10db   : > { %v6927_v52 = vcombine.low %v6921_v6, %v6923_v50 }
0x10dd   : > { %6929 = vst [vmem:[%s656_s12] sm:$0x77] %v6927_v52 }
0x10de PF: > { %s9778_s24 = sld [smem:[#allocation4_spill]] }
0x10e4   : > { %s31_s2 = sadd.s32 1, %s9778_s24  }
0x10e5   : > { %p28_p4 = scmp.ge.s32.totalorder %s31_s2, 4  }
0x10e7   :  { %30 = sbr.rel (!%p28_p4) target bundleno = 16 (0x10), region = 182 }

</bundles_post_ra>
